<compile_context>
chip_gen: v7x
topology: tpu7x:2x2x1
jax: 0.10.0
libtpu: 0.0.40
codegen_flags: <defaults>
</compile_context>

<pallas_src>
import jax
import jax.numpy as jnp
from jax.experimental import pallas as pl
from jax.experimental.pallas import tpu as pltpu

IN_FEATURES = 3 * 64 * 64   # 12288
HIDDEN = 100                # kept unpadded end-to-end (full-dim blocks are legal)
OUT = 6
OUT_PAD = 128               # lane-pad output dim only; sliced back to 6 in wrapper


def mlp_kernel(x_ref, w1_ref, b1_ref, w2_ref, b2_ref, out_ref):
    # First Linear: (Bp, K) f32 -> bf16  @  (K, 100) bf16, f32 MXU accumulation.
    x_bf = x_ref[...].astype(jnp.bfloat16)
    h = jnp.dot(x_bf, w1_ref[...], preferred_element_type=jnp.float32)
    h = jnp.maximum(h + b1_ref[...], 0.0)                       # bias + ReLU (f32)
    # Second Linear: bf16 x bf16 -> f32 (single MXU pass on v5e too), f32 bias.
    y = jnp.dot(h.astype(jnp.bfloat16), w2_ref[...],
                preferred_element_type=jnp.float32)
    out_ref[...] = (y + b2_ref[...]).astype(out_ref.dtype)


def pack_params(w1, b1, w2, b2):
    """One-time parameter packing.  Call at init/load time, NOT per forward."""
    w1p = w1.astype(jnp.bfloat16)                                         # (K, 100)
    b1p = b1.reshape(1, HIDDEN).astype(jnp.float32)                       # (1, 100)
    w2p = jnp.pad(w2, ((0, 0), (0, OUT_PAD - OUT))).astype(jnp.bfloat16)  # (100, 128)
    b2p = jnp.pad(b2.reshape(1, OUT),
                  ((0, 0), (0, OUT_PAD - OUT))).astype(jnp.float32)       # (1, 128)
    return w1p, b1p, w2p, b2p


def mlp_classifier_forward(x_nchw, packed_params):
    """x_nchw: (B, 3, 64, 64) f32; packed_params from pack_params().
    Returns (B, 6) f32, matching torch: Linear -> ReLU -> Linear on x.view(B,-1)."""
    w1p, b1p, w2p, b2p = packed_params
    B = x_nchw.shape[0]
    B_pad = ((B + 7) // 8) * 8

    # Flatten exactly like torch's x.view(B, -1); keep f32 (cast happens in-kernel).
    x_flat = x_nchw.reshape(B, -1)
    if B_pad != B:
        x_flat = jnp.pad(x_flat, ((0, B_pad - B), (0, 0)))

    out_pad = pl.pallas_call(
        mlp_kernel,
        out_shape=jax.ShapeDtypeStruct((B_pad, OUT_PAD), jnp.float32),
        grid_spec=pltpu.PrefetchScalarGridSpec(
            num_scalar_prefetch=0,
            grid=(1,),  # single step: full-K tile, no accumulator scratch needed
            in_specs=[
                pl.BlockSpec((B_pad, IN_FEATURES), lambda k: (0, 0)),   # x (f32)
                pl.BlockSpec((IN_FEATURES, HIDDEN), lambda k: (0, 0)),  # W1 (bf16, unpadded)
                pl.BlockSpec((1, HIDDEN), lambda k: (0, 0)),            # b1 (f32)
                pl.BlockSpec((HIDDEN, OUT_PAD), lambda k: (0, 0)),      # W2 (bf16)
                pl.BlockSpec((1, OUT_PAD), lambda k: (0, 0)),           # b2 (f32)
            ],
            out_specs=pl.BlockSpec((B_pad, OUT_PAD), lambda k: (0, 0)),
        ),
        compiler_params=pltpu.CompilerParams(
            dimension_semantics=("arbitrary",),
        ),
    )(x_flat, w1p, b1p, w2p, b2p)

    return out_pad[:B, :OUT]


def init_params(key):
    # PyTorch-like uniform(-1/sqrt(fan_in), +1/sqrt(fan_in)) init, f32 masters.
    k1, k2, k3, k4 = jax.random.split(key, 4)
    lim1 = 1.0 / jnp.sqrt(jnp.float32(IN_FEATURES))
    lim2 = 1.0 / jnp.sqrt(jnp.float32(HIDDEN))
    w1 = jax.random.uniform(k1, (IN_FEATURES, HIDDEN), jnp.float32, -lim1, lim1)
    b1 = jax.random.uniform(k2, (1, HIDDEN), jnp.float32, -lim1, lim1)
    w2 = jax.random.uniform(k3, (HIDDEN, OUT), jnp.float32, -lim2, lim2)
    b2 = jax.random.uniform(k4, (1, OUT), jnp.float32, -lim2, lim2)
    return w1, b1, w2, b2


if __name__ == "__main__":
    key = jax.random.PRNGKey(0)
    kx, kp = jax.random.split(key)

    B = 2
    x = jax.random.normal(kx, (B, 3, 64, 64), jnp.float32)  # NCHW like PyTorch
    w1, b1, w2, b2 = init_params(kp)

    # Pack ONCE (load-time), then call the forward with packed buffers.
    packed = jax.block_until_ready(pack_params(w1, b1, w2, b2))

    out = mlp_classifier_forward(x, packed)
    out = jax.block_until_ready(out)
    assert out.shape == (B, OUT)

    x_flat = x.reshape(B, -1)

    # Tight check against a reference that applies the same bf16 roundings the
    # kernel does (x, W1, h, W2 in bf16; f32 accumulation and bias adds).
    x_bf = x_flat.astype(jnp.bfloat16).astype(jnp.float32)
    w1_bf = w1.astype(jnp.bfloat16).astype(jnp.float32)
    h_ref = jnp.maximum(x_bf @ w1_bf + b1, 0.0)
    h_bf = h_ref.astype(jnp.bfloat16).astype(jnp.float32)
    w2_bf = w2.astype(jnp.bfloat16).astype(jnp.float32)
    ref_bf = h_bf @ w2_bf + b2
    assert jnp.allclose(out, ref_bf, atol=2e-3, rtol=2e-3)

    # Loose check against the pure-f32 PyTorch-equivalent reference (tolerance
    # widened because x/W1/h/W2 are handled in bf16 for HBM/MXU efficiency).
    ref_f32 = jnp.maximum(x_flat @ w1 + b1, 0.0) @ w2 + b2
    assert jnp.allclose(out, ref_f32, atol=2e-2, rtol=2e-2)

    print("KERNEL_OK")
</pallas_src>

<mosaic_0001>
module attributes {stable_mosaic.version = 11 : i64} {
  func.func @mlp_kernel(%arg0: i32, %arg1: memref<8x12288xf32, #tpu.memory_space<vmem>>, %arg2: memref<12288x100xbf16, #tpu.memory_space<vmem>>, %arg3: memref<1x100xf32, #tpu.memory_space<vmem>>, %arg4: memref<100x128xbf16, #tpu.memory_space<vmem>>, %arg5: memref<1x128xf32, #tpu.memory_space<vmem>>, %arg6: memref<8x128xf32, #tpu.memory_space<vmem>>) attributes {dimension_semantics = [#tpu.dimension_semantics<arbitrary>], iteration_bounds = array<i64: 1>, scalar_prefetch = 0 : i64, scratch_operands = 0 : i64, tpu.core_type = #tpu.core_type<tc>, window_params = [{pipeline_mode = #tpu.pipeline_mode<synchronous>, transform_indices = @transform_0, window_bounds = array<i64: 8, 12288>}, {pipeline_mode = #tpu.pipeline_mode<synchronous>, transform_indices = @transform_1, window_bounds = array<i64: 12288, 100>}, {pipeline_mode = #tpu.pipeline_mode<synchronous>, transform_indices = @transform_2, window_bounds = array<i64: 1, 100>}, {pipeline_mode = #tpu.pipeline_mode<synchronous>, transform_indices = @transform_3, window_bounds = array<i64: 100, 128>}, {pipeline_mode = #tpu.pipeline_mode<synchronous>, transform_indices = @transform_4, window_bounds = array<i64: 1, 128>}, {pipeline_mode = #tpu.pipeline_mode<synchronous>, transform_indices = @transform_5, window_bounds = array<i64: 8, 128>}]} {
    %c0 = arith.constant 0 : index
    %c0_0 = arith.constant 0 : index
    %0 = vector.load %arg1[%c0, %c0_0] : memref<8x12288xf32, #tpu.memory_space<vmem>>, vector<8x12288xf32>
    %1 = arith.truncf %0 : vector<8x12288xf32> to vector<8x12288xbf16>
    %c0_1 = arith.constant 0 : index
    %c0_2 = arith.constant 0 : index
    %2 = vector.load %arg2[%c0_1, %c0_2] : memref<12288x100xbf16, #tpu.memory_space<vmem>>, vector<12288x100xbf16>
    %cst = arith.constant dense<0.000000e+00> : vector<8x100xf32>
    %3 = tpu.matmul %1, %2, %cst {dimension_numbers = #tpu.dot_dimension_numbers<[1], [0], [0], [1], [0, 0, 1, 1], [], []>} : vector<8x12288xbf16>, vector<12288x100xbf16>, vector<8x100xf32> -> vector<8x100xf32>
    %c0_3 = arith.constant 0 : index
    %c0_4 = arith.constant 0 : index
    %4 = vector.load %arg3[%c0_3, %c0_4] : memref<1x100xf32, #tpu.memory_space<vmem>>, vector<1x100xf32>
    %5 = vector.broadcast %4 : vector<1x100xf32> to vector<8x100xf32>
    %6 = arith.addf %3, %5 : vector<8x100xf32>
    %cst_5 = arith.constant 0.000000e+00 : f32
    %7 = vector.broadcast %cst_5 : f32 to vector<8x100xf32>
    %8 = arith.maximumf %6, %7 : vector<8x100xf32>
    %9 = arith.truncf %8 : vector<8x100xf32> to vector<8x100xbf16>
    %c0_6 = arith.constant 0 : index
    %c0_7 = arith.constant 0 : index
    %10 = vector.load %arg4[%c0_6, %c0_7] : memref<100x128xbf16, #tpu.memory_space<vmem>>, vector<100x128xbf16>
    %cst_8 = arith.constant dense<0.000000e+00> : vector<8x128xf32>
    %11 = tpu.matmul %9, %10, %cst_8 {dimension_numbers = #tpu.dot_dimension_numbers<[1], [0], [0], [1], [0, 0, 1, 1], [], []>} : vector<8x100xbf16>, vector<100x128xbf16>, vector<8x128xf32> -> vector<8x128xf32>
    %c0_9 = arith.constant 0 : index
    %c0_10 = arith.constant 0 : index
    %12 = vector.load %arg5[%c0_9, %c0_10] : memref<1x128xf32, #tpu.memory_space<vmem>>, vector<1x128xf32>
    %13 = vector.broadcast %12 : vector<1x128xf32> to vector<8x128xf32>
    %14 = arith.addf %11, %13 : vector<8x128xf32>
    %c0_11 = arith.constant 0 : index
    %c0_12 = arith.constant 0 : index
    %15 = vector.load %arg6[%c0_11, %c0_12] : memref<8x128xf32, #tpu.memory_space<vmem>>, vector<8x128xf32>
    tpu.vector_store %arg6[%c0_11, %c0_12], %14 {strides = array<i32>} : memref<8x128xf32, #tpu.memory_space<vmem>>, vector<8x128xf32>,
    return
  }
  func.func @transform_0(%arg0: i32) -> (i32, i32) {
    %c0_i32 = arith.constant 0 : i32
    %c0_i32_0 = arith.constant 0 : i32
    %c0_i32_1 = arith.constant 0 : i32
    return %c0_i32, %c0_i32_0 : i32, i32
  }
  func.func @transform_1(%arg0: i32) -> (i32, i32) {
    %c0_i32 = arith.constant 0 : i32
    %c0_i32_0 = arith.constant 0 : i32
    %c0_i32_1 = arith.constant 0 : i32
    return %c0_i32, %c0_i32_0 : i32, i32
  }
  func.func @transform_2(%arg0: i32) -> (i32, i32) {
    %c0_i32 = arith.constant 0 : i32
    %c0_i32_0 = arith.constant 0 : i32
    %c0_i32_1 = arith.constant 0 : i32
    return %c0_i32, %c0_i32_0 : i32, i32
  }
  func.func @transform_3(%arg0: i32) -> (i32, i32) {
    %c0_i32 = arith.constant 0 : i32
    %c0_i32_0 = arith.constant 0 : i32
    %c0_i32_1 = arith.constant 0 : i32
    return %c0_i32, %c0_i32_0 : i32, i32
  }
  func.func @transform_4(%arg0: i32) -> (i32, i32) {
    %c0_i32 = arith.constant 0 : i32
    %c0_i32_0 = arith.constant 0 : i32
    %c0_i32_1 = arith.constant 0 : i32
    return %c0_i32, %c0_i32_0 : i32, i32
  }
  func.func @transform_5(%arg0: i32) -> (i32, i32) {
    %c0_i32 = arith.constant 0 : i32
    %c0_i32_0 = arith.constant 0 : i32
    %c0_i32_1 = arith.constant 0 : i32
    return %c0_i32, %c0_i32_0 : i32, i32
  }
}

</mosaic_0001>

<bundles_post_ra>
// kernel: tpu_custom_call.1
= control target key start
LH: loop header
LB: loop body
LE: loop exit
PB: predicated region body
PF: predicated region fallthrough
CT: control target
= control target key end

     0   :  { %s13783_s0 = inlined_call_operand.vmem [shape: f32[8,12288], index: 0, kind: input, shape index: {}]   ;;  %s13784_s1 = inlined_call_operand.vmem [shape: bf16[12288,100], index: 1, kind: input, shape index: {}]   ;;  %s13785_s2 = inlined_call_operand.vmem [shape: f32[1,100], index: 2, kind: input, shape index: {}]   ;;  %s13786_s3 = inlined_call_operand.vmem [shape: bf16[100,128], index: 3, kind: input, shape index: {}]   ;;  %s13787_s4 = inlined_call_operand.vmem [shape: f32[1,128], index: 4, kind: input, shape index: {}]   ;;  %s13788_s5 = inlined_call_operand.hbm [shape: f32[8,128], index: 5, kind: output, shape index: {}]  }
   0x1   :  { %v10272_v0 = vld [vmem:[%s13784_s1 + $0x40] sm:$0xff]   ;;  %v10276_v4 = vld [vmem:[%s13784_s1 + $0x48] sm:$0xff]   ;;  %v10280_v8 = vld [vmem:[%s13784_s1 + $0x50] sm:$0xff]  }
   0x2   :  { %v10273_v1 = vld [vmem:[%s13784_s1 + $0xc0] sm:$0xff]   ;;  %9187 = vmatprep.subr.bf16.mxu0 %v10272_v0  ;;  %v10277_v5 = vld [vmem:[%s13784_s1 + $0xc8] sm:$0xff]   ;;  %v10281_v9 = vld [vmem:[%s13784_s1 + $0xd0] sm:$0xff]  }
   0x3   :  { %v10274_v2 = vld [vmem:[%s13784_s1] sm:$0xff]   ;;  %9209 = vmatprep.subr.bf16.mxu1 %v10273_v1  ;;  %v10278_v6 = vld [vmem:[%s13784_s1 + $0x8] sm:$0xff]   ;;  %v10282_v10 = vld [vmem:[%s13784_s1 + $0x10] sm:$0xff]  }
   0x4   :  { %v10275_v3 = vld [vmem:[%s13784_s1 + $0x80] sm:$0xff]   ;;  %9188 = vmatpush3.bf16.msra.mxu0 %v10274_v2  ;;  %v10279_v7 = vld [vmem:[%s13784_s1 + $0x88] sm:$0xff]   ;;  %v10283_v11 = vld [vmem:[%s13784_s1 + $0x90] sm:$0xff]  }
   0x5   :  { %9210 = vmatpush3.bf16.msra.mxu1 %v10275_v3  ;;  %9189 = vmatprep.subr.bf16.mxu0 %v10276_v4  ;;  %v10284_v12 = vld [vmem:[%s13784_s1 + $0x58] sm:$0xff]   ;;  %v10288_v16 = vld [vmem:[%s13784_s1 + $0x60] sm:$0xff]   ;;  %v10292_v20 = vld [vmem:[%s13784_s1 + $0x68] sm:$0xff]  }
   0x6   :  { %9211 = vmatprep.subr.bf16.mxu1 %v10277_v5  ;;  %v10285_v13 = vld [vmem:[%s13784_s1 + $0xd8] sm:$0xff]   ;;  %v10289_v17 = vld [vmem:[%s13784_s1 + $0xe0] sm:$0xff]   ;;  %v10293_v21 = vld [vmem:[%s13784_s1 + $0xe8] sm:$0xff]  }
   0x7   :  { %v10286_v14 = vld [vmem:[%s13784_s1 + $0x18] sm:$0xff]   ;;  %v10290_v18 = vld [vmem:[%s13784_s1 + $0x20] sm:$0xff]   ;;  %v10294_v22 = vld [vmem:[%s13784_s1 + $0x28] sm:$0xff]  }
   0x8   :  { %9190 = vmatpush3.bf16.msra.mxu0 %v10278_v6  ;;  %v10287_v15 = vld [vmem:[%s13784_s1 + $0x98] sm:$0xff]   ;;  %v10291_v19 = vld [vmem:[%s13784_s1 + $0xa0] sm:$0xff]   ;;  %v10295_v23 = vld [vmem:[%s13784_s1 + $0xa8] sm:$0xff]  }
   0x9   :  { %9212 = vmatpush3.bf16.msra.mxu1 %v10279_v7  ;;  %9191 = vmatprep.subr.bf16.mxu0 %v10280_v8  ;;  %v10296_v24 = vld [vmem:[%s13784_s1 + $0x70] sm:$0xff]   ;;  %v10300_v28 = vld [vmem:[%s13784_s1 + $0x78] sm:$0xff]   ;;  %v23_v32 = vld [vmem:[%s13783_s0 + $0x8] sm:$0xff] }
   0xa   :  { %9213 = vmatprep.subr.bf16.mxu1 %v10281_v9  ;;  %v10297_v25 = vld [vmem:[%s13784_s1 + $0xf0] sm:$0xff]   ;;  %v10301_v29 = vld [vmem:[%s13784_s1 + $0xf8] sm:$0xff]   ;;  %v22_v34 = vld [vmem:[%s13783_s0] sm:$0xff]  ;;  %v119_v35 = vpack.c.bf16 %v23_v32, %v23_v32 }
   0xb   :  { %v10298_v26 = vld [vmem:[%s13784_s1 + $0x30] sm:$0xff]   ;;  %v10302_v30 = vld [vmem:[%s13784_s1 + $0x38] sm:$0xff]   ;;  %v118_v37 = vpack.c.bf16 %v22_v34, %v22_v34  ;;  %v10304_v40 = vld [vmem:[%s13784_s1 + $0x140] sm:$0xff]  }
   0xc   :  { %9192 = vmatpush3.bf16.msra.mxu0 %v10282_v10  ;;  %v10299_v27 = vld [vmem:[%s13784_s1 + $0xb0] sm:$0xff]   ;;  %v10303_v31 = vld [vmem:[%s13784_s1 + $0xb8] sm:$0xff]   ;;  %6397 = vmatprep.mubr.bf16.mxu0 %v119_v35  ;;  %v10305_v41 = vld [vmem:[%s13784_s1 + $0x1c0] sm:$0xff]  }
   0xd   :  { %9214 = vmatpush3.bf16.msra.mxu1 %v10283_v11  ;;  %9193 = vmatprep.subr.bf16.mxu0 %v10284_v12  ;;  %v25_v33 = vld [vmem:[%s13783_s0 + $0x18] sm:$0xff]  ;;  %v24_v38 = vld [vmem:[%s13783_s0 + $0x10] sm:$0xff]  ;;  %v10306_v42 = vld [vmem:[%s13784_s1 + $0x100] sm:$0xff]  }
   0xe   :  { %9215 = vmatprep.subr.bf16.mxu1 %v10285_v13  ;;  %v121_v36 = vpack.c.bf16 %v25_v33, %v25_v33  ;;  %v120_v39 = vpack.c.bf16 %v24_v38, %v24_v38  ;;  %v10307_v43 = vld [vmem:[%s13784_s1 + $0x180] sm:$0xff]   ;;  %v10308_v44 = vld [vmem:[%s13784_s1 + $0x148] sm:$0xff]   ;;  %v10312_v48 = vld [vmem:[%s13784_s1 + $0x150] sm:$0xff]  }
   0xf   :  { %v10309_v45 = vld [vmem:[%s13784_s1 + $0x1c8] sm:$0xff]   ;;  %v10313_v49 = vld [vmem:[%s13784_s1 + $0x1d0] sm:$0xff]   ;;  %v10316_v52 = vld [vmem:[%s13784_s1 + $0x158] sm:$0xff]  }
  0x10   :  { %9194 = vmatpush3.bf16.msra.mxu0 %v10286_v14  ;;  %6437 = vmatprep.mubr.bf16.mxu1 %v121_v36  ;;  %v10310_v46 = vld [vmem:[%s13784_s1 + $0x108] sm:$0xff]   ;;  %v10314_v50 = vld [vmem:[%s13784_s1 + $0x110] sm:$0xff]   ;;  %v10317_v53 = vld [vmem:[%s13784_s1 + $0x1d8] sm:$0xff]  }
  0x11   :  { %9216 = vmatpush3.bf16.msra.mxu1 %v10287_v15  ;;  %9195 = vmatprep.subr.bf16.mxu0 %v10288_v16  ;;  %v10311_v47 = vld [vmem:[%s13784_s1 + $0x188] sm:$0xff]   ;;  %v10315_v51 = vld [vmem:[%s13784_s1 + $0x190] sm:$0xff]   ;;  %v10318_v54 = vld [vmem:[%s13784_s1 + $0x118] sm:$0xff]  }
  0x12   :  { %9217 = vmatprep.subr.bf16.mxu1 %v10289_v17  ;;  %v10319_v55 = vld [vmem:[%s13784_s1 + $0x198] sm:$0xff]   ;;  %v10320_v56 = vld [vmem:[%s13784_s1 + $0x160] sm:$0xff]   ;;  %v10324_v60 = vld [vmem:[%s13784_s1 + $0x168] sm:$0xff]  }
  0x13   :  { %v10321_v57 = vld [vmem:[%s13784_s1 + $0x1e0] sm:$0xff]   ;;  %v10325_v61 = vld [vmem:[%s13784_s1 + $0x1e8] sm:$0xff]   ;;  %v10328_v0 = vld [vmem:[%s13784_s1 + $0x170] sm:$0xff]  }
  0x14   :  { %9196 = vmatpush3.bf16.msra.mxu0 %v10290_v18  ;;  %v10322_v58 = vld [vmem:[%s13784_s1 + $0x120] sm:$0xff]   ;;  %v10326_v62 = vld [vmem:[%s13784_s1 + $0x128] sm:$0xff]   ;;  %v10329_v1 = vld [vmem:[%s13784_s1 + $0x1f0] sm:$0xff]  }
  0x15   :  { %9218 = vmatpush3.bf16.msra.mxu1 %v10291_v19  ;;  %9197 = vmatprep.subr.bf16.mxu0 %v10292_v20  ;;  %v10323_v59 = vld [vmem:[%s13784_s1 + $0x1a0] sm:$0xff]   ;;  %v10327_v63 = vld [vmem:[%s13784_s1 + $0x1a8] sm:$0xff]   ;;  %v10330_v2 = vld [vmem:[%s13784_s1 + $0x130] sm:$0xff]  }
  0x16   :  { %9219 = vmatprep.subr.bf16.mxu1 %v10293_v21  ;;  %v10331_v3 = vld [vmem:[%s13784_s1 + $0x1b0] sm:$0xff]   ;;  %v10332_v4 = vld [vmem:[%s13784_s1 + $0x178] sm:$0xff]   ;;  %v27_v8 = vld [vmem:[%s13783_s0 + $0x28] sm:$0xff] }
  0x17   :  { %v10333_v5 = vld [vmem:[%s13784_s1 + $0x1f8] sm:$0xff]   ;;  %v123_v10 = vpack.c.bf16 %v27_v8, %v27_v8  ;;  %v26_v12 = vld [vmem:[%s13783_s0 + $0x20] sm:$0xff]  ;;  %v28_v13 = vld [vmem:[%s13783_s0 + $0x30] sm:$0xff] }
  0x18   :  { %9198 = vmatpush3.bf16.msra.mxu0 %v10294_v22  ;;  %v10334_v6 = vld [vmem:[%s13784_s1 + $0x138] sm:$0xff]   ;;  %v122_v14 = vpack.c.bf16 %v26_v12, %v26_v12  ;;  %v124_v15 = vpack.c.bf16 %v28_v13, %v28_v13  ;;  %v10336_v16 = vld [vmem:[%s13784_s1 + $0x240] sm:$0xff]   ;;  %v10340_v20 = vld [vmem:[%s13784_s1 + $0x248] sm:$0xff]  }
  0x19   :  { %9220 = vmatpush3.bf16.msra.mxu1 %v10295_v23  ;;  %9199 = vmatprep.subr.bf16.mxu0 %v10296_v24  ;;  %v10335_v7 = vld [vmem:[%s13784_s1 + $0x1b8] sm:$0xff]   ;;  %v10337_v17 = vld [vmem:[%s13784_s1 + $0x2c0] sm:$0xff]   ;;  %v10341_v21 = vld [vmem:[%s13784_s1 + $0x2c8] sm:$0xff]  }
  0x1a   :  { %9221 = vmatprep.subr.bf16.mxu1 %v10297_v25  ;;  %v29_v9 = vld [vmem:[%s13783_s0 + $0x38] sm:$0xff]  ;;  %v10338_v18 = vld [vmem:[%s13784_s1 + $0x200] sm:$0xff]   ;;  %v10342_v22 = vld [vmem:[%s13784_s1 + $0x208] sm:$0xff]  }
  0x1b   :  { %v125_v11 = vpack.c.bf16 %v29_v9, %v29_v9  ;;  %v10339_v19 = vld [vmem:[%s13784_s1 + $0x280] sm:$0xff]   ;;  %v10343_v23 = vld [vmem:[%s13784_s1 + $0x288] sm:$0xff]   ;;  %v10344_v24 = vld [vmem:[%s13784_s1 + $0x250] sm:$0xff]  }
  0x1c   :  { %9200 = vmatpush3.bf16.msra.mxu0 %v10298_v26  ;;  %v10345_v25 = vld [vmem:[%s13784_s1 + $0x2d0] sm:$0xff]   ;;  %v10352_v32 = vld [vmem:[%s13784_s1 + $0x260] sm:$0xff]   ;;  %v10356_v36 = vld [vmem:[%s13784_s1 + $0x268] sm:$0xff]  }
  0x1d   :  { %9222 = vmatpush3.bf16.msra.mxu1 %v10299_v27  ;;  %9201 = vmatprep.subr.bf16.mxu0 %v10300_v28  ;;  %v10346_v26 = vld [vmem:[%s13784_s1 + $0x210] sm:$0xff]   ;;  %v10348_v28 = vld [vmem:[%s13784_s1 + $0x258] sm:$0xff]   ;;  %v10353_v33 = vld [vmem:[%s13784_s1 + $0x2e0] sm:$0xff]  }
  0x1e   :  { %9223 = vmatprep.subr.bf16.mxu1 %v10301_v29  ;;  %v10347_v27 = vld [vmem:[%s13784_s1 + $0x290] sm:$0xff]   ;;  %v10349_v29 = vld [vmem:[%s13784_s1 + $0x2d8] sm:$0xff]   ;;  %v10354_v34 = vld [vmem:[%s13784_s1 + $0x220] sm:$0xff]  }
  0x1f   :  { %v10355_v35 = vld [vmem:[%s13784_s1 + $0x2a0] sm:$0xff]   ;;  %v10358_v38 = vld [vmem:[%s13784_s1 + $0x228] sm:$0xff]  }
  0x20   :  { %9202 = vmatpush3.bf16.msra.mxu0 %v10302_v30  ;;  %v10350_v30 = vld [vmem:[%s13784_s1 + $0x218] sm:$0xff]   ;;  %v10384_v8 = vld [vmem:[%s13784_s1 + $0x360] sm:$0xff]   ;;  %v10388_v12 = vld [vmem:[%s13784_s1 + $0x368] sm:$0xff]  }
  0x21   :  { %9224 = vmatpush3.bf16.msra.mxu1 %v10303_v31  ;;  %9231 = vmatprep.subr.bf16.mxu0 %v10304_v40  ;;  %v10351_v31 = vld [vmem:[%s13784_s1 + $0x298] sm:$0xff]   ;;  %v10360_v40 = vld [vmem:[%s13784_s1 + $0x270] sm:$0xff]   ;;  %v10385_v9 = vld [vmem:[%s13784_s1 + $0x3e0] sm:$0xff]  }
  0x22   :  { %9253 = vmatprep.subr.bf16.mxu1 %v10305_v41  ;;  %v10361_v41 = vld [vmem:[%s13784_s1 + $0x2f0] sm:$0xff]   ;;  %v10389_v13 = vld [vmem:[%s13784_s1 + $0x3e8] sm:$0xff]  }
  0x23   :  { %6398 = vmatmul.mubr.bf16.vlgmr.msra.gmra.mrb[0].mxu0 %v118_v37  ;;  %v10357_v37 = vld [vmem:[%s13784_s1 + $0x2e8] sm:$0xff]  }
  0x24   :  { %6438 = vmatmul.mubr.bf16.vlgmr.msra.gmra.mrb[0].mxu1 %v120_v39  ;;  %9232 = vmatpush3.bf16.msra.mxu0 %v10306_v42  ;;  %v10359_v39 = vld [vmem:[%s13784_s1 + $0x2a8] sm:$0xff]   ;;  %v10362_v42 = vld [vmem:[%s13784_s1 + $0x230] sm:$0xff]  }
  0x25   :  { %9254 = vmatpush3.bf16.msra.mxu1 %v10307_v43  ;;  %9233 = vmatprep.subr.bf16.mxu0 %v10308_v44  ;;  %v10363_v43 = vld [vmem:[%s13784_s1 + $0x2b0] sm:$0xff]   ;;  %v10364_v44 = vld [vmem:[%s13784_s1 + $0x278] sm:$0xff]  }
  0x26   :  { %9255 = vmatprep.subr.bf16.mxu1 %v10309_v45  ;;  %6477 = vmatprep.mubr.bf16.mxu0 %v123_v10  ;;  %v10365_v45 = vld [vmem:[%s13784_s1 + $0x2f8] sm:$0xff]   ;;  %v10386_v10 = vld [vmem:[%s13784_s1 + $0x320] sm:$0xff]  }
  0x27   :  { %6517 = vmatprep.mubr.bf16.mxu1 %v125_v11  ;;  %v10387_v11 = vld [vmem:[%s13784_s1 + $0x3a0] sm:$0xff]  }
  0x28   :  { %9234 = vmatpush3.bf16.msra.mxu0 %v10310_v46  ;;  %v10366_v46 = vld [vmem:[%s13784_s1 + $0x238] sm:$0xff]  }
  0x29   :  { %9256 = vmatpush3.bf16.msra.mxu1 %v10311_v47  ;;  %9235 = vmatprep.subr.bf16.mxu0 %v10312_v48  ;;  %v10367_v47 = vld [vmem:[%s13784_s1 + $0x2b8] sm:$0xff]   ;;  %v31_v48 = vld [vmem:[%s13783_s0 + $0x48] sm:$0xff] }
  0x2a   :  { %9257 = vmatprep.subr.bf16.mxu1 %v10313_v49  ;;  %v127_v49 = vpack.c.bf16 %v31_v48, %v31_v48  ;;  %v10416_v48 = vld [vmem:[%s13784_s1 + $0x460] sm:$0xff]  }
  0x2c   :  { %9236 = vmatpush3.bf16.msra.mxu0 %v10314_v50  ;;  %v33_v50 = vld [vmem:[%s13783_s0 + $0x58] sm:$0xff] }
  0x2d   :  { %9258 = vmatpush3.bf16.msra.mxu1 %v10315_v51  ;;  %9237 = vmatprep.subr.bf16.mxu0 %v10316_v52  ;;  %v30_v51 = vld [vmem:[%s13783_s0 + $0x40] sm:$0xff]  ;;  %v32_v52 = vld [vmem:[%s13783_s0 + $0x50] sm:$0xff] }
  0x2e   :  { %9259 = vmatprep.subr.bf16.mxu1 %v10317_v53  ;;  %v129_v53 = vpack.c.bf16 %v33_v50, %v33_v50  ;;  %v10418_v50 = vld [vmem:[%s13784_s1 + $0x420] sm:$0xff]  }
  0x30   :  { %9238 = vmatpush3.bf16.msra.mxu0 %v10318_v54  ;;  %v126_v54 = vpack.c.bf16 %v30_v51, %v30_v51  ;;  %v10419_v51 = vld [vmem:[%s13784_s1 + $0x4a0] sm:$0xff]  }
  0x31   :  { %9260 = vmatpush3.bf16.msra.mxu1 %v10319_v55  ;;  %9239 = vmatprep.subr.bf16.mxu0 %v10320_v56  ;;  %v128_v55 = vpack.c.bf16 %v32_v52, %v32_v52  ;;  %v10368_v56 = vld [vmem:[%s13784_s1 + $0x340] sm:$0xff]   ;;  %v10420_v52 = vld [vmem:[%s13784_s1 + $0x468] sm:$0xff]  }
  0x32   :  { %9261 = vmatprep.subr.bf16.mxu1 %v10321_v57  ;;  %v10369_v57 = vld [vmem:[%s13784_s1 + $0x3c0] sm:$0xff]  }
  0x34   :  { %9240 = vmatpush3.bf16.msra.mxu0 %v10322_v58  ;;  %v10370_v58 = vld [vmem:[%s13784_s1 + $0x300] sm:$0xff]  }
  0x35   :  { %9262 = vmatpush3.bf16.msra.mxu1 %v10323_v59  ;;  %9241 = vmatprep.subr.bf16.mxu0 %v10324_v60  ;;  %v10371_v59 = vld [vmem:[%s13784_s1 + $0x380] sm:$0xff]   ;;  %v10372_v60 = vld [vmem:[%s13784_s1 + $0x348] sm:$0xff]  }
  0x36   :  { %9263 = vmatprep.subr.bf16.mxu1 %v10325_v61  ;;  %v10373_v61 = vld [vmem:[%s13784_s1 + $0x3c8] sm:$0xff]  }
  0x38   :  { %9242 = vmatpush3.bf16.msra.mxu0 %v10326_v62  ;;  %v10374_v62 = vld [vmem:[%s13784_s1 + $0x308] sm:$0xff]  }
  0x39   :  { %9264 = vmatpush3.bf16.msra.mxu1 %v10327_v63  ;;  %9243 = vmatprep.subr.bf16.mxu0 %v10328_v0  ;;  %v10375_v63 = vld [vmem:[%s13784_s1 + $0x388] sm:$0xff]   ;;  %v10376_v0 = vld [vmem:[%s13784_s1 + $0x350] sm:$0xff]  }
  0x3a   :  { %9265 = vmatprep.subr.bf16.mxu1 %v10329_v1  ;;  %v10377_v1 = vld [vmem:[%s13784_s1 + $0x3d0] sm:$0xff]  }
  0x3c   :  { %9244 = vmatpush3.bf16.msra.mxu0 %v10330_v2  ;;  %v10378_v2 = vld [vmem:[%s13784_s1 + $0x310] sm:$0xff]  }
  0x3d   :  { %9266 = vmatpush3.bf16.msra.mxu1 %v10331_v3  ;;  %9245 = vmatprep.subr.bf16.mxu0 %v10332_v4  ;;  %v10379_v3 = vld [vmem:[%s13784_s1 + $0x390] sm:$0xff]   ;;  %v10380_v4 = vld [vmem:[%s13784_s1 + $0x358] sm:$0xff]  }
  0x3e   :  { %9267 = vmatprep.subr.bf16.mxu1 %v10333_v5  ;;  %v10381_v5 = vld [vmem:[%s13784_s1 + $0x3d8] sm:$0xff]  }
  0x40   :  { %9246 = vmatpush3.bf16.msra.mxu0 %v10334_v6  ;;  %v10382_v6 = vld [vmem:[%s13784_s1 + $0x318] sm:$0xff]  }
  0x41   :  { %9268 = vmatpush3.bf16.msra.mxu1 %v10335_v7  ;;  %9275 = vmatprep.subr.bf16.mxu0 %v10336_v16  ;;  %v10383_v7 = vld [vmem:[%s13784_s1 + $0x398] sm:$0xff]   ;;  %v10392_v16 = vld [vmem:[%s13784_s1 + $0x370] sm:$0xff]  }
  0x42   :  { %9297 = vmatprep.subr.bf16.mxu1 %v10337_v17  ;;  %v10393_v17 = vld [vmem:[%s13784_s1 + $0x3f0] sm:$0xff]  }
  0x43   :  { %6478 = vmatmul.mubr.bf16.vlgmr.msra.gmra.mrb[4].mxu0 %v122_v14  ;;  %v10390_v14 = vld [vmem:[%s13784_s1 + $0x328] sm:$0xff]  }
  0x44   :  { %6518 = vmatmul.mubr.bf16.vlgmr.msra.gmra.mrb[4].mxu1 %v124_v15  ;;  %9276 = vmatpush3.bf16.msra.mxu0 %v10338_v18  ;;  %v10391_v15 = vld [vmem:[%s13784_s1 + $0x3a8] sm:$0xff]   ;;  %v10394_v18 = vld [vmem:[%s13784_s1 + $0x330] sm:$0xff]  }
  0x45   :  { %9298 = vmatpush3.bf16.msra.mxu1 %v10339_v19  ;;  %9277 = vmatprep.subr.bf16.mxu0 %v10340_v20  ;;  %v10395_v19 = vld [vmem:[%s13784_s1 + $0x3b0] sm:$0xff]   ;;  %v10396_v20 = vld [vmem:[%s13784_s1 + $0x378] sm:$0xff]  }
  0x46   :  { %9299 = vmatprep.subr.bf16.mxu1 %v10341_v21  ;;  %6557 = vmatprep.mubr.bf16.mxu0 %v127_v49  ;;  %v10397_v21 = vld [vmem:[%s13784_s1 + $0x3f8] sm:$0xff]   ;;  %v10417_v49 = vld [vmem:[%s13784_s1 + $0x4e0] sm:$0xff]  }
  0x47   :  { %6597 = vmatprep.mubr.bf16.mxu1 %v129_v53  ;;  %v10421_v53 = vld [vmem:[%s13784_s1 + $0x4e8] sm:$0xff]  }
  0x48   :  { %9278 = vmatpush3.bf16.msra.mxu0 %v10342_v22  ;;  %v10398_v22 = vld [vmem:[%s13784_s1 + $0x338] sm:$0xff]  }
  0x49   :  { %9300 = vmatpush3.bf16.msra.mxu1 %v10343_v23  ;;  %9279 = vmatprep.subr.bf16.mxu0 %v10344_v24  ;;  %v10399_v23 = vld [vmem:[%s13784_s1 + $0x3b8] sm:$0xff]   ;;  %v35_v24 = vld [vmem:[%s13783_s0 + $0x68] sm:$0xff] }
  0x4a   :  { %9301 = vmatprep.subr.bf16.mxu1 %v10345_v25  ;;  %v37_v25 = vld [vmem:[%s13783_s0 + $0x78] sm:$0xff] }
  0x4c   :  { %9280 = vmatpush3.bf16.msra.mxu0 %v10346_v26  ;;  %v34_v26 = vld [vmem:[%s13783_s0 + $0x60] sm:$0xff] }
  0x4d   :  { %9302 = vmatpush3.bf16.msra.mxu1 %v10347_v27  ;;  %9281 = vmatprep.subr.bf16.mxu0 %v10348_v28  ;;  %v131_v27 = vpack.c.bf16 %v35_v24, %v35_v24  ;;  %v133_v28 = vpack.c.bf16 %v37_v25, %v37_v25  ;;  %v10448_v24 = vld [vmem:[%s13784_s1 + $0x560] sm:$0xff]  }
  0x4e   :  { %9303 = vmatprep.subr.bf16.mxu1 %v10349_v29  ;;  %v130_v29 = vpack.c.bf16 %v34_v26, %v34_v26  ;;  %v10449_v25 = vld [vmem:[%s13784_s1 + $0x5e0] sm:$0xff]  }
  0x4f   :  { %v10450_v26 = vld [vmem:[%s13784_s1 + $0x520] sm:$0xff]  }
  0x50   :  { %9282 = vmatpush3.bf16.msra.mxu0 %v10350_v30  ;;  %v36_v30 = vld [vmem:[%s13783_s0 + $0x70] sm:$0xff] }
  0x51   :  { %9304 = vmatpush3.bf16.msra.mxu1 %v10351_v31  ;;  %9283 = vmatprep.subr.bf16.mxu0 %v10352_v32  ;;  %v132_v31 = vpack.c.bf16 %v36_v30, %v36_v30  ;;  %v10400_v32 = vld [vmem:[%s13784_s1 + $0x440] sm:$0xff]   ;;  %v10454_v30 = vld [vmem:[%s13784_s1 + $0x528] sm:$0xff]  }
  0x52   :  { %9305 = vmatprep.subr.bf16.mxu1 %v10353_v33  ;;  %v10401_v33 = vld [vmem:[%s13784_s1 + $0x4c0] sm:$0xff]  }
  0x54   :  { %9284 = vmatpush3.bf16.msra.mxu0 %v10354_v34  ;;  %v10402_v34 = vld [vmem:[%s13784_s1 + $0x400] sm:$0xff]  }
  0x55   :  { %9306 = vmatpush3.bf16.msra.mxu1 %v10355_v35  ;;  %9285 = vmatprep.subr.bf16.mxu0 %v10356_v36  ;;  %v10403_v35 = vld [vmem:[%s13784_s1 + $0x480] sm:$0xff]   ;;  %v10404_v36 = vld [vmem:[%s13784_s1 + $0x448] sm:$0xff]  }
  0x56   :  { %9307 = vmatprep.subr.bf16.mxu1 %v10357_v37  ;;  %v10405_v37 = vld [vmem:[%s13784_s1 + $0x4c8] sm:$0xff]  }
  0x58   :  { %9286 = vmatpush3.bf16.msra.mxu0 %v10358_v38  ;;  %v10406_v38 = vld [vmem:[%s13784_s1 + $0x408] sm:$0xff]  }
  0x59   :  { %9308 = vmatpush3.bf16.msra.mxu1 %v10359_v39  ;;  %9287 = vmatprep.subr.bf16.mxu0 %v10360_v40  ;;  %v10407_v39 = vld [vmem:[%s13784_s1 + $0x488] sm:$0xff]   ;;  %v10408_v40 = vld [vmem:[%s13784_s1 + $0x450] sm:$0xff]  }
  0x5a   :  { %9309 = vmatprep.subr.bf16.mxu1 %v10361_v41  ;;  %v10409_v41 = vld [vmem:[%s13784_s1 + $0x4d0] sm:$0xff]  }
  0x5c   :  { %9288 = vmatpush3.bf16.msra.mxu0 %v10362_v42  ;;  %v10410_v42 = vld [vmem:[%s13784_s1 + $0x410] sm:$0xff]  }
  0x5d   :  { %9310 = vmatpush3.bf16.msra.mxu1 %v10363_v43  ;;  %9289 = vmatprep.subr.bf16.mxu0 %v10364_v44  ;;  %v10411_v43 = vld [vmem:[%s13784_s1 + $0x490] sm:$0xff]   ;;  %v10412_v44 = vld [vmem:[%s13784_s1 + $0x458] sm:$0xff]  }
  0x5e   :  { %9311 = vmatprep.subr.bf16.mxu1 %v10365_v45  ;;  %v10413_v45 = vld [vmem:[%s13784_s1 + $0x4d8] sm:$0xff]  }
  0x60   :  { %9290 = vmatpush3.bf16.msra.mxu0 %v10366_v46  ;;  %v10414_v46 = vld [vmem:[%s13784_s1 + $0x418] sm:$0xff]  }
  0x61   :  { %9312 = vmatpush3.bf16.msra.mxu1 %v10367_v47  ;;  %9319 = vmatprep.subr.bf16.mxu0 %v10368_v56  ;;  %v10415_v47 = vld [vmem:[%s13784_s1 + $0x498] sm:$0xff]   ;;  %v10424_v56 = vld [vmem:[%s13784_s1 + $0x470] sm:$0xff]  }
  0x62   :  { %9341 = vmatprep.subr.bf16.mxu1 %v10369_v57  ;;  %v10425_v57 = vld [vmem:[%s13784_s1 + $0x4f0] sm:$0xff]  }
  0x63   :  { %6558 = vmatmul.mubr.bf16.vlgmr.msra.gmra.mrb[8].mxu0 %v126_v54  ;;  %v10422_v54 = vld [vmem:[%s13784_s1 + $0x428] sm:$0xff]  }
  0x64   :  { %6598 = vmatmul.mubr.bf16.vlgmr.msra.gmra.mrb[8].mxu1 %v128_v55  ;;  %9320 = vmatpush3.bf16.msra.mxu0 %v10370_v58  ;;  %v10423_v55 = vld [vmem:[%s13784_s1 + $0x4a8] sm:$0xff]   ;;  %v10426_v58 = vld [vmem:[%s13784_s1 + $0x430] sm:$0xff]  }
  0x65   :  { %9342 = vmatpush3.bf16.msra.mxu1 %v10371_v59  ;;  %9321 = vmatprep.subr.bf16.mxu0 %v10372_v60  ;;  %v10427_v59 = vld [vmem:[%s13784_s1 + $0x4b0] sm:$0xff]   ;;  %v10428_v60 = vld [vmem:[%s13784_s1 + $0x478] sm:$0xff]  }
  0x66   :  { %9343 = vmatprep.subr.bf16.mxu1 %v10373_v61  ;;  %6637 = vmatprep.mubr.bf16.mxu0 %v131_v27  ;;  %v10429_v61 = vld [vmem:[%s13784_s1 + $0x4f8] sm:$0xff]   ;;  %v10451_v27 = vld [vmem:[%s13784_s1 + $0x5a0] sm:$0xff]  }
  0x67   :  { %6677 = vmatprep.mubr.bf16.mxu1 %v133_v28  ;;  %v10452_v28 = vld [vmem:[%s13784_s1 + $0x568] sm:$0xff]  }
  0x68   :  { %9322 = vmatpush3.bf16.msra.mxu0 %v10374_v62  ;;  %v10430_v62 = vld [vmem:[%s13784_s1 + $0x438] sm:$0xff]  }
  0x69   :  { %9344 = vmatpush3.bf16.msra.mxu1 %v10375_v63  ;;  %9323 = vmatprep.subr.bf16.mxu0 %v10376_v0  ;;  %v10431_v63 = vld [vmem:[%s13784_s1 + $0x4b8] sm:$0xff]   ;;  %v39_v0 = vld [vmem:[%s13783_s0 + $0x88] sm:$0xff] }
  0x6a   :  { %9345 = vmatprep.subr.bf16.mxu1 %v10377_v1  ;;  %v41_v1 = vld [vmem:[%s13783_s0 + $0x98] sm:$0xff] }
  0x6c   :  { %9324 = vmatpush3.bf16.msra.mxu0 %v10378_v2  ;;  %v135_v2 = vpack.c.bf16 %v39_v0, %v39_v0  ;;  %v10480_v0 = vld [vmem:[%s13784_s1 + $0x660] sm:$0xff]  }
  0x6d   :  { %9346 = vmatpush3.bf16.msra.mxu1 %v10379_v3  ;;  %9325 = vmatprep.subr.bf16.mxu0 %v10380_v4  ;;  %v137_v3 = vpack.c.bf16 %v41_v1, %v41_v1  ;;  %v38_v4 = vld [vmem:[%s13783_s0 + $0x80] sm:$0xff] }
  0x6e   :  { %9347 = vmatprep.subr.bf16.mxu1 %v10381_v5  ;;  %v40_v5 = vld [vmem:[%s13783_s0 + $0x90] sm:$0xff]  ;;  %v10481_v1 = vld [vmem:[%s13784_s1 + $0x6e0] sm:$0xff]  }
  0x70   :  { %9326 = vmatpush3.bf16.msra.mxu0 %v10382_v6  ;;  %v134_v6 = vpack.c.bf16 %v38_v4, %v38_v4  ;;  %v10484_v4 = vld [vmem:[%s13784_s1 + $0x668] sm:$0xff]  }
  0x71   :  { %9348 = vmatpush3.bf16.msra.mxu1 %v10383_v7  ;;  %9327 = vmatprep.subr.bf16.mxu0 %v10384_v8  ;;  %v136_v7 = vpack.c.bf16 %v40_v5, %v40_v5  ;;  %v10432_v8 = vld [vmem:[%s13784_s1 + $0x540] sm:$0xff]   ;;  %v10485_v5 = vld [vmem:[%s13784_s1 + $0x6e8] sm:$0xff]  }
  0x72   :  { %9349 = vmatprep.subr.bf16.mxu1 %v10385_v9  ;;  %v10433_v9 = vld [vmem:[%s13784_s1 + $0x5c0] sm:$0xff]  }
  0x74   :  { %9328 = vmatpush3.bf16.msra.mxu0 %v10386_v10  ;;  %v10434_v10 = vld [vmem:[%s13784_s1 + $0x500] sm:$0xff]  }
  0x75   :  { %9350 = vmatpush3.bf16.msra.mxu1 %v10387_v11  ;;  %9329 = vmatprep.subr.bf16.mxu0 %v10388_v12  ;;  %v10435_v11 = vld [vmem:[%s13784_s1 + $0x580] sm:$0xff]   ;;  %v10436_v12 = vld [vmem:[%s13784_s1 + $0x548] sm:$0xff]  }
  0x76   :  { %9351 = vmatprep.subr.bf16.mxu1 %v10389_v13  ;;  %v10437_v13 = vld [vmem:[%s13784_s1 + $0x5c8] sm:$0xff]  }
  0x78   :  { %9330 = vmatpush3.bf16.msra.mxu0 %v10390_v14  ;;  %v10438_v14 = vld [vmem:[%s13784_s1 + $0x508] sm:$0xff]  }
  0x79   :  { %9352 = vmatpush3.bf16.msra.mxu1 %v10391_v15  ;;  %9331 = vmatprep.subr.bf16.mxu0 %v10392_v16  ;;  %v10439_v15 = vld [vmem:[%s13784_s1 + $0x588] sm:$0xff]   ;;  %v10440_v16 = vld [vmem:[%s13784_s1 + $0x550] sm:$0xff]  }
  0x7a   :  { %9353 = vmatprep.subr.bf16.mxu1 %v10393_v17  ;;  %v10441_v17 = vld [vmem:[%s13784_s1 + $0x5d0] sm:$0xff]  }
  0x7c   :  { %9332 = vmatpush3.bf16.msra.mxu0 %v10394_v18  ;;  %v10442_v18 = vld [vmem:[%s13784_s1 + $0x510] sm:$0xff]  }
  0x7d   :  { %9354 = vmatpush3.bf16.msra.mxu1 %v10395_v19  ;;  %9333 = vmatprep.subr.bf16.mxu0 %v10396_v20  ;;  %v10443_v19 = vld [vmem:[%s13784_s1 + $0x590] sm:$0xff]   ;;  %v10444_v20 = vld [vmem:[%s13784_s1 + $0x558] sm:$0xff]  }
  0x7e   :  { %9355 = vmatprep.subr.bf16.mxu1 %v10397_v21  ;;  %v10445_v21 = vld [vmem:[%s13784_s1 + $0x5d8] sm:$0xff]  }
  0x80   :  { %9334 = vmatpush3.bf16.msra.mxu0 %v10398_v22  ;;  %v10446_v22 = vld [vmem:[%s13784_s1 + $0x518] sm:$0xff]  }
  0x81   :  { %9356 = vmatpush3.bf16.msra.mxu1 %v10399_v23  ;;  %9363 = vmatprep.subr.bf16.mxu0 %v10400_v32  ;;  %v10447_v23 = vld [vmem:[%s13784_s1 + $0x598] sm:$0xff]   ;;  %v10456_v32 = vld [vmem:[%s13784_s1 + $0x570] sm:$0xff]  }
  0x82   :  { %9385 = vmatprep.subr.bf16.mxu1 %v10401_v33  ;;  %v10457_v33 = vld [vmem:[%s13784_s1 + $0x5f0] sm:$0xff]  }
  0x83   :  { %6638 = vmatmul.mubr.bf16.vlgmr.msra.gmra.mrb[12].mxu0 %v130_v29  ;;  %v10453_v29 = vld [vmem:[%s13784_s1 + $0x5e8] sm:$0xff]  }
  0x84   :  { %6678 = vmatmul.mubr.bf16.vlgmr.msra.gmra.mrb[12].mxu1 %v132_v31  ;;  %9364 = vmatpush3.bf16.msra.mxu0 %v10402_v34  ;;  %v10455_v31 = vld [vmem:[%s13784_s1 + $0x5a8] sm:$0xff]   ;;  %v10458_v34 = vld [vmem:[%s13784_s1 + $0x530] sm:$0xff]  }
  0x85   :  { %9386 = vmatpush3.bf16.msra.mxu1 %v10403_v35  ;;  %9365 = vmatprep.subr.bf16.mxu0 %v10404_v36  ;;  %v10459_v35 = vld [vmem:[%s13784_s1 + $0x5b0] sm:$0xff]   ;;  %v10460_v36 = vld [vmem:[%s13784_s1 + $0x578] sm:$0xff]  }
  0x86   :  { %9387 = vmatprep.subr.bf16.mxu1 %v10405_v37  ;;  %6717 = vmatprep.mubr.bf16.mxu0 %v135_v2  ;;  %v10461_v37 = vld [vmem:[%s13784_s1 + $0x5f8] sm:$0xff]   ;;  %v10482_v2 = vld [vmem:[%s13784_s1 + $0x620] sm:$0xff]  }
  0x87   :  { %6757 = vmatprep.mubr.bf16.mxu1 %v137_v3  ;;  %v10483_v3 = vld [vmem:[%s13784_s1 + $0x6a0] sm:$0xff]  }
  0x88   :  { %9366 = vmatpush3.bf16.msra.mxu0 %v10406_v38  ;;  %v10462_v38 = vld [vmem:[%s13784_s1 + $0x538] sm:$0xff]  }
  0x89   :  { %9388 = vmatpush3.bf16.msra.mxu1 %v10407_v39  ;;  %9367 = vmatprep.subr.bf16.mxu0 %v10408_v40  ;;  %v10463_v39 = vld [vmem:[%s13784_s1 + $0x5b8] sm:$0xff]   ;;  %v43_v40 = vld [vmem:[%s13783_s0 + $0xa8] sm:$0xff] }
  0x8a   :  { %9389 = vmatprep.subr.bf16.mxu1 %v10409_v41  ;;  %v139_v41 = vpack.c.bf16 %v43_v40, %v43_v40 }
  0x8c   :  { %9368 = vmatpush3.bf16.msra.mxu0 %v10410_v42  ;;  %v45_v42 = vld [vmem:[%s13783_s0 + $0xb8] sm:$0xff] }
  0x8d   :  { %9390 = vmatpush3.bf16.msra.mxu1 %v10411_v43  ;;  %9369 = vmatprep.subr.bf16.mxu0 %v10412_v44  ;;  %v42_v43 = vld [vmem:[%s13783_s0 + $0xa0] sm:$0xff]  ;;  %v44_v44 = vld [vmem:[%s13783_s0 + $0xb0] sm:$0xff] }
  0x8e   :  { %9391 = vmatprep.subr.bf16.mxu1 %v10413_v45  ;;  %v141_v45 = vpack.c.bf16 %v45_v42, %v45_v42 }
  0x90   :  { %9370 = vmatpush3.bf16.msra.mxu0 %v10414_v46  ;;  %v138_v46 = vpack.c.bf16 %v42_v43, %v42_v43  ;;  %v10512_v43 = vld [vmem:[%s13784_s1 + $0x760] sm:$0xff]  }
  0x91   :  { %9392 = vmatpush3.bf16.msra.mxu1 %v10415_v47  ;;  %9371 = vmatprep.subr.bf16.mxu0 %v10416_v48  ;;  %v140_v47 = vpack.c.bf16 %v44_v44, %v44_v44  ;;  %v10464_v48 = vld [vmem:[%s13784_s1 + $0x640] sm:$0xff]  }
  0x92   :  { %9393 = vmatprep.subr.bf16.mxu1 %v10417_v49  ;;  %v10465_v49 = vld [vmem:[%s13784_s1 + $0x6c0] sm:$0xff]  }
  0x94   :  { %9372 = vmatpush3.bf16.msra.mxu0 %v10418_v50  ;;  %v10466_v50 = vld [vmem:[%s13784_s1 + $0x600] sm:$0xff]  }
  0x95   :  { %9394 = vmatpush3.bf16.msra.mxu1 %v10419_v51  ;;  %9373 = vmatprep.subr.bf16.mxu0 %v10420_v52  ;;  %v10467_v51 = vld [vmem:[%s13784_s1 + $0x680] sm:$0xff]   ;;  %v10468_v52 = vld [vmem:[%s13784_s1 + $0x648] sm:$0xff]  }
  0x96   :  { %9395 = vmatprep.subr.bf16.mxu1 %v10421_v53  ;;  %v10469_v53 = vld [vmem:[%s13784_s1 + $0x6c8] sm:$0xff]  }
  0x98   :  { %9374 = vmatpush3.bf16.msra.mxu0 %v10422_v54  ;;  %v10470_v54 = vld [vmem:[%s13784_s1 + $0x608] sm:$0xff]  }
  0x99   :  { %9396 = vmatpush3.bf16.msra.mxu1 %v10423_v55  ;;  %9375 = vmatprep.subr.bf16.mxu0 %v10424_v56  ;;  %v10471_v55 = vld [vmem:[%s13784_s1 + $0x688] sm:$0xff]   ;;  %v10472_v56 = vld [vmem:[%s13784_s1 + $0x650] sm:$0xff]  }
  0x9a   :  { %9397 = vmatprep.subr.bf16.mxu1 %v10425_v57  ;;  %v10473_v57 = vld [vmem:[%s13784_s1 + $0x6d0] sm:$0xff]  }
  0x9c   :  { %9376 = vmatpush3.bf16.msra.mxu0 %v10426_v58  ;;  %v10474_v58 = vld [vmem:[%s13784_s1 + $0x610] sm:$0xff]  }
  0x9d   :  { %9398 = vmatpush3.bf16.msra.mxu1 %v10427_v59  ;;  %9377 = vmatprep.subr.bf16.mxu0 %v10428_v60  ;;  %v10475_v59 = vld [vmem:[%s13784_s1 + $0x690] sm:$0xff]   ;;  %v10476_v60 = vld [vmem:[%s13784_s1 + $0x658] sm:$0xff]  }
  0x9e   :  { %9399 = vmatprep.subr.bf16.mxu1 %v10429_v61  ;;  %v10477_v61 = vld [vmem:[%s13784_s1 + $0x6d8] sm:$0xff]  }
  0xa0   :  { %9378 = vmatpush3.bf16.msra.mxu0 %v10430_v62  ;;  %v10478_v62 = vld [vmem:[%s13784_s1 + $0x618] sm:$0xff]  }
  0xa1   :  { %9400 = vmatpush3.bf16.msra.mxu1 %v10431_v63  ;;  %9407 = vmatprep.subr.bf16.mxu0 %v10432_v8  ;;  %v10479_v63 = vld [vmem:[%s13784_s1 + $0x698] sm:$0xff]   ;;  %v10488_v8 = vld [vmem:[%s13784_s1 + $0x670] sm:$0xff]  }
  0xa2   :  { %9429 = vmatprep.subr.bf16.mxu1 %v10433_v9  ;;  %v10489_v9 = vld [vmem:[%s13784_s1 + $0x6f0] sm:$0xff]  }
  0xa3   :  { %6718 = vmatmul.mubr.bf16.vlgmr.msra.gmra.mrb[16].mxu0 %v134_v6  ;;  %v10486_v6 = vld [vmem:[%s13784_s1 + $0x628] sm:$0xff]  }
  0xa4   :  { %6758 = vmatmul.mubr.bf16.vlgmr.msra.gmra.mrb[16].mxu1 %v136_v7  ;;  %9408 = vmatpush3.bf16.msra.mxu0 %v10434_v10  ;;  %v10487_v7 = vld [vmem:[%s13784_s1 + $0x6a8] sm:$0xff]   ;;  %v10490_v10 = vld [vmem:[%s13784_s1 + $0x630] sm:$0xff]  }
  0xa5   :  { %9430 = vmatpush3.bf16.msra.mxu1 %v10435_v11  ;;  %9409 = vmatprep.subr.bf16.mxu0 %v10436_v12  ;;  %v10491_v11 = vld [vmem:[%s13784_s1 + $0x6b0] sm:$0xff]   ;;  %v10492_v12 = vld [vmem:[%s13784_s1 + $0x678] sm:$0xff]  }
  0xa6   :  { %9431 = vmatprep.subr.bf16.mxu1 %v10437_v13  ;;  %6797 = vmatprep.mubr.bf16.mxu0 %v139_v41  ;;  %v10493_v13 = vld [vmem:[%s13784_s1 + $0x6f8] sm:$0xff]  }
  0xa7   :  { %6837 = vmatprep.mubr.bf16.mxu1 %v141_v45  ;;  %v10511_v41 = vld [vmem:[%s13784_s1 + $0x798] sm:$0xff]  }
  0xa8   :  { %9410 = vmatpush3.bf16.msra.mxu0 %v10438_v14  ;;  %v10494_v14 = vld [vmem:[%s13784_s1 + $0x638] sm:$0xff]  }
  0xa9   :  { %9432 = vmatpush3.bf16.msra.mxu1 %v10439_v15  ;;  %9411 = vmatprep.subr.bf16.mxu0 %v10440_v16  ;;  %v10495_v15 = vld [vmem:[%s13784_s1 + $0x6b8] sm:$0xff]   ;;  %v47_v16 = vld [vmem:[%s13783_s0 + $0xc8] sm:$0xff] }
  0xaa   :  { %9433 = vmatprep.subr.bf16.mxu1 %v10441_v17  ;;  %v49_v17 = vld [vmem:[%s13783_s0 + $0xd8] sm:$0xff] }
  0xac   :  { %9412 = vmatpush3.bf16.msra.mxu0 %v10442_v18  ;;  %v46_v18 = vld [vmem:[%s13783_s0 + $0xc0] sm:$0xff] }
  0xad   :  { %9434 = vmatpush3.bf16.msra.mxu1 %v10443_v19  ;;  %9413 = vmatprep.subr.bf16.mxu0 %v10444_v20  ;;  %v143_v19 = vpack.c.bf16 %v47_v16, %v47_v16  ;;  %v145_v20 = vpack.c.bf16 %v49_v17, %v49_v17  ;;  %v10531_v16 = vld [vmem:[%s13784_s1 + $0x880] sm:$0xff]   ;;  %v10532_v17 = vld [vmem:[%s13784_s1 + $0x848] sm:$0xff]  }
  0xae   :  { %9435 = vmatprep.subr.bf16.mxu1 %v10445_v21  ;;  %v142_v21 = vpack.c.bf16 %v46_v18, %v46_v18  ;;  %v10533_v18 = vld [vmem:[%s13784_s1 + $0x8c8] sm:$0xff]  }
  0xb0   :  { %9414 = vmatpush3.bf16.msra.mxu0 %v10446_v22  ;;  %v48_v22 = vld [vmem:[%s13783_s0 + $0xd0] sm:$0xff] }
  0xb1   :  { %9436 = vmatpush3.bf16.msra.mxu1 %v10447_v23  ;;  %9415 = vmatprep.subr.bf16.mxu0 %v10448_v24  ;;  %v144_v23 = vpack.c.bf16 %v48_v22, %v48_v22  ;;  %v10496_v24 = vld [vmem:[%s13784_s1 + $0x740] sm:$0xff]   ;;  %v10537_v22 = vld [vmem:[%s13784_s1 + $0x8d0] sm:$0xff]  }
  0xb2   :  { %9437 = vmatprep.subr.bf16.mxu1 %v10449_v25  ;;  %v10497_v25 = vld [vmem:[%s13784_s1 + $0x7c0] sm:$0xff]  }
  0xb4   :  { %9416 = vmatpush3.bf16.msra.mxu0 %v10450_v26  ;;  %v10498_v26 = vld [vmem:[%s13784_s1 + $0x700] sm:$0xff]  }
  0xb5   :  { %9438 = vmatpush3.bf16.msra.mxu1 %v10451_v27  ;;  %9417 = vmatprep.subr.bf16.mxu0 %v10452_v28  ;;  %v10499_v27 = vld [vmem:[%s13784_s1 + $0x780] sm:$0xff]   ;;  %v10500_v28 = vld [vmem:[%s13784_s1 + $0x748] sm:$0xff]  }
  0xb6   :  { %9439 = vmatprep.subr.bf16.mxu1 %v10453_v29  ;;  %v10501_v29 = vld [vmem:[%s13784_s1 + $0x7c8] sm:$0xff]  }
  0xb8   :  { %9418 = vmatpush3.bf16.msra.mxu0 %v10454_v30  ;;  %v10502_v30 = vld [vmem:[%s13784_s1 + $0x708] sm:$0xff]  }
  0xb9   :  { %9440 = vmatpush3.bf16.msra.mxu1 %v10455_v31  ;;  %9419 = vmatprep.subr.bf16.mxu0 %v10456_v32  ;;  %v10503_v31 = vld [vmem:[%s13784_s1 + $0x788] sm:$0xff]   ;;  %v10504_v32 = vld [vmem:[%s13784_s1 + $0x750] sm:$0xff]  }
  0xba   :  { %9441 = vmatprep.subr.bf16.mxu1 %v10457_v33  ;;  %v10505_v33 = vld [vmem:[%s13784_s1 + $0x7d0] sm:$0xff]  }
  0xbc   :  { %9420 = vmatpush3.bf16.msra.mxu0 %v10458_v34  ;;  %v10506_v34 = vld [vmem:[%s13784_s1 + $0x710] sm:$0xff]  }
  0xbd   :  { %9442 = vmatpush3.bf16.msra.mxu1 %v10459_v35  ;;  %9421 = vmatprep.subr.bf16.mxu0 %v10460_v36  ;;  %v10507_v35 = vld [vmem:[%s13784_s1 + $0x790] sm:$0xff]   ;;  %v10508_v36 = vld [vmem:[%s13784_s1 + $0x758] sm:$0xff]  }
  0xbe   :  { %9443 = vmatprep.subr.bf16.mxu1 %v10461_v37  ;;  %v10509_v37 = vld [vmem:[%s13784_s1 + $0x7d8] sm:$0xff]  }
  0xc0   :  { %9422 = vmatpush3.bf16.msra.mxu0 %v10462_v38 }
  0xc1   :  { %9444 = vmatpush3.bf16.msra.mxu1 %v10463_v39  ;;  %9451 = vmatprep.subr.bf16.mxu0 %v10464_v48  ;;  %v10510_v39 = vld [vmem:[%s13784_s1 + $0x718] sm:$0xff]  }
  0xc2   :  { %9473 = vmatprep.subr.bf16.mxu1 %v10465_v49  ;;  %v10514_v49 = vld [vmem:[%s13784_s1 + $0x720] sm:$0xff]  }
  0xc3   :  { %6798 = vmatmul.mubr.bf16.vlgmr.msra.gmra.mrb[20].mxu0 %v138_v46  ;;  %v10513_v46 = vld [vmem:[%s13784_s1 + $0x7e0] sm:$0xff]  }
  0xc4   :  { %6838 = vmatmul.mubr.bf16.vlgmr.msra.gmra.mrb[20].mxu1 %v140_v47  ;;  %9452 = vmatpush3.bf16.msra.mxu0 %v10466_v50 }
  0xc5   :  { %9474 = vmatpush3.bf16.msra.mxu1 %v10467_v51  ;;  %9453 = vmatprep.subr.bf16.mxu0 %v10468_v52  ;;  %v10515_v51 = vld [vmem:[%s13784_s1 + $0x7a0] sm:$0xff]  }
  0xc6   :  { %9475 = vmatprep.subr.bf16.mxu1 %v10469_v53  ;;  %6877 = vmatprep.mubr.bf16.mxu0 %v143_v19  ;;  %v8409_v52 = vld [vmem:[%s13785_s2] ss:$0 sm:$0xff]  ;;  %v10534_v19 = vld [vmem:[%s13784_s1 + $0x808] sm:$0xff]  }
  0xc7   :  { %6917 = vmatprep.mubr.bf16.mxu1 %v145_v20  ;;  %v10535_v20 = vld [vmem:[%s13784_s1 + $0x888] sm:$0xff]  }
  0xc8   :  { %9454 = vmatpush3.bf16.msra.mxu0 %v10470_v54 }
  0xc9   :  { %9476 = vmatpush3.bf16.msra.mxu1 %v10471_v55  ;;  %9455 = vmatprep.subr.bf16.mxu0 %v10472_v56  ;;  %v10516_v55 = vld [vmem:[%s13784_s1 + $0x768] sm:$0xff]  }
  0xca   :  { %9477 = vmatprep.subr.bf16.mxu1 %v10473_v57  ;;  %v10517_v57 = vld [vmem:[%s13784_s1 + $0x7e8] sm:$0xff]  }
  0xcc   :  { %9456 = vmatpush3.bf16.msra.mxu0 %v10474_v58 }
  0xcd   :  { %9478 = vmatpush3.bf16.msra.mxu1 %v10475_v59  ;;  %9457 = vmatprep.subr.bf16.mxu0 %v10476_v60  ;;  %v10518_v59 = vld [vmem:[%s13784_s1 + $0x728] sm:$0xff]  }
  0xce   :  { %9479 = vmatprep.subr.bf16.mxu1 %v10477_v61  ;;  %v10519_v60 = vld [vmem:[%s13784_s1 + $0x7a8] sm:$0xff]   ;;  %v10520_v61 = vld [vmem:[%s13784_s1 + $0x770] sm:$0xff]  }
  0xd0   :  { %9458 = vmatpush3.bf16.msra.mxu0 %v10478_v62  ;;  %v10521_v62 = vld [vmem:[%s13784_s1 + $0x7f0] sm:$0xff]  }
  0xd1   :  { %9480 = vmatpush3.bf16.msra.mxu1 %v10479_v63  ;;  %9459 = vmatprep.subr.bf16.mxu0 %v10480_v0  ;;  %v10522_v63 = vld [vmem:[%s13784_s1 + $0x730] sm:$0xff]  }
  0xd2   :  { %9481 = vmatprep.subr.bf16.mxu1 %v10481_v1  ;;  %v10523_v0 = vld [vmem:[%s13784_s1 + $0x7b0] sm:$0xff]   ;;  %v10524_v1 = vld [vmem:[%s13784_s1 + $0x778] sm:$0xff]  }
  0xd4   :  { %9460 = vmatpush3.bf16.msra.mxu0 %v10482_v2  ;;  %v10525_v2 = vld [vmem:[%s13784_s1 + $0x7f8] sm:$0xff]  }
  0xd5   :  { %9482 = vmatpush3.bf16.msra.mxu1 %v10483_v3  ;;  %9461 = vmatprep.subr.bf16.mxu0 %v10484_v4  ;;  %v10526_v3 = vld [vmem:[%s13784_s1 + $0x738] sm:$0xff]  }
  0xd6   :  { %9483 = vmatprep.subr.bf16.mxu1 %v10485_v5  ;;  %v10527_v4 = vld [vmem:[%s13784_s1 + $0x7b8] sm:$0xff]   ;;  %v51_v5 = vld [vmem:[%s13783_s0 + $0xe8] sm:$0xff] }
  0xd8   :  { %9462 = vmatpush3.bf16.msra.mxu0 %v10486_v6  ;;  %v147_v6 = vpack.c.bf16 %v51_v5, %v51_v5  ;;  %v10564_v5 = vld [vmem:[%s13784_s1 + $0x948] sm:$0xff]  }
  0xd9   :  { %9484 = vmatpush3.bf16.msra.mxu1 %v10487_v7  ;;  %9463 = vmatprep.subr.bf16.mxu0 %v10488_v8  ;;  %v53_v7 = vld [vmem:[%s13783_s0 + $0xf8] sm:$0xff]  ;;  %v50_v8 = vld [vmem:[%s13783_s0 + $0xe0] sm:$0xff] }
  0xda   :  { %9485 = vmatprep.subr.bf16.mxu1 %v10489_v9  ;;  %v52_v9 = vld [vmem:[%s13783_s0 + $0xf0] sm:$0xff] }
  0xdc   :  { %9464 = vmatpush3.bf16.msra.mxu0 %v10490_v10  ;;  %v149_v10 = vpack.c.bf16 %v53_v7, %v53_v7  ;;  %v10566_v7 = vld [vmem:[%s13784_s1 + $0x908] sm:$0xff]  }
  0xdd   :  { %9486 = vmatpush3.bf16.msra.mxu1 %v10491_v11  ;;  %9465 = vmatprep.subr.bf16.mxu0 %v10492_v12  ;;  %v146_v11 = vpack.c.bf16 %v50_v8, %v50_v8  ;;  %v148_v12 = vpack.c.bf16 %v52_v9, %v52_v9  ;;  %v10567_v8 = vld [vmem:[%s13784_s1 + $0x988] sm:$0xff]   ;;  %v10568_v9 = vld [vmem:[%s13784_s1 + $0x950] sm:$0xff]  }
  0xde   :  { %9487 = vmatprep.subr.bf16.mxu1 %v10493_v13  ;;  %v10528_v13 = vld [vmem:[%s13784_s1 + $0x840] sm:$0xff]  }
  0xe0   :  { %9466 = vmatpush3.bf16.msra.mxu0 %v10494_v14  ;;  %v10529_v14 = vld [vmem:[%s13784_s1 + $0x8c0] sm:$0xff]  }
  0xe1   :  { %9488 = vmatpush3.bf16.msra.mxu1 %v10495_v15  ;;  %9495 = vmatprep.subr.bf16.mxu0 %v10496_v24  ;;  %v10530_v15 = vld [vmem:[%s13784_s1 + $0x800] sm:$0xff]   ;;  %v10539_v24 = vld [vmem:[%s13784_s1 + $0x890] sm:$0xff]  }
  0xe2   :  { %9517 = vmatprep.subr.bf16.mxu1 %v10497_v25  ;;  %v10540_v25 = vld [vmem:[%s13784_s1 + $0x858] sm:$0xff]  }
  0xe3   :  { %6878 = vmatmul.mubr.bf16.vlgmr.msra.gmra.mrb[24].mxu0 %v142_v21  ;;  %v10536_v21 = vld [vmem:[%s13784_s1 + $0x850] sm:$0xff]  }
  0xe4   :  { %6918 = vmatmul.mubr.bf16.vlgmr.msra.gmra.mrb[24].mxu1 %v144_v23  ;;  %9496 = vmatpush3.bf16.msra.mxu0 %v10498_v26  ;;  %v10538_v23 = vld [vmem:[%s13784_s1 + $0x810] sm:$0xff]   ;;  %v10541_v26 = vld [vmem:[%s13784_s1 + $0x8d8] sm:$0xff]  }
  0xe5   :  { %9518 = vmatpush3.bf16.msra.mxu1 %v10499_v27  ;;  %9497 = vmatprep.subr.bf16.mxu0 %v10500_v28  ;;  %v10542_v28 = vld [vmem:[%s13784_s1 + $0x818] sm:$0xff]  }
  0xe6   :  { %9519 = vmatprep.subr.bf16.mxu1 %v10501_v29  ;;  %6957 = vmatprep.mubr.bf16.mxu0 %v147_v6  ;;  %v10565_v6 = vld [vmem:[%s13784_s1 + $0x9c8] sm:$0xff]  }
  0xe7   :  { %6997 = vmatprep.mubr.bf16.mxu1 %v149_v10  ;;  %v10569_v10 = vld [vmem:[%s13784_s1 + $0x9d0] sm:$0xff]  }
  0xe8   :  { %9498 = vmatpush3.bf16.msra.mxu0 %v10502_v30  ;;  %v10543_v30 = vld [vmem:[%s13784_s1 + $0x898] sm:$0xff]  }
  0xe9   :  { %9520 = vmatpush3.bf16.msra.mxu1 %v10503_v31  ;;  %9499 = vmatprep.subr.bf16.mxu0 %v10504_v32  ;;  %v10544_v32 = vld [vmem:[%s13784_s1 + $0x860] sm:$0xff]  }
  0xea   :  { %9521 = vmatprep.subr.bf16.mxu1 %v10505_v33 }
  0xec   :  { %9500 = vmatpush3.bf16.msra.mxu0 %v10506_v34 }
  0xed   :  { %9522 = vmatpush3.bf16.msra.mxu1 %v10507_v35  ;;  %9501 = vmatprep.subr.bf16.mxu0 %v10508_v36  ;;  %v10545_v35 = vld [vmem:[%s13784_s1 + $0x8e0] sm:$0xff]  }
  0xee   :  { %9523 = vmatprep.subr.bf16.mxu1 %v10509_v37 }
  0xf0   :  { %9502 = vmatpush3.bf16.msra.mxu0 %v10510_v39 }
  0xf1   :  { %9524 = vmatpush3.bf16.msra.mxu1 %v10511_v41  ;;  %9503 = vmatprep.subr.bf16.mxu0 %v10512_v43  ;;  %v10547_v41 = vld [vmem:[%s13784_s1 + $0x8a0] sm:$0xff]  }
  0xf2   :  { %9525 = vmatprep.subr.bf16.mxu1 %v10513_v46  ;;  %v10549_v46 = vld [vmem:[%s13784_s1 + $0x8e8] sm:$0xff]  }
  0xf4   :  { %9504 = vmatpush3.bf16.msra.mxu0 %v10514_v49  ;;  %v10552_v49 = vld [vmem:[%s13784_s1 + $0x870] sm:$0xff]  }
  0xf5   :  { %9526 = vmatpush3.bf16.msra.mxu1 %v10515_v51  ;;  %9505 = vmatprep.subr.bf16.mxu0 %v10516_v55  ;;  %v10554_v51 = vld [vmem:[%s13784_s1 + $0x830] sm:$0xff]   ;;  %v10558_v55 = vld [vmem:[%s13784_s1 + $0x838] sm:$0xff]  }
  0xf6   :  { %v9203_v38 = vpop.f32.mrb[0].mxu0  ;;  %9527 = vmatprep.subr.bf16.mxu1 %v10517_v57  ;;  %v55_v57 = vld [vmem:[%s13783_s0 + $0x108] sm:$0xff] }
  0xf7   :  { %v9225_v40 = vpop.f32.mrb[0].mxu1  ;;  %v9204_v42 = vpop.f32.mrb[1].mxu0 }
  0xf8   :  { %v9205_v44 = vadd.f32 %v9204_v42, %v9203_v38  ;;  %v9226_v45 = vpop.f32.mrb[1].mxu1  ;;  %v9206_v48 = vpop.f32.mrb[2].mxu0  ;;  %9506 = vmatpush3.bf16.msra.mxu0 %v10518_v59  ;;  %v10546_v38 = vld [vmem:[%s13784_s1 + $0x820] sm:$0xff]  }
  0xf9   :  { %v9227_v47 = vadd.f32 %v9226_v45, %v9225_v40  ;;  %v9228_v50 = vpop.f32.mrb[2].mxu1  ;;  %v9207_v53 = vpop.f32.mrb[3].mxu0  ;;  %9528 = vmatpush3.bf16.msra.mxu1 %v10519_v60  ;;  %9507 = vmatprep.subr.bf16.mxu0 %v10520_v61  ;;  %v10551_v48 = vld [vmem:[%s13784_s1 + $0x8a8] sm:$0xff]   ;;  %v54_v59 = vld [vmem:[%s13783_s0 + $0x100] sm:$0xff]  ;;  %v151_v60 = vpack.c.bf16 %v55_v57, %v55_v57 }
  0xfa   :  { %v6400_v54 = vadd.f32 %v9205_v44, %v8409_v52  ;;  %v9229_v56 = vpop.f32.mrb[3].mxu1  ;;  %9529 = vmatprep.subr.bf16.mxu1 %v10521_v62  ;;  %v10548_v44 = vld [vmem:[%s13784_s1 + $0x868] sm:$0xff]   ;;  %v10553_v50 = vld [vmem:[%s13784_s1 + $0x8f0] sm:$0xff]   ;;  %v10556_v53 = vld [vmem:[%s13784_s1 + $0x878] sm:$0xff]   ;;  %v150_v62 = vpack.c.bf16 %v54_v59, %v54_v59 }
  0xfb   :  { %v10555_v52 = vld [vmem:[%s13784_s1 + $0x8b0] sm:$0xff]   ;;  %v10559_v56 = vld [vmem:[%s13784_s1 + $0x8b8] sm:$0xff]   ;;  %v10596_v57 = vld [vmem:[%s13784_s1 + $0xa48] sm:$0xff]  }
  0xfc   :  { %v11929_v58 = vadd.f32 %v9227_v47, %v6400_v54  ;;  %9508 = vmatpush3.bf16.msra.mxu0 %v10522_v63  ;;  %v10550_v47 = vld [vmem:[%s13784_s1 + $0x828] sm:$0xff]   ;;  %v10557_v54 = vld [vmem:[%s13784_s1 + $0x8f8] sm:$0xff]   ;;  %v56_v63 = vld [vmem:[%s13783_s0 + $0x110] sm:$0xff] }
  0xfd   :  { %9530 = vmatpush3.bf16.msra.mxu1 %v10523_v0  ;;  %9509 = vmatprep.subr.bf16.mxu0 %v10524_v1  ;;  %v152_v0 = vpack.c.bf16 %v56_v63, %v56_v63  ;;  %v10560_v1 = vld [vmem:[%s13784_s1 + $0x940] sm:$0xff]   ;;  %v10598_v59 = vld [vmem:[%s13784_s1 + $0xa08] sm:$0xff]   ;;  %v10602_v63 = vld [vmem:[%s13784_s1 + $0xa10] sm:$0xff]  }
  0xfe   :  { %9531 = vmatprep.subr.bf16.mxu1 %v10525_v2  ;;  %v10561_v2 = vld [vmem:[%s13784_s1 + $0x9c0] sm:$0xff]  }
 0x100   :  { %9510 = vmatpush3.bf16.msra.mxu0 %v10526_v3  ;;  %v10562_v3 = vld [vmem:[%s13784_s1 + $0x900] sm:$0xff]  }
 0x101   :  { %9532 = vmatpush3.bf16.msra.mxu1 %v10527_v4  ;;  %9539 = vmatprep.subr.bf16.mxu0 %v10528_v13  ;;  %v10563_v4 = vld [vmem:[%s13784_s1 + $0x980] sm:$0xff]   ;;  %v10572_v13 = vld [vmem:[%s13784_s1 + $0x958] sm:$0xff]  }
 0x102   :  { %9561 = vmatprep.subr.bf16.mxu1 %v10529_v14 }
 0x103   :  { %6958 = vmatmul.mubr.bf16.vlgmr.msra.gmra.mrb[28].mxu0 %v146_v11  ;;  %v10570_v11 = vld [vmem:[%s13784_s1 + $0x910] sm:$0xff]  }
 0x104   :  { %6998 = vmatmul.mubr.bf16.vlgmr.msra.gmra.mrb[28].mxu1 %v148_v12  ;;  %9540 = vmatpush3.bf16.msra.mxu0 %v10530_v15  ;;  %v10571_v12 = vld [vmem:[%s13784_s1 + $0x990] sm:$0xff]   ;;  %v10573_v15 = vld [vmem:[%s13784_s1 + $0x9d8] sm:$0xff]  }
 0x105   :  { %9562 = vmatpush3.bf16.msra.mxu1 %v10531_v16  ;;  %9541 = vmatprep.subr.bf16.mxu0 %v10532_v17  ;;  %v10574_v17 = vld [vmem:[%s13784_s1 + $0x918] sm:$0xff]  }
 0x106   :  { %9563 = vmatprep.subr.bf16.mxu1 %v10533_v18  ;;  %7037 = vmatprep.mubr.bf16.mxu0 %v151_v60  ;;  %v10599_v60 = vld [vmem:[%s13784_s1 + $0xa88] sm:$0xff]  }
 0x108   :  { %9542 = vmatpush3.bf16.msra.mxu0 %v10534_v19  ;;  %v10575_v19 = vld [vmem:[%s13784_s1 + $0x998] sm:$0xff]  }
 0x109   :  { %9564 = vmatpush3.bf16.msra.mxu1 %v10535_v20  ;;  %9543 = vmatprep.subr.bf16.mxu0 %v10536_v21 }
 0x10a   :  { %9565 = vmatprep.subr.bf16.mxu1 %v10537_v22  ;;  %v10576_v22 = vld [vmem:[%s13784_s1 + $0x960] sm:$0xff]  }
 0x10c   :  { %9544 = vmatpush3.bf16.msra.mxu0 %v10538_v23 }
 0x10d   :  { %9566 = vmatpush3.bf16.msra.mxu1 %v10539_v24  ;;  %9545 = vmatprep.subr.bf16.mxu0 %v10540_v25  ;;  %v10577_v25 = vld [vmem:[%s13784_s1 + $0x9e0] sm:$0xff]  }
 0x10e   :  { %9567 = vmatprep.subr.bf16.mxu1 %v10541_v26 }
 0x110   :  { %9546 = vmatpush3.bf16.msra.mxu0 %v10542_v28  ;;  %v10578_v28 = vld [vmem:[%s13784_s1 + $0x920] sm:$0xff]  }
 0x111   :  { %9568 = vmatpush3.bf16.msra.mxu1 %v10543_v30  ;;  %9547 = vmatprep.subr.bf16.mxu0 %v10544_v32  ;;  %v10579_v30 = vld [vmem:[%s13784_s1 + $0x9a0] sm:$0xff]  }
 0x112   :  { %9569 = vmatprep.subr.bf16.mxu1 %v10545_v35  ;;  %v10582_v35 = vld [vmem:[%s13784_s1 + $0x928] sm:$0xff]  }
 0x114   :  { %9548 = vmatpush3.bf16.msra.mxu0 %v10546_v38  ;;  %v10585_v38 = vld [vmem:[%s13784_s1 + $0x9f0] sm:$0xff]  }
 0x115   :  { %9570 = vmatpush3.bf16.msra.mxu1 %v10547_v41  ;;  %9549 = vmatprep.subr.bf16.mxu0 %v10548_v44  ;;  %v10588_v41 = vld [vmem:[%s13784_s1 + $0x978] sm:$0xff]  }
 0x116   :  { %v9247_v27 = vpop.f32.mrb[4].mxu0  ;;  %9571 = vmatprep.subr.bf16.mxu1 %v10549_v46  ;;  %v10591_v44 = vld [vmem:[%s13784_s1 + $0x9b8] sm:$0xff]  }
 0x117   :  { %v9269_v29 = vpop.f32.mrb[4].mxu1  ;;  %v9248_v31 = vpop.f32.mrb[5].mxu0  ;;  %v61_v46 = vld [vmem:[%s13783_s0 + $0x138] sm:$0xff] }
 0x118   :  { %v9249_v33 = vadd.f32 %v9248_v31, %v9247_v27  ;;  %v9270_v34 = vpop.f32.mrb[5].mxu1  ;;  %v9250_v37 = vpop.f32.mrb[6].mxu0  ;;  %9550 = vmatpush3.bf16.msra.mxu0 %v10550_v47 }
 0x119   :  { %v9271_v36 = vadd.f32 %v9270_v34, %v9269_v29  ;;  %v9272_v40 = vpop.f32.mrb[6].mxu1  ;;  %v9251_v42 = vpop.f32.mrb[7].mxu0  ;;  %9572 = vmatpush3.bf16.msra.mxu1 %v10551_v48  ;;  %9551 = vmatprep.subr.bf16.mxu0 %v10552_v49  ;;  %v10581_v34 = vld [vmem:[%s13784_s1 + $0x9e8] sm:$0xff]   ;;  %v10584_v37 = vld [vmem:[%s13784_s1 + $0x970] sm:$0xff]   ;;  %v157_v48 = vpack.c.bf16 %v61_v46, %v61_v46  ;;  %v58_v49 = vld [vmem:[%s13783_s0 + $0x120] sm:$0xff] }
 0x11a   :  { %v6480_v39 = vadd.f32 %v9249_v33, %v11929_v58  ;;  %v9273_v45 = vpop.f32.mrb[7].mxu1  ;;  %9573 = vmatprep.subr.bf16.mxu1 %v10553_v50  ;;  %v57_v58 = vld [vmem:[%s13783_s0 + $0x118] sm:$0xff]  ;;  %v10580_v33 = vld [vmem:[%s13784_s1 + $0x968] sm:$0xff]   ;;  %v10587_v40 = vld [vmem:[%s13784_s1 + $0x9b0] sm:$0xff]  }
 0x11b   :  { %v153_v61 = vpack.c.bf16 %v57_v58, %v57_v58  ;;  %v10589_v42 = vld [vmem:[%s13784_s1 + $0x9f8] sm:$0xff]   ;;  %v59_v45 = vld [vmem:[%s13783_s0 + $0x128] sm:$0xff]  ;;  %v60_v50 = vld [vmem:[%s13783_s0 + $0x130] sm:$0xff] }
 0x11c   :  { %v12034_v43 = vadd.f32 %v9271_v36, %v6480_v39  ;;  %9552 = vmatpush3.bf16.msra.mxu0 %v10554_v51  ;;  %v10583_v36 = vld [vmem:[%s13784_s1 + $0x9a8] sm:$0xff]   ;;  %v10586_v39 = vld [vmem:[%s13784_s1 + $0x930] sm:$0xff]   ;;  %v155_v47 = vpack.c.bf16 %v59_v45, %v59_v45  ;;  %v154_v51 = vpack.c.bf16 %v58_v49, %v58_v49 }
 0x11d   :  { %9574 = vmatpush3.bf16.msra.mxu1 %v10555_v52  ;;  %9553 = vmatprep.subr.bf16.mxu0 %v10556_v53  ;;  %v156_v52 = vpack.c.bf16 %v60_v50, %v60_v50  ;;  %v10592_v53 = vld [vmem:[%s13784_s1 + $0xa40] sm:$0xff]   ;;  %v10597_v58 = vld [vmem:[%s13784_s1 + $0xac8] sm:$0xff]   ;;  %v10632_v49 = vld [vmem:[%s13784_s1 + $0xb50] sm:$0xff]  }
 0x11e   :  { %9575 = vmatprep.subr.bf16.mxu1 %v10557_v54  ;;  %7077 = vmatprep.mubr.bf16.mxu1 %v153_v61  ;;  %v10593_v54 = vld [vmem:[%s13784_s1 + $0xac0] sm:$0xff]   ;;  %v10600_v61 = vld [vmem:[%s13784_s1 + $0xa50] sm:$0xff]   ;;  %v10628_v45 = vld [vmem:[%s13784_s1 + $0xb48] sm:$0xff]  }
 0x11f   :  { %v10629_v46 = vld [vmem:[%s13784_s1 + $0xbc8] sm:$0xff]   ;;  %v10633_v50 = vld [vmem:[%s13784_s1 + $0xbd0] sm:$0xff]  }
 0x120   :  { %9554 = vmatpush3.bf16.msra.mxu0 %v10558_v55  ;;  %v10594_v55 = vld [vmem:[%s13784_s1 + $0xa00] sm:$0xff]  }
 0x121   :  { %9576 = vmatpush3.bf16.msra.mxu1 %v10559_v56  ;;  %9583 = vmatprep.subr.bf16.mxu0 %v10560_v1  ;;  %v10595_v56 = vld [vmem:[%s13784_s1 + $0xa80] sm:$0xff]   ;;  %v10604_v1 = vld [vmem:[%s13784_s1 + $0xa58] sm:$0xff]  }
 0x122   :  { %9605 = vmatprep.subr.bf16.mxu1 %v10561_v2  ;;  %v10605_v2 = vld [vmem:[%s13784_s1 + $0xad8] sm:$0xff]  }
 0x123   :  { %7038 = vmatmul.mubr.bf16.vlgmr.msra.gmra.mrb[32].mxu0 %v150_v62  ;;  %v10601_v62 = vld [vmem:[%s13784_s1 + $0xad0] sm:$0xff]  }
 0x124   :  { %7078 = vmatmul.mubr.bf16.vlgmr.msra.gmra.mrb[32].mxu1 %v152_v0  ;;  %9584 = vmatpush3.bf16.msra.mxu0 %v10562_v3  ;;  %v10603_v0 = vld [vmem:[%s13784_s1 + $0xa90] sm:$0xff]  }
 0x125   :  { %9606 = vmatpush3.bf16.msra.mxu1 %v10563_v4  ;;  %9585 = vmatprep.subr.bf16.mxu0 %v10564_v5  ;;  %v10606_v4 = vld [vmem:[%s13784_s1 + $0xa18] sm:$0xff]  }
 0x126   :  { %9607 = vmatprep.subr.bf16.mxu1 %v10565_v6  ;;  %7117 = vmatprep.mubr.bf16.mxu0 %v155_v47  ;;  %v10607_v6 = vld [vmem:[%s13784_s1 + $0xa98] sm:$0xff]   ;;  %v10630_v47 = vld [vmem:[%s13784_s1 + $0xb08] sm:$0xff]  }
 0x127   :  { %7157 = vmatprep.mubr.bf16.mxu1 %v157_v48  ;;  %v10631_v48 = vld [vmem:[%s13784_s1 + $0xb88] sm:$0xff]  }
 0x128   :  { %9586 = vmatpush3.bf16.msra.mxu0 %v10566_v7 }
 0x129   :  { %9608 = vmatpush3.bf16.msra.mxu1 %v10567_v8  ;;  %9587 = vmatprep.subr.bf16.mxu0 %v10568_v9  ;;  %v10608_v8 = vld [vmem:[%s13784_s1 + $0xa60] sm:$0xff]  }
 0x12a   :  { %9609 = vmatprep.subr.bf16.mxu1 %v10569_v10 }
 0x12c   :  { %9588 = vmatpush3.bf16.msra.mxu0 %v10570_v11  ;;  %v10609_v11 = vld [vmem:[%s13784_s1 + $0xae0] sm:$0xff]  }
 0x12d   :  { %9610 = vmatpush3.bf16.msra.mxu1 %v10571_v12  ;;  %9589 = vmatprep.subr.bf16.mxu0 %v10572_v13 }
 0x12e   :  { %9611 = vmatprep.subr.bf16.mxu1 %v10573_v15 }
 0x130   :  { %9590 = vmatpush3.bf16.msra.mxu0 %v10574_v17  ;;  %v10611_v17 = vld [vmem:[%s13784_s1 + $0xaa0] sm:$0xff]  }
 0x131   :  { %9612 = vmatpush3.bf16.msra.mxu1 %v10575_v19  ;;  %9591 = vmatprep.subr.bf16.mxu0 %v10576_v22  ;;  %v10613_v22 = vld [vmem:[%s13784_s1 + $0xae8] sm:$0xff]  }
 0x132   :  { %9613 = vmatprep.subr.bf16.mxu1 %v10577_v25  ;;  %v10616_v25 = vld [vmem:[%s13784_s1 + $0xa70] sm:$0xff]  }
 0x134   :  { %9592 = vmatpush3.bf16.msra.mxu0 %v10578_v28  ;;  %v10619_v28 = vld [vmem:[%s13784_s1 + $0xab0] sm:$0xff]  }
 0x135   :  { %9614 = vmatpush3.bf16.msra.mxu1 %v10579_v30  ;;  %9593 = vmatprep.subr.bf16.mxu0 %v10580_v33  ;;  %v10621_v30 = vld [vmem:[%s13784_s1 + $0xaf8] sm:$0xff]   ;;  %v63_v33 = vld [vmem:[%s13783_s0 + $0x148] sm:$0xff] }
 0x136   :  { %v9291_v14 = vpop.f32.mrb[8].mxu0  ;;  %9615 = vmatprep.subr.bf16.mxu1 %v10581_v34  ;;  %v159_v34 = vpack.c.bf16 %v63_v33, %v63_v33  ;;  %v10660_v33 = vld [vmem:[%s13784_s1 + $0xc48] sm:$0xff]  }
 0x137   :  { %v9313_v16 = vpop.f32.mrb[8].mxu1  ;;  %v9292_v18 = vpop.f32.mrb[9].mxu0 }
 0x138   :  { %v9293_v20 = vadd.f32 %v9292_v18, %v9291_v14  ;;  %v9314_v21 = vpop.f32.mrb[9].mxu1  ;;  %v9294_v24 = vpop.f32.mrb[10].mxu0  ;;  %9594 = vmatpush3.bf16.msra.mxu0 %v10582_v35  ;;  %v10610_v14 = vld [vmem:[%s13784_s1 + $0xa20] sm:$0xff]   ;;  %v65_v35 = vld [vmem:[%s13783_s0 + $0x158] sm:$0xff] }
 0x139   :  { %v9315_v23 = vadd.f32 %v9314_v21, %v9313_v16  ;;  %v9316_v27 = vpop.f32.mrb[10].mxu1  ;;  %v9295_v29 = vpop.f32.mrb[11].mxu0  ;;  %9616 = vmatpush3.bf16.msra.mxu1 %v10583_v36  ;;  %9595 = vmatprep.subr.bf16.mxu0 %v10584_v37  ;;  %v10615_v24 = vld [vmem:[%s13784_s1 + $0xaa8] sm:$0xff]   ;;  %v62_v36 = vld [vmem:[%s13783_s0 + $0x140] sm:$0xff]  ;;  %v64_v37 = vld [vmem:[%s13783_s0 + $0x150] sm:$0xff] }
 0x13a   :  { %v6560_v26 = vadd.f32 %v9293_v20, %v12034_v43  ;;  %v9317_v32 = vpop.f32.mrb[11].mxu1  ;;  %9617 = vmatprep.subr.bf16.mxu1 %v10585_v38  ;;  %v10590_v43 = vld [vmem:[%s13784_s1 + $0x938] sm:$0xff]   ;;  %v10612_v20 = vld [vmem:[%s13784_s1 + $0xa68] sm:$0xff]   ;;  %v10618_v27 = vld [vmem:[%s13784_s1 + $0xa30] sm:$0xff]   ;;  %v161_v38 = vpack.c.bf16 %v65_v35, %v65_v35 }
 0x13b   :  { %v10620_v29 = vld [vmem:[%s13784_s1 + $0xa78] sm:$0xff]   ;;  %v10662_v35 = vld [vmem:[%s13784_s1 + $0xc08] sm:$0xff]  }
 0x13c   :  { %v12145_v31 = vadd.f32 %v9315_v23, %v6560_v26  ;;  %9596 = vmatpush3.bf16.msra.mxu0 %v10586_v39  ;;  %v10614_v23 = vld [vmem:[%s13784_s1 + $0xa28] sm:$0xff]   ;;  %v10617_v26 = vld [vmem:[%s13784_s1 + $0xaf0] sm:$0xff]   ;;  %v10623_v32 = vld [vmem:[%s13784_s1 + $0xab8] sm:$0xff]   ;;  %v158_v39 = vpack.c.bf16 %v62_v36, %v62_v36 }
 0x13d   :  { %9618 = vmatpush3.bf16.msra.mxu1 %v10587_v40  ;;  %9597 = vmatprep.subr.bf16.mxu0 %v10588_v41  ;;  %v160_v40 = vpack.c.bf16 %v64_v37, %v64_v37  ;;  %v10624_v41 = vld [vmem:[%s13784_s1 + $0xb40] sm:$0xff]   ;;  %v10663_v36 = vld [vmem:[%s13784_s1 + $0xc88] sm:$0xff]   ;;  %v10664_v37 = vld [vmem:[%s13784_s1 + $0xc50] sm:$0xff]  }
 0x13e   :  { %9619 = vmatprep.subr.bf16.mxu1 %v10589_v42  ;;  %v10625_v42 = vld [vmem:[%s13784_s1 + $0xbc0] sm:$0xff]  }
 0x140   :  { %9598 = vmatpush3.bf16.msra.mxu0 %v10590_v43  ;;  %v10626_v43 = vld [vmem:[%s13784_s1 + $0xb00] sm:$0xff]  }
 0x141   :  { %9620 = vmatpush3.bf16.msra.mxu1 %v10591_v44  ;;  %9627 = vmatprep.subr.bf16.mxu0 %v10592_v53  ;;  %v10627_v44 = vld [vmem:[%s13784_s1 + $0xb80] sm:$0xff]   ;;  %v10636_v53 = vld [vmem:[%s13784_s1 + $0xb58] sm:$0xff]  }
 0x142   :  { %9649 = vmatprep.subr.bf16.mxu1 %v10593_v54  ;;  %v10637_v54 = vld [vmem:[%s13784_s1 + $0xbd8] sm:$0xff]  }
 0x143   :  { %7118 = vmatmul.mubr.bf16.vlgmr.msra.gmra.mrb[36].mxu0 %v154_v51  ;;  %v10634_v51 = vld [vmem:[%s13784_s1 + $0xb10] sm:$0xff]  }
 0x144   :  { %7158 = vmatmul.mubr.bf16.vlgmr.msra.gmra.mrb[36].mxu1 %v156_v52  ;;  %9628 = vmatpush3.bf16.msra.mxu0 %v10594_v55  ;;  %v10635_v52 = vld [vmem:[%s13784_s1 + $0xb90] sm:$0xff]  }
 0x145   :  { %9650 = vmatpush3.bf16.msra.mxu1 %v10595_v56  ;;  %9629 = vmatprep.subr.bf16.mxu0 %v10596_v57  ;;  %v10638_v56 = vld [vmem:[%s13784_s1 + $0xb18] sm:$0xff]  }
 0x146   :  { %9651 = vmatprep.subr.bf16.mxu1 %v10597_v58  ;;  %7197 = vmatprep.mubr.bf16.mxu0 %v159_v34  ;;  %v10639_v58 = vld [vmem:[%s13784_s1 + $0xb98] sm:$0xff]   ;;  %v10661_v34 = vld [vmem:[%s13784_s1 + $0xcc8] sm:$0xff]  }
 0x147   :  { %7237 = vmatprep.mubr.bf16.mxu1 %v161_v38  ;;  %v10665_v38 = vld [vmem:[%s13784_s1 + $0xcd0] sm:$0xff]  }
 0x148   :  { %9630 = vmatpush3.bf16.msra.mxu0 %v10598_v59 }
 0x149   :  { %9652 = vmatpush3.bf16.msra.mxu1 %v10599_v60  ;;  %9631 = vmatprep.subr.bf16.mxu0 %v10600_v61  ;;  %v10640_v60 = vld [vmem:[%s13784_s1 + $0xb60] sm:$0xff]  }
 0x14a   :  { %9653 = vmatprep.subr.bf16.mxu1 %v10601_v62 }
 0x14c   :  { %9632 = vmatpush3.bf16.msra.mxu0 %v10602_v63  ;;  %v10641_v63 = vld [vmem:[%s13784_s1 + $0xbe0] sm:$0xff]  }
 0x14d   :  { %9654 = vmatpush3.bf16.msra.mxu1 %v10603_v0  ;;  %9633 = vmatprep.subr.bf16.mxu0 %v10604_v1 }
 0x14e   :  { %9655 = vmatprep.subr.bf16.mxu1 %v10605_v2  ;;  %v10642_v2 = vld [vmem:[%s13784_s1 + $0xb20] sm:$0xff]  }
 0x150   :  { %9634 = vmatpush3.bf16.msra.mxu0 %v10606_v4 }
 0x151   :  { %9656 = vmatpush3.bf16.msra.mxu1 %v10607_v6  ;;  %9635 = vmatprep.subr.bf16.mxu0 %v10608_v8  ;;  %v10644_v8 = vld [vmem:[%s13784_s1 + $0xb68] sm:$0xff]  }
 0x152   :  { %9657 = vmatprep.subr.bf16.mxu1 %v10609_v11  ;;  %v10646_v11 = vld [vmem:[%s13784_s1 + $0xb28] sm:$0xff]  }
 0x154   :  { %9636 = vmatpush3.bf16.msra.mxu0 %v10610_v14  ;;  %v10649_v14 = vld [vmem:[%s13784_s1 + $0xbf0] sm:$0xff]  }
 0x155   :  { %9658 = vmatpush3.bf16.msra.mxu1 %v10611_v17  ;;  %9637 = vmatprep.subr.bf16.mxu0 %v10612_v20  ;;  %v10652_v17 = vld [vmem:[%s13784_s1 + $0xb78] sm:$0xff]  }
 0x156   :  { %v9335_v3 = vpop.f32.mrb[12].mxu0  ;;  %9659 = vmatprep.subr.bf16.mxu1 %v10613_v22  ;;  %v10655_v20 = vld [vmem:[%s13784_s1 + $0xbb8] sm:$0xff]  }
 0x157   :  { %v9357_v5 = vpop.f32.mrb[12].mxu1  ;;  %v9336_v7 = vpop.f32.mrb[13].mxu0  ;;  %v69_v22 = vld [vmem:[%s13783_s0 + $0x178] sm:$0xff] }
 0x158   :  { %v9337_v9 = vadd.f32 %v9336_v7, %v9335_v3  ;;  %v9358_v10 = vpop.f32.mrb[13].mxu1  ;;  %v9338_v13 = vpop.f32.mrb[14].mxu0  ;;  %9638 = vmatpush3.bf16.msra.mxu0 %v10614_v23  ;;  %v66_v23 = vld [vmem:[%s13783_s0 + $0x160] sm:$0xff] }
 0x159   :  { %v9359_v12 = vadd.f32 %v9358_v10, %v9357_v5  ;;  %v9360_v16 = vpop.f32.mrb[14].mxu1  ;;  %v9339_v18 = vpop.f32.mrb[15].mxu0  ;;  %9660 = vmatpush3.bf16.msra.mxu1 %v10615_v24  ;;  %9639 = vmatprep.subr.bf16.mxu0 %v10616_v25  ;;  %v10643_v5 = vld [vmem:[%s13784_s1 + $0xba0] sm:$0xff]   ;;  %v10645_v10 = vld [vmem:[%s13784_s1 + $0xbe8] sm:$0xff]   ;;  %v10648_v13 = vld [vmem:[%s13784_s1 + $0xb70] sm:$0xff]   ;;  %v165_v25 = vpack.c.bf16 %v69_v22, %v69_v22 }
 0x15a   :  { %v6640_v15 = vadd.f32 %v9337_v9, %v12145_v31  ;;  %v9361_v21 = vpop.f32.mrb[15].mxu1  ;;  %9661 = vmatprep.subr.bf16.mxu1 %v10617_v26  ;;  %v10622_v31 = vld [vmem:[%s13784_s1 + $0xa38] sm:$0xff]   ;;  %v10651_v16 = vld [vmem:[%s13784_s1 + $0xbb0] sm:$0xff]   ;;  %v162_v26 = vpack.c.bf16 %v66_v23, %v66_v23  ;;  %v10693_v22 = vld [vmem:[%s13784_s1 + $0xdc8] sm:$0xff]  }
 0x15b   :  { %v10653_v18 = vld [vmem:[%s13784_s1 + $0xbf8] sm:$0xff]   ;;  %v67_v21 = vld [vmem:[%s13783_s0 + $0x168] sm:$0xff] }
 0x15c   :  { %v12256_v19 = vadd.f32 %v9359_v12, %v6640_v15  ;;  %9640 = vmatpush3.bf16.msra.mxu0 %v10618_v27  ;;  %v10647_v12 = vld [vmem:[%s13784_s1 + $0xba8] sm:$0xff]   ;;  %v10650_v15 = vld [vmem:[%s13784_s1 + $0xb30] sm:$0xff]   ;;  %v163_v24 = vpack.c.bf16 %v67_v21, %v67_v21 }
 0x15d   :  { %9662 = vmatpush3.bf16.msra.mxu1 %v10619_v28  ;;  %9641 = vmatprep.subr.bf16.mxu0 %v10620_v29  ;;  %v68_v27 = vld [vmem:[%s13783_s0 + $0x170] sm:$0xff]  ;;  %v10656_v29 = vld [vmem:[%s13784_s1 + $0xc40] sm:$0xff]   ;;  %v10692_v21 = vld [vmem:[%s13784_s1 + $0xd48] sm:$0xff]  }
 0x15e   :  { %9663 = vmatprep.subr.bf16.mxu1 %v10621_v30  ;;  %v164_v28 = vpack.c.bf16 %v68_v27, %v68_v27  ;;  %v10657_v30 = vld [vmem:[%s13784_s1 + $0xcc0] sm:$0xff]   ;;  %v10694_v23 = vld [vmem:[%s13784_s1 + $0xd08] sm:$0xff]   ;;  %v10698_v27 = vld [vmem:[%s13784_s1 + $0xd10] sm:$0xff]  }
 0x160   :  { %9642 = vmatpush3.bf16.msra.mxu0 %v10622_v31  ;;  %v10658_v31 = vld [vmem:[%s13784_s1 + $0xc00] sm:$0xff]  }
 0x161   :  { %9664 = vmatpush3.bf16.msra.mxu1 %v10623_v32  ;;  %9671 = vmatprep.subr.bf16.mxu0 %v10624_v41  ;;  %v10659_v32 = vld [vmem:[%s13784_s1 + $0xc80] sm:$0xff]   ;;  %v10668_v41 = vld [vmem:[%s13784_s1 + $0xc58] sm:$0xff]  }
 0x162   :  { %9693 = vmatprep.subr.bf16.mxu1 %v10625_v42 }
 0x163   :  { %7198 = vmatmul.mubr.bf16.vlgmr.msra.gmra.mrb[40].mxu0 %v158_v39  ;;  %v10666_v39 = vld [vmem:[%s13784_s1 + $0xc10] sm:$0xff]  }
 0x164   :  { %7238 = vmatmul.mubr.bf16.vlgmr.msra.gmra.mrb[40].mxu1 %v160_v40  ;;  %9672 = vmatpush3.bf16.msra.mxu0 %v10626_v43  ;;  %v10667_v40 = vld [vmem:[%s13784_s1 + $0xc90] sm:$0xff]   ;;  %v10669_v43 = vld [vmem:[%s13784_s1 + $0xcd8] sm:$0xff]  }
 0x165   :  { %9694 = vmatpush3.bf16.msra.mxu1 %v10627_v44  ;;  %9673 = vmatprep.subr.bf16.mxu0 %v10628_v45  ;;  %v10670_v45 = vld [vmem:[%s13784_s1 + $0xc18] sm:$0xff]  }
 0x166   :  { %9695 = vmatprep.subr.bf16.mxu1 %v10629_v46  ;;  %7277 = vmatprep.mubr.bf16.mxu0 %v163_v24  ;;  %v10695_v24 = vld [vmem:[%s13784_s1 + $0xd88] sm:$0xff]  }
 0x167   :  { %7317 = vmatprep.mubr.bf16.mxu1 %v165_v25  ;;  %v10696_v25 = vld [vmem:[%s13784_s1 + $0xd50] sm:$0xff]  }
 0x168   :  { %9674 = vmatpush3.bf16.msra.mxu0 %v10630_v47  ;;  %v10671_v47 = vld [vmem:[%s13784_s1 + $0xc98] sm:$0xff]  }
 0x169   :  { %9696 = vmatpush3.bf16.msra.mxu1 %v10631_v48  ;;  %9675 = vmatprep.subr.bf16.mxu0 %v10632_v49 }
 0x16a   :  { %9697 = vmatprep.subr.bf16.mxu1 %v10633_v50  ;;  %v10672_v50 = vld [vmem:[%s13784_s1 + $0xc60] sm:$0xff]  }
 0x16c   :  { %9676 = vmatpush3.bf16.msra.mxu0 %v10634_v51 }
 0x16d   :  { %9698 = vmatpush3.bf16.msra.mxu1 %v10635_v52  ;;  %9677 = vmatprep.subr.bf16.mxu0 %v10636_v53  ;;  %v10673_v53 = vld [vmem:[%s13784_s1 + $0xce0] sm:$0xff]  }
 0x16e   :  { %9699 = vmatprep.subr.bf16.mxu1 %v10637_v54 }
 0x170   :  { %9678 = vmatpush3.bf16.msra.mxu0 %v10638_v56  ;;  %v10674_v56 = vld [vmem:[%s13784_s1 + $0xc20] sm:$0xff]  }
 0x171   :  { %9700 = vmatpush3.bf16.msra.mxu1 %v10639_v58  ;;  %9679 = vmatprep.subr.bf16.mxu0 %v10640_v60  ;;  %v10675_v58 = vld [vmem:[%s13784_s1 + $0xca0] sm:$0xff]  }
 0x172   :  { %9701 = vmatprep.subr.bf16.mxu1 %v10641_v63  ;;  %v10678_v63 = vld [vmem:[%s13784_s1 + $0xc28] sm:$0xff]  }
 0x174   :  { %9680 = vmatpush3.bf16.msra.mxu0 %v10642_v2  ;;  %v10681_v2 = vld [vmem:[%s13784_s1 + $0xcf0] sm:$0xff]  }
 0x175   :  { %9702 = vmatpush3.bf16.msra.mxu1 %v10643_v5  ;;  %9681 = vmatprep.subr.bf16.mxu0 %v10644_v8  ;;  %v10684_v5 = vld [vmem:[%s13784_s1 + $0xc78] sm:$0xff]  }
 0x176   :  { %v9379_v55 = vpop.f32.mrb[16].mxu0  ;;  %9703 = vmatprep.subr.bf16.mxu1 %v10645_v10  ;;  %v10687_v8 = vld [vmem:[%s13784_s1 + $0xcb8] sm:$0xff]  }
 0x177   :  { %v9401_v57 = vpop.f32.mrb[16].mxu1  ;;  %v9380_v59 = vpop.f32.mrb[17].mxu0  ;;  %v73_v10 = vld [vmem:[%s13783_s0 + $0x198] sm:$0xff] }
 0x178   :  { %v9381_v61 = vadd.f32 %v9380_v59, %v9379_v55  ;;  %v9402_v62 = vpop.f32.mrb[17].mxu1  ;;  %v9382_v1 = vpop.f32.mrb[18].mxu0  ;;  %9682 = vmatpush3.bf16.msra.mxu0 %v10646_v11 }
 0x179   :  { %v9403_v0 = vadd.f32 %v9402_v62, %v9401_v57  ;;  %v9404_v4 = vpop.f32.mrb[18].mxu1  ;;  %v9383_v6 = vpop.f32.mrb[19].mxu0  ;;  %9704 = vmatpush3.bf16.msra.mxu1 %v10647_v12  ;;  %9683 = vmatprep.subr.bf16.mxu0 %v10648_v13  ;;  %v10677_v62 = vld [vmem:[%s13784_s1 + $0xce8] sm:$0xff]   ;;  %v10680_v1 = vld [vmem:[%s13784_s1 + $0xc70] sm:$0xff]   ;;  %v169_v12 = vpack.c.bf16 %v73_v10, %v73_v10  ;;  %v70_v13 = vld [vmem:[%s13783_s0 + $0x180] sm:$0xff] }
 0x17a   :  { %v6720_v3 = vadd.f32 %v9381_v61, %v12256_v19  ;;  %v9405_v9 = vpop.f32.mrb[19].mxu1  ;;  %9705 = vmatprep.subr.bf16.mxu1 %v10649_v14  ;;  %v10654_v19 = vld [vmem:[%s13784_s1 + $0xb38] sm:$0xff]   ;;  %v10676_v61 = vld [vmem:[%s13784_s1 + $0xc68] sm:$0xff]   ;;  %v10683_v4 = vld [vmem:[%s13784_s1 + $0xcb0] sm:$0xff]  }
 0x17b   :  { %v10685_v6 = vld [vmem:[%s13784_s1 + $0xcf8] sm:$0xff]   ;;  %v71_v9 = vld [vmem:[%s13783_s0 + $0x188] sm:$0xff]  ;;  %v72_v14 = vld [vmem:[%s13783_s0 + $0x190] sm:$0xff] }
 0x17c   :  { %v12367_v7 = vadd.f32 %v9403_v0, %v6720_v3  ;;  %9684 = vmatpush3.bf16.msra.mxu0 %v10650_v15  ;;  %v10679_v0 = vld [vmem:[%s13784_s1 + $0xca8] sm:$0xff]   ;;  %v10682_v3 = vld [vmem:[%s13784_s1 + $0xc30] sm:$0xff]   ;;  %v167_v11 = vpack.c.bf16 %v71_v9, %v71_v9  ;;  %v166_v15 = vpack.c.bf16 %v70_v13, %v70_v13 }
 0x17d   :  { %9706 = vmatpush3.bf16.msra.mxu1 %v10651_v16  ;;  %9685 = vmatprep.subr.bf16.mxu0 %v10652_v17  ;;  %v168_v16 = vpack.c.bf16 %v72_v14, %v72_v14  ;;  %v10688_v17 = vld [vmem:[%s13784_s1 + $0xd40] sm:$0xff]   ;;  %v10724_v9 = vld [vmem:[%s13784_s1 + $0xe48] sm:$0xff]   ;;  %v10728_v13 = vld [vmem:[%s13784_s1 + $0xe50] sm:$0xff]  }
 0x17e   :  { %9707 = vmatprep.subr.bf16.mxu1 %v10653_v18  ;;  %v10689_v18 = vld [vmem:[%s13784_s1 + $0xdc0] sm:$0xff]   ;;  %v10725_v10 = vld [vmem:[%s13784_s1 + $0xec8] sm:$0xff]   ;;  %v10729_v14 = vld [vmem:[%s13784_s1 + $0xed0] sm:$0xff]  }
 0x180   :  { %9686 = vmatpush3.bf16.msra.mxu0 %v10654_v19  ;;  %v10690_v19 = vld [vmem:[%s13784_s1 + $0xd00] sm:$0xff]  }
 0x181   :  { %9708 = vmatpush3.bf16.msra.mxu1 %v10655_v20  ;;  %9715 = vmatprep.subr.bf16.mxu0 %v10656_v29  ;;  %v10691_v20 = vld [vmem:[%s13784_s1 + $0xd80] sm:$0xff]   ;;  %v10700_v29 = vld [vmem:[%s13784_s1 + $0xd58] sm:$0xff]  }
 0x182   :  { %9737 = vmatprep.subr.bf16.mxu1 %v10657_v30  ;;  %v10701_v30 = vld [vmem:[%s13784_s1 + $0xdd8] sm:$0xff]  }
 0x183   :  { %7278 = vmatmul.mubr.bf16.vlgmr.msra.gmra.mrb[44].mxu0 %v162_v26  ;;  %v10697_v26 = vld [vmem:[%s13784_s1 + $0xdd0] sm:$0xff]  }
 0x184   :  { %7318 = vmatmul.mubr.bf16.vlgmr.msra.gmra.mrb[44].mxu1 %v164_v28  ;;  %9716 = vmatpush3.bf16.msra.mxu0 %v10658_v31  ;;  %v10699_v28 = vld [vmem:[%s13784_s1 + $0xd90] sm:$0xff]  }
 0x185   :  { %9738 = vmatpush3.bf16.msra.mxu1 %v10659_v32  ;;  %9717 = vmatprep.subr.bf16.mxu0 %v10660_v33  ;;  %v10702_v32 = vld [vmem:[%s13784_s1 + $0xd18] sm:$0xff]  }
 0x186   :  { %9739 = vmatprep.subr.bf16.mxu1 %v10661_v34  ;;  %7357 = vmatprep.mubr.bf16.mxu0 %v167_v11  ;;  %v10703_v34 = vld [vmem:[%s13784_s1 + $0xd98] sm:$0xff]   ;;  %v10726_v11 = vld [vmem:[%s13784_s1 + $0xe08] sm:$0xff]  }
 0x187   :  { %7397 = vmatprep.mubr.bf16.mxu1 %v169_v12  ;;  %v10727_v12 = vld [vmem:[%s13784_s1 + $0xe88] sm:$0xff]  }
 0x188   :  { %9718 = vmatpush3.bf16.msra.mxu0 %v10662_v35 }
 0x189   :  { %9740 = vmatpush3.bf16.msra.mxu1 %v10663_v36  ;;  %9719 = vmatprep.subr.bf16.mxu0 %v10664_v37  ;;  %v10704_v36 = vld [vmem:[%s13784_s1 + $0xd60] sm:$0xff]  }
 0x18a   :  { %9741 = vmatprep.subr.bf16.mxu1 %v10665_v38 }
 0x18c   :  { %9720 = vmatpush3.bf16.msra.mxu0 %v10666_v39  ;;  %v10705_v39 = vld [vmem:[%s13784_s1 + $0xde0] sm:$0xff]  }
 0x18d   :  { %9742 = vmatpush3.bf16.msra.mxu1 %v10667_v40  ;;  %9721 = vmatprep.subr.bf16.mxu0 %v10668_v41 }
 0x18e   :  { %9743 = vmatprep.subr.bf16.mxu1 %v10669_v43 }
 0x190   :  { %9722 = vmatpush3.bf16.msra.mxu0 %v10670_v45  ;;  %v10707_v45 = vld [vmem:[%s13784_s1 + $0xda0] sm:$0xff]  }
 0x191   :  { %9744 = vmatpush3.bf16.msra.mxu1 %v10671_v47  ;;  %9723 = vmatprep.subr.bf16.mxu0 %v10672_v50  ;;  %v10709_v50 = vld [vmem:[%s13784_s1 + $0xde8] sm:$0xff]  }
 0x192   :  { %9745 = vmatprep.subr.bf16.mxu1 %v10673_v53  ;;  %v10712_v53 = vld [vmem:[%s13784_s1 + $0xd70] sm:$0xff]  }
 0x194   :  { %9724 = vmatpush3.bf16.msra.mxu0 %v10674_v56  ;;  %v10715_v56 = vld [vmem:[%s13784_s1 + $0xdb0] sm:$0xff]  }
 0x195   :  { %9746 = vmatpush3.bf16.msra.mxu1 %v10675_v58  ;;  %9725 = vmatprep.subr.bf16.mxu0 %v10676_v61  ;;  %v10717_v58 = vld [vmem:[%s13784_s1 + $0xdf8] sm:$0xff]   ;;  %v75_v61 = vld [vmem:[%s13783_s0 + $0x1a8] sm:$0xff] }
 0x196   :  { %v9423_v42 = vpop.f32.mrb[20].mxu0  ;;  %9747 = vmatprep.subr.bf16.mxu1 %v10677_v62  ;;  %v171_v62 = vpack.c.bf16 %v75_v61, %v75_v61  ;;  %v10756_v61 = vld [vmem:[%s13784_s1 + $0xf48] sm:$0xff]  }
 0x197   :  { %v9445_v44 = vpop.f32.mrb[20].mxu1  ;;  %v9424_v46 = vpop.f32.mrb[21].mxu0 }
 0x198   :  { %v9425_v48 = vadd.f32 %v9424_v46, %v9423_v42  ;;  %v9446_v49 = vpop.f32.mrb[21].mxu1  ;;  %v9426_v52 = vpop.f32.mrb[22].mxu0  ;;  %9726 = vmatpush3.bf16.msra.mxu0 %v10678_v63  ;;  %v10706_v42 = vld [vmem:[%s13784_s1 + $0xd20] sm:$0xff]   ;;  %v77_v63 = vld [vmem:[%s13783_s0 + $0x1b8] sm:$0xff] }
 0x199   :  { %v9447_v51 = vadd.f32 %v9446_v49, %v9445_v44  ;;  %v9448_v55 = vpop.f32.mrb[22].mxu1  ;;  %v9427_v57 = vpop.f32.mrb[23].mxu0  ;;  %9748 = vmatpush3.bf16.msra.mxu1 %v10679_v0  ;;  %9727 = vmatprep.subr.bf16.mxu0 %v10680_v1  ;;  %v10711_v52 = vld [vmem:[%s13784_s1 + $0xda8] sm:$0xff]   ;;  %v74_v0 = vld [vmem:[%s13783_s0 + $0x1a0] sm:$0xff]  ;;  %v76_v1 = vld [vmem:[%s13783_s0 + $0x1b0] sm:$0xff] }
 0x19a   :  { %v6800_v54 = vadd.f32 %v9425_v48, %v12367_v7  ;;  %v9449_v60 = vpop.f32.mrb[23].mxu1  ;;  %9749 = vmatprep.subr.bf16.mxu1 %v10681_v2  ;;  %v10686_v7 = vld [vmem:[%s13784_s1 + $0xc38] sm:$0xff]   ;;  %v10708_v48 = vld [vmem:[%s13784_s1 + $0xd68] sm:$0xff]   ;;  %v10714_v55 = vld [vmem:[%s13784_s1 + $0xd30] sm:$0xff]   ;;  %v173_v2 = vpack.c.bf16 %v77_v63, %v77_v63 }
 0x19b   :  { %v10716_v57 = vld [vmem:[%s13784_s1 + $0xd78] sm:$0xff]   ;;  %v10758_v63 = vld [vmem:[%s13784_s1 + $0xf08] sm:$0xff]  }
 0x19c   :  { %v12478_v59 = vadd.f32 %v9447_v51, %v6800_v54  ;;  %9728 = vmatpush3.bf16.msra.mxu0 %v10682_v3  ;;  %v10710_v51 = vld [vmem:[%s13784_s1 + $0xd28] sm:$0xff]   ;;  %v10713_v54 = vld [vmem:[%s13784_s1 + $0xdf0] sm:$0xff]   ;;  %v10719_v60 = vld [vmem:[%s13784_s1 + $0xdb8] sm:$0xff]   ;;  %v170_v3 = vpack.c.bf16 %v74_v0, %v74_v0 }
 0x19d   :  { %9750 = vmatpush3.bf16.msra.mxu1 %v10683_v4  ;;  %9729 = vmatprep.subr.bf16.mxu0 %v10684_v5  ;;  %v172_v4 = vpack.c.bf16 %v76_v1, %v76_v1  ;;  %v10720_v5 = vld [vmem:[%s13784_s1 + $0xe40] sm:$0xff]   ;;  %v10759_v0 = vld [vmem:[%s13784_s1 + $0xf88] sm:$0xff]   ;;  %v10760_v1 = vld [vmem:[%s13784_s1 + $0xf50] sm:$0xff]  }
 0x19e   :  { %9751 = vmatprep.subr.bf16.mxu1 %v10685_v6  ;;  %v10721_v6 = vld [vmem:[%s13784_s1 + $0xec0] sm:$0xff]  }
 0x1a0   :  { %9730 = vmatpush3.bf16.msra.mxu0 %v10686_v7  ;;  %v10722_v7 = vld [vmem:[%s13784_s1 + $0xe00] sm:$0xff]  }
 0x1a1   :  { %9752 = vmatpush3.bf16.msra.mxu1 %v10687_v8  ;;  %9759 = vmatprep.subr.bf16.mxu0 %v10688_v17  ;;  %v10723_v8 = vld [vmem:[%s13784_s1 + $0xe80] sm:$0xff]   ;;  %v10732_v17 = vld [vmem:[%s13784_s1 + $0xe58] sm:$0xff]  }
 0x1a2   :  { %9781 = vmatprep.subr.bf16.mxu1 %v10689_v18  ;;  %v10733_v18 = vld [vmem:[%s13784_s1 + $0xed8] sm:$0xff]  }
 0x1a3   :  { %7358 = vmatmul.mubr.bf16.vlgmr.msra.gmra.mrb[48].mxu0 %v166_v15  ;;  %v10730_v15 = vld [vmem:[%s13784_s1 + $0xe10] sm:$0xff]  }
 0x1a4   :  { %7398 = vmatmul.mubr.bf16.vlgmr.msra.gmra.mrb[48].mxu1 %v168_v16  ;;  %9760 = vmatpush3.bf16.msra.mxu0 %v10690_v19  ;;  %v10731_v16 = vld [vmem:[%s13784_s1 + $0xe90] sm:$0xff]  }
 0x1a5   :  { %9782 = vmatpush3.bf16.msra.mxu1 %v10691_v20  ;;  %9761 = vmatprep.subr.bf16.mxu0 %v10692_v21  ;;  %v10734_v20 = vld [vmem:[%s13784_s1 + $0xe18] sm:$0xff]  }
 0x1a6   :  { %9783 = vmatprep.subr.bf16.mxu1 %v10693_v22  ;;  %7437 = vmatprep.mubr.bf16.mxu0 %v171_v62  ;;  %v10735_v22 = vld [vmem:[%s13784_s1 + $0xe98] sm:$0xff]   ;;  %v10757_v62 = vld [vmem:[%s13784_s1 + $0xfc8] sm:$0xff]  }
 0x1a7   :  { %7477 = vmatprep.mubr.bf16.mxu1 %v173_v2  ;;  %v10761_v2 = vld [vmem:[%s13784_s1 + $0xfd0] sm:$0xff]  }
 0x1a8   :  { %9762 = vmatpush3.bf16.msra.mxu0 %v10694_v23 }
 0x1a9   :  { %9784 = vmatpush3.bf16.msra.mxu1 %v10695_v24  ;;  %9763 = vmatprep.subr.bf16.mxu0 %v10696_v25  ;;  %v10736_v24 = vld [vmem:[%s13784_s1 + $0xe60] sm:$0xff]  }
 0x1aa   :  { %9785 = vmatprep.subr.bf16.mxu1 %v10697_v26 }
 0x1ac   :  { %9764 = vmatpush3.bf16.msra.mxu0 %v10698_v27  ;;  %v10737_v27 = vld [vmem:[%s13784_s1 + $0xee0] sm:$0xff]  }
 0x1ad   :  { %9786 = vmatpush3.bf16.msra.mxu1 %v10699_v28  ;;  %9765 = vmatprep.subr.bf16.mxu0 %v10700_v29 }
 0x1ae   :  { %9787 = vmatprep.subr.bf16.mxu1 %v10701_v30  ;;  %v10738_v30 = vld [vmem:[%s13784_s1 + $0xe20] sm:$0xff]  }
 0x1b0   :  { %9766 = vmatpush3.bf16.msra.mxu0 %v10702_v32 }
 0x1b1   :  { %9788 = vmatpush3.bf16.msra.mxu1 %v10703_v34  ;;  %9767 = vmatprep.subr.bf16.mxu0 %v10704_v36  ;;  %v10740_v36 = vld [vmem:[%s13784_s1 + $0xe68] sm:$0xff]  }
 0x1b2   :  { %9789 = vmatprep.subr.bf16.mxu1 %v10705_v39  ;;  %v10742_v39 = vld [vmem:[%s13784_s1 + $0xe28] sm:$0xff]  }
 0x1b4   :  { %9768 = vmatpush3.bf16.msra.mxu0 %v10706_v42  ;;  %v10745_v42 = vld [vmem:[%s13784_s1 + $0xef0] sm:$0xff]  }
 0x1b5   :  { %9790 = vmatpush3.bf16.msra.mxu1 %v10707_v45  ;;  %9769 = vmatprep.subr.bf16.mxu0 %v10708_v48  ;;  %v10748_v45 = vld [vmem:[%s13784_s1 + $0xe78] sm:$0xff]  }
 0x1b6   :  { %v9467_v31 = vpop.f32.mrb[24].mxu0  ;;  %9791 = vmatprep.subr.bf16.mxu1 %v10709_v50  ;;  %v10751_v48 = vld [vmem:[%s13784_s1 + $0xeb8] sm:$0xff]  }
 0x1b7   :  { %v9489_v33 = vpop.f32.mrb[24].mxu1  ;;  %v9468_v35 = vpop.f32.mrb[25].mxu0  ;;  %v81_v50 = vld [vmem:[%s13783_s0 + $0x1d8] sm:$0xff] }
 0x1b8   :  { %v9469_v37 = vadd.f32 %v9468_v35, %v9467_v31  ;;  %v9490_v38 = vpop.f32.mrb[25].mxu1  ;;  %v9470_v41 = vpop.f32.mrb[26].mxu0  ;;  %9770 = vmatpush3.bf16.msra.mxu0 %v10710_v51  ;;  %v78_v51 = vld [vmem:[%s13783_s0 + $0x1c0] sm:$0xff] }
 0x1b9   :  { %v9491_v40 = vadd.f32 %v9490_v38, %v9489_v33  ;;  %v9492_v44 = vpop.f32.mrb[26].mxu1  ;;  %v9471_v46 = vpop.f32.mrb[27].mxu0  ;;  %9792 = vmatpush3.bf16.msra.mxu1 %v10711_v52  ;;  %9771 = vmatprep.subr.bf16.mxu0 %v10712_v53  ;;  %v10739_v33 = vld [vmem:[%s13784_s1 + $0xea0] sm:$0xff]   ;;  %v10741_v38 = vld [vmem:[%s13784_s1 + $0xee8] sm:$0xff]   ;;  %v10744_v41 = vld [vmem:[%s13784_s1 + $0xe70] sm:$0xff]   ;;  %v177_v53 = vpack.c.bf16 %v81_v50, %v81_v50 }
 0x1ba   :  { %v6880_v43 = vadd.f32 %v9469_v37, %v12478_v59  ;;  %v9493_v49 = vpop.f32.mrb[27].mxu1  ;;  %9793 = vmatprep.subr.bf16.mxu1 %v10713_v54  ;;  %v10718_v59 = vld [vmem:[%s13784_s1 + $0xd38] sm:$0xff]   ;;  %v10747_v44 = vld [vmem:[%s13784_s1 + $0xeb0] sm:$0xff]   ;;  %v174_v54 = vpack.c.bf16 %v78_v51, %v78_v51  ;;  %v10789_v50 = vld [vmem:[%s13784_s1 + $0x10c8] sm:$0xff]  }
 0x1bb   :  { %v10749_v46 = vld [vmem:[%s13784_s1 + $0xef8] sm:$0xff]   ;;  %v79_v49 = vld [vmem:[%s13783_s0 + $0x1c8] sm:$0xff] }
 0x1bc   :  { %v12589_v47 = vadd.f32 %v9491_v40, %v6880_v43  ;;  %9772 = vmatpush3.bf16.msra.mxu0 %v10714_v55  ;;  %v10743_v40 = vld [vmem:[%s13784_s1 + $0xea8] sm:$0xff]   ;;  %v10746_v43 = vld [vmem:[%s13784_s1 + $0xe30] sm:$0xff]   ;;  %v175_v52 = vpack.c.bf16 %v79_v49, %v79_v49 }
 0x1bd   :  { %9794 = vmatpush3.bf16.msra.mxu1 %v10715_v56  ;;  %9773 = vmatprep.subr.bf16.mxu0 %v10716_v57  ;;  %v80_v55 = vld [vmem:[%s13783_s0 + $0x1d0] sm:$0xff]  ;;  %v10752_v57 = vld [vmem:[%s13784_s1 + $0xf40] sm:$0xff]   ;;  %v10788_v49 = vld [vmem:[%s13784_s1 + $0x1048] sm:$0xff]  }
 0x1be   :  { %9795 = vmatprep.subr.bf16.mxu1 %v10717_v58  ;;  %v176_v56 = vpack.c.bf16 %v80_v55, %v80_v55  ;;  %v10753_v58 = vld [vmem:[%s13784_s1 + $0xfc0] sm:$0xff]   ;;  %v10790_v51 = vld [vmem:[%s13784_s1 + $0x1008] sm:$0xff]   ;;  %v10794_v55 = vld [vmem:[%s13784_s1 + $0x1010] sm:$0xff]  }
 0x1c0   :  { %9774 = vmatpush3.bf16.msra.mxu0 %v10718_v59  ;;  %v10754_v59 = vld [vmem:[%s13784_s1 + $0xf00] sm:$0xff]  }
 0x1c1   :  { %9796 = vmatpush3.bf16.msra.mxu1 %v10719_v60  ;;  %9803 = vmatprep.subr.bf16.mxu0 %v10720_v5  ;;  %v10755_v60 = vld [vmem:[%s13784_s1 + $0xf80] sm:$0xff]   ;;  %v10764_v5 = vld [vmem:[%s13784_s1 + $0xf58] sm:$0xff]  }
 0x1c2   :  { %9825 = vmatprep.subr.bf16.mxu1 %v10721_v6  ;;  %v10765_v6 = vld [vmem:[%s13784_s1 + $0xfd8] sm:$0xff]  }
 0x1c3   :  { %7438 = vmatmul.mubr.bf16.vlgmr.msra.gmra.mrb[52].mxu0 %v170_v3  ;;  %v10762_v3 = vld [vmem:[%s13784_s1 + $0xf10] sm:$0xff]  }
 0x1c4   :  { %7478 = vmatmul.mubr.bf16.vlgmr.msra.gmra.mrb[52].mxu1 %v172_v4  ;;  %9804 = vmatpush3.bf16.msra.mxu0 %v10722_v7  ;;  %v10763_v4 = vld [vmem:[%s13784_s1 + $0xf90] sm:$0xff]  }
 0x1c5   :  { %9826 = vmatpush3.bf16.msra.mxu1 %v10723_v8  ;;  %9805 = vmatprep.subr.bf16.mxu0 %v10724_v9  ;;  %v10766_v8 = vld [vmem:[%s13784_s1 + $0xf18] sm:$0xff]  }
 0x1c6   :  { %9827 = vmatprep.subr.bf16.mxu1 %v10725_v10  ;;  %7517 = vmatprep.mubr.bf16.mxu0 %v175_v52  ;;  %v10767_v10 = vld [vmem:[%s13784_s1 + $0xf98] sm:$0xff]   ;;  %v10791_v52 = vld [vmem:[%s13784_s1 + $0x1088] sm:$0xff]  }
 0x1c7   :  { %7557 = vmatprep.mubr.bf16.mxu1 %v177_v53  ;;  %v10792_v53 = vld [vmem:[%s13784_s1 + $0x1050] sm:$0xff]  }
 0x1c8   :  { %9806 = vmatpush3.bf16.msra.mxu0 %v10726_v11 }
 0x1c9   :  { %9828 = vmatpush3.bf16.msra.mxu1 %v10727_v12  ;;  %9807 = vmatprep.subr.bf16.mxu0 %v10728_v13  ;;  %v10768_v12 = vld [vmem:[%s13784_s1 + $0xf60] sm:$0xff]  }
 0x1ca   :  { %9829 = vmatprep.subr.bf16.mxu1 %v10729_v14 }
 0x1cc   :  { %9808 = vmatpush3.bf16.msra.mxu0 %v10730_v15  ;;  %v10769_v15 = vld [vmem:[%s13784_s1 + $0xfe0] sm:$0xff]  }
 0x1cd   :  { %9830 = vmatpush3.bf16.msra.mxu1 %v10731_v16  ;;  %9809 = vmatprep.subr.bf16.mxu0 %v10732_v17 }
 0x1ce   :  { %9831 = vmatprep.subr.bf16.mxu1 %v10733_v18  ;;  %v10770_v18 = vld [vmem:[%s13784_s1 + $0xf20] sm:$0xff]  }
 0x1d0   :  { %9810 = vmatpush3.bf16.msra.mxu0 %v10734_v20 }
 0x1d1   :  { %9832 = vmatpush3.bf16.msra.mxu1 %v10735_v22  ;;  %9811 = vmatprep.subr.bf16.mxu0 %v10736_v24  ;;  %v10772_v24 = vld [vmem:[%s13784_s1 + $0xf68] sm:$0xff]  }
 0x1d2   :  { %9833 = vmatprep.subr.bf16.mxu1 %v10737_v27  ;;  %v10774_v27 = vld [vmem:[%s13784_s1 + $0xf28] sm:$0xff]  }
 0x1d4   :  { %9812 = vmatpush3.bf16.msra.mxu0 %v10738_v30  ;;  %v10777_v30 = vld [vmem:[%s13784_s1 + $0xff0] sm:$0xff]  }
 0x1d5   :  { %9834 = vmatpush3.bf16.msra.mxu1 %v10739_v33  ;;  %9813 = vmatprep.subr.bf16.mxu0 %v10740_v36  ;;  %v10780_v33 = vld [vmem:[%s13784_s1 + $0xf78] sm:$0xff]  }
 0x1d6   :  { %v9511_v19 = vpop.f32.mrb[28].mxu0  ;;  %9835 = vmatprep.subr.bf16.mxu1 %v10741_v38  ;;  %v10783_v36 = vld [vmem:[%s13784_s1 + $0xfb8] sm:$0xff]  }
 0x1d7   :  { %v9533_v21 = vpop.f32.mrb[28].mxu1  ;;  %v9512_v23 = vpop.f32.mrb[29].mxu0  ;;  %v85_v38 = vld [vmem:[%s13783_s0 + $0x1f8] sm:$0xff] }
 0x1d8   :  { %v9513_v25 = vadd.f32 %v9512_v23, %v9511_v19  ;;  %v9534_v26 = vpop.f32.mrb[29].mxu1  ;;  %v9514_v29 = vpop.f32.mrb[30].mxu0  ;;  %9814 = vmatpush3.bf16.msra.mxu0 %v10742_v39 }
 0x1d9   :  { %v9535_v28 = vadd.f32 %v9534_v26, %v9533_v21  ;;  %v9536_v32 = vpop.f32.mrb[30].mxu1  ;;  %v9515_v34 = vpop.f32.mrb[31].mxu0  ;;  %9836 = vmatpush3.bf16.msra.mxu1 %v10743_v40  ;;  %9815 = vmatprep.subr.bf16.mxu0 %v10744_v41  ;;  %v10771_v21 = vld [vmem:[%s13784_s1 + $0xfa0] sm:$0xff]   ;;  %v10773_v26 = vld [vmem:[%s13784_s1 + $0xfe8] sm:$0xff]   ;;  %v10776_v29 = vld [vmem:[%s13784_s1 + $0xf70] sm:$0xff]   ;;  %v181_v40 = vpack.c.bf16 %v85_v38, %v85_v38 }
 0x1da   :  { %v6960_v31 = vadd.f32 %v9513_v25, %v12589_v47  ;;  %v9537_v37 = vpop.f32.mrb[31].mxu1  ;;  %9837 = vmatprep.subr.bf16.mxu1 %v10745_v42  ;;  %v10750_v47 = vld [vmem:[%s13784_s1 + $0xe38] sm:$0xff]   ;;  %v10779_v32 = vld [vmem:[%s13784_s1 + $0xfb0] sm:$0xff]   ;;  %v82_v41 = vld [vmem:[%s13783_s0 + $0x1e0] sm:$0xff] }
 0x1db   :  { %v10781_v34 = vld [vmem:[%s13784_s1 + $0xff8] sm:$0xff]   ;;  %v83_v37 = vld [vmem:[%s13783_s0 + $0x1e8] sm:$0xff]  ;;  %v84_v42 = vld [vmem:[%s13783_s0 + $0x1f0] sm:$0xff] }
 0x1dc   :  { %v12700_v35 = vadd.f32 %v9535_v28, %v6960_v31  ;;  %9816 = vmatpush3.bf16.msra.mxu0 %v10746_v43  ;;  %v10775_v28 = vld [vmem:[%s13784_s1 + $0xfa8] sm:$0xff]   ;;  %v10778_v31 = vld [vmem:[%s13784_s1 + $0xf30] sm:$0xff]   ;;  %v179_v39 = vpack.c.bf16 %v83_v37, %v83_v37  ;;  %v178_v43 = vpack.c.bf16 %v82_v41, %v82_v41 }
 0x1dd   :  { %9838 = vmatpush3.bf16.msra.mxu1 %v10747_v44  ;;  %9817 = vmatprep.subr.bf16.mxu0 %v10748_v45  ;;  %v180_v44 = vpack.c.bf16 %v84_v42, %v84_v42  ;;  %v10784_v45 = vld [vmem:[%s13784_s1 + $0x1040] sm:$0xff]   ;;  %v10820_v37 = vld [vmem:[%s13784_s1 + $0x1148] sm:$0xff]   ;;  %v10824_v41 = vld [vmem:[%s13784_s1 + $0x1150] sm:$0xff]  }
 0x1de   :  { %9839 = vmatprep.subr.bf16.mxu1 %v10749_v46  ;;  %v10785_v46 = vld [vmem:[%s13784_s1 + $0x10c0] sm:$0xff]   ;;  %v10821_v38 = vld [vmem:[%s13784_s1 + $0x11c8] sm:$0xff]   ;;  %v10825_v42 = vld [vmem:[%s13784_s1 + $0x11d0] sm:$0xff]  }
 0x1e0   :  { %9818 = vmatpush3.bf16.msra.mxu0 %v10750_v47  ;;  %v10786_v47 = vld [vmem:[%s13784_s1 + $0x1000] sm:$0xff]  }
 0x1e1   :  { %9840 = vmatpush3.bf16.msra.mxu1 %v10751_v48  ;;  %9847 = vmatprep.subr.bf16.mxu0 %v10752_v57  ;;  %v10787_v48 = vld [vmem:[%s13784_s1 + $0x1080] sm:$0xff]   ;;  %v10796_v57 = vld [vmem:[%s13784_s1 + $0x1058] sm:$0xff]  }
 0x1e2   :  { %9869 = vmatprep.subr.bf16.mxu1 %v10753_v58  ;;  %v10797_v58 = vld [vmem:[%s13784_s1 + $0x10d8] sm:$0xff]  }
 0x1e3   :  { %7518 = vmatmul.mubr.bf16.vlgmr.msra.gmra.mrb[56].mxu0 %v174_v54  ;;  %v10793_v54 = vld [vmem:[%s13784_s1 + $0x10d0] sm:$0xff]  }
 0x1e4   :  { %7558 = vmatmul.mubr.bf16.vlgmr.msra.gmra.mrb[56].mxu1 %v176_v56  ;;  %9848 = vmatpush3.bf16.msra.mxu0 %v10754_v59  ;;  %v10795_v56 = vld [vmem:[%s13784_s1 + $0x1090] sm:$0xff]  }
 0x1e5   :  { %9870 = vmatpush3.bf16.msra.mxu1 %v10755_v60  ;;  %9849 = vmatprep.subr.bf16.mxu0 %v10756_v61  ;;  %v10798_v60 = vld [vmem:[%s13784_s1 + $0x1018] sm:$0xff]  }
 0x1e6   :  { %9871 = vmatprep.subr.bf16.mxu1 %v10757_v62  ;;  %7597 = vmatprep.mubr.bf16.mxu0 %v179_v39  ;;  %v10799_v62 = vld [vmem:[%s13784_s1 + $0x1098] sm:$0xff]   ;;  %v10822_v39 = vld [vmem:[%s13784_s1 + $0x1108] sm:$0xff]  }
 0x1e7   :  { %7637 = vmatprep.mubr.bf16.mxu1 %v181_v40  ;;  %v10823_v40 = vld [vmem:[%s13784_s1 + $0x1188] sm:$0xff]  }
 0x1e8   :  { %9850 = vmatpush3.bf16.msra.mxu0 %v10758_v63 }
 0x1e9   :  { %9872 = vmatpush3.bf16.msra.mxu1 %v10759_v0  ;;  %9851 = vmatprep.subr.bf16.mxu0 %v10760_v1  ;;  %v10800_v0 = vld [vmem:[%s13784_s1 + $0x1060] sm:$0xff]  }
 0x1ea   :  { %9873 = vmatprep.subr.bf16.mxu1 %v10761_v2 }
 0x1ec   :  { %9852 = vmatpush3.bf16.msra.mxu0 %v10762_v3  ;;  %v10801_v3 = vld [vmem:[%s13784_s1 + $0x10e0] sm:$0xff]  }
 0x1ed   :  { %9874 = vmatpush3.bf16.msra.mxu1 %v10763_v4  ;;  %9853 = vmatprep.subr.bf16.mxu0 %v10764_v5 }
 0x1ee   :  { %9875 = vmatprep.subr.bf16.mxu1 %v10765_v6  ;;  %v10802_v6 = vld [vmem:[%s13784_s1 + $0x1020] sm:$0xff]  }
 0x1f0   :  { %9854 = vmatpush3.bf16.msra.mxu0 %v10766_v8 }
 0x1f1   :  { %9876 = vmatpush3.bf16.msra.mxu1 %v10767_v10  ;;  %9855 = vmatprep.subr.bf16.mxu0 %v10768_v12  ;;  %v10804_v12 = vld [vmem:[%s13784_s1 + $0x1068] sm:$0xff]  }
 0x1f2   :  { %9877 = vmatprep.subr.bf16.mxu1 %v10769_v15  ;;  %v10806_v15 = vld [vmem:[%s13784_s1 + $0x1028] sm:$0xff]  }
 0x1f4   :  { %9856 = vmatpush3.bf16.msra.mxu0 %v10770_v18  ;;  %v10809_v18 = vld [vmem:[%s13784_s1 + $0x10f0] sm:$0xff]  }
 0x1f5   :  { %9878 = vmatpush3.bf16.msra.mxu1 %v10771_v21  ;;  %9857 = vmatprep.subr.bf16.mxu0 %v10772_v24  ;;  %v10812_v21 = vld [vmem:[%s13784_s1 + $0x1078] sm:$0xff]  }
 0x1f6   :  { %v9555_v7 = vpop.f32.mrb[32].mxu0  ;;  %9879 = vmatprep.subr.bf16.mxu1 %v10773_v26  ;;  %v10815_v24 = vld [vmem:[%s13784_s1 + $0x10b8] sm:$0xff]  }
 0x1f7   :  { %v9577_v9 = vpop.f32.mrb[32].mxu1  ;;  %v9556_v11 = vpop.f32.mrb[33].mxu0 }
 0x1f8   :  { %v9557_v13 = vadd.f32 %v9556_v11, %v9555_v7  ;;  %v9578_v14 = vpop.f32.mrb[33].mxu1  ;;  %v9558_v17 = vpop.f32.mrb[34].mxu0  ;;  %9858 = vmatpush3.bf16.msra.mxu0 %v10774_v27  ;;  %v89_v27 = vld [vmem:[%s13783_s0 + $0x218] sm:$0xff] }
 0x1f9   :  { %v9579_v16 = vadd.f32 %v9578_v14, %v9577_v9  ;;  %v9580_v20 = vpop.f32.mrb[34].mxu1  ;;  %v9559_v22 = vpop.f32.mrb[35].mxu0  ;;  %9880 = vmatpush3.bf16.msra.mxu1 %v10775_v28  ;;  %9859 = vmatprep.subr.bf16.mxu0 %v10776_v29  ;;  %v10803_v9 = vld [vmem:[%s13784_s1 + $0x10a0] sm:$0xff]   ;;  %v10805_v14 = vld [vmem:[%s13784_s1 + $0x10e8] sm:$0xff]   ;;  %v10808_v17 = vld [vmem:[%s13784_s1 + $0x1070] sm:$0xff]  }
 0x1fa   :  { %v7040_v19 = vadd.f32 %v9557_v13, %v12700_v35  ;;  %v9581_v25 = vpop.f32.mrb[35].mxu1  ;;  %9881 = vmatprep.subr.bf16.mxu1 %v10777_v30  ;;  %v10782_v35 = vld [vmem:[%s13784_s1 + $0xf38] sm:$0xff]   ;;  %v10811_v20 = vld [vmem:[%s13784_s1 + $0x10b0] sm:$0xff]   ;;  %v86_v28 = vld [vmem:[%s13783_s0 + $0x200] sm:$0xff]  ;;  %v185_v30 = vpack.c.bf16 %v89_v27, %v89_v27 }
 0x1fb   :  { %v10813_v22 = vld [vmem:[%s13784_s1 + $0x10f8] sm:$0xff]   ;;  %v87_v25 = vld [vmem:[%s13783_s0 + $0x208] sm:$0xff]  ;;  %v88_v29 = vld [vmem:[%s13783_s0 + $0x210] sm:$0xff] }
 0x1fc   :  { %v12811_v23 = vadd.f32 %v9579_v16, %v7040_v19  ;;  %9860 = vmatpush3.bf16.msra.mxu0 %v10778_v31  ;;  %v10807_v16 = vld [vmem:[%s13784_s1 + $0x10a8] sm:$0xff]   ;;  %v10810_v19 = vld [vmem:[%s13784_s1 + $0x1030] sm:$0xff]   ;;  %v183_v26 = vpack.c.bf16 %v87_v25, %v87_v25  ;;  %v182_v31 = vpack.c.bf16 %v86_v28, %v86_v28 }
 0x1fd   :  { %9882 = vmatpush3.bf16.msra.mxu1 %v10779_v32  ;;  %9861 = vmatprep.subr.bf16.mxu0 %v10780_v33  ;;  %v184_v32 = vpack.c.bf16 %v88_v29, %v88_v29  ;;  %v10816_v33 = vld [vmem:[%s13784_s1 + $0x1140] sm:$0xff]   ;;  %v10852_v25 = vld [vmem:[%s13784_s1 + $0x1248] sm:$0xff]   ;;  %v10856_v29 = vld [vmem:[%s13784_s1 + $0x1250] sm:$0xff]  }
 0x1fe   :  { %9883 = vmatprep.subr.bf16.mxu1 %v10781_v34  ;;  %v10817_v34 = vld [vmem:[%s13784_s1 + $0x11c0] sm:$0xff]   ;;  %v10854_v27 = vld [vmem:[%s13784_s1 + $0x1208] sm:$0xff]  }
 0x1ff   :  { %v10855_v28 = vld [vmem:[%s13784_s1 + $0x1288] sm:$0xff]  }
 0x200   :  { %9862 = vmatpush3.bf16.msra.mxu0 %v10782_v35  ;;  %v10818_v35 = vld [vmem:[%s13784_s1 + $0x1100] sm:$0xff]  }
 0x201   :  { %9884 = vmatpush3.bf16.msra.mxu1 %v10783_v36  ;;  %9891 = vmatprep.subr.bf16.mxu0 %v10784_v45  ;;  %v10819_v36 = vld [vmem:[%s13784_s1 + $0x1180] sm:$0xff]   ;;  %v10828_v45 = vld [vmem:[%s13784_s1 + $0x1158] sm:$0xff]  }
 0x202   :  { %9913 = vmatprep.subr.bf16.mxu1 %v10785_v46  ;;  %v10829_v46 = vld [vmem:[%s13784_s1 + $0x11d8] sm:$0xff]  }
 0x203   :  { %7598 = vmatmul.mubr.bf16.vlgmr.msra.gmra.mrb[60].mxu0 %v178_v43  ;;  %v10826_v43 = vld [vmem:[%s13784_s1 + $0x1110] sm:$0xff]  }
 0x204   :  { %7638 = vmatmul.mubr.bf16.vlgmr.msra.gmra.mrb[60].mxu1 %v180_v44  ;;  %9892 = vmatpush3.bf16.msra.mxu0 %v10786_v47  ;;  %v10827_v44 = vld [vmem:[%s13784_s1 + $0x1190] sm:$0xff]  }
 0x205   :  { %9914 = vmatpush3.bf16.msra.mxu1 %v10787_v48  ;;  %9893 = vmatprep.subr.bf16.mxu0 %v10788_v49  ;;  %v10830_v48 = vld [vmem:[%s13784_s1 + $0x1118] sm:$0xff]  }
 0x206   :  { %9915 = vmatprep.subr.bf16.mxu1 %v10789_v50  ;;  %7677 = vmatprep.mubr.bf16.mxu0 %v183_v26  ;;  %v10831_v50 = vld [vmem:[%s13784_s1 + $0x1198] sm:$0xff]   ;;  %v10853_v26 = vld [vmem:[%s13784_s1 + $0x12c8] sm:$0xff]  }
 0x207   :  { %7717 = vmatprep.mubr.bf16.mxu1 %v185_v30  ;;  %v10857_v30 = vld [vmem:[%s13784_s1 + $0x12d0] sm:$0xff]  }
 0x208   :  { %9894 = vmatpush3.bf16.msra.mxu0 %v10790_v51 }
 0x209   :  { %9916 = vmatpush3.bf16.msra.mxu1 %v10791_v52  ;;  %9895 = vmatprep.subr.bf16.mxu0 %v10792_v53  ;;  %v10832_v52 = vld [vmem:[%s13784_s1 + $0x1160] sm:$0xff]  }
 0x20a   :  { %9917 = vmatprep.subr.bf16.mxu1 %v10793_v54 }
 0x20c   :  { %9896 = vmatpush3.bf16.msra.mxu0 %v10794_v55  ;;  %v10833_v55 = vld [vmem:[%s13784_s1 + $0x11e0] sm:$0xff]  }
 0x20d   :  { %9918 = vmatpush3.bf16.msra.mxu1 %v10795_v56  ;;  %9897 = vmatprep.subr.bf16.mxu0 %v10796_v57 }
 0x20e   :  { %9919 = vmatprep.subr.bf16.mxu1 %v10797_v58  ;;  %v10834_v58 = vld [vmem:[%s13784_s1 + $0x1120] sm:$0xff]  }
 0x210   :  { %9898 = vmatpush3.bf16.msra.mxu0 %v10798_v60 }
 0x211   :  { %9920 = vmatpush3.bf16.msra.mxu1 %v10799_v62  ;;  %9899 = vmatprep.subr.bf16.mxu0 %v10800_v0  ;;  %v10836_v0 = vld [vmem:[%s13784_s1 + $0x1168] sm:$0xff]  }
 0x212   :  { %9921 = vmatprep.subr.bf16.mxu1 %v10801_v3  ;;  %v10838_v3 = vld [vmem:[%s13784_s1 + $0x1128] sm:$0xff]  }
 0x214   :  { %9900 = vmatpush3.bf16.msra.mxu0 %v10802_v6  ;;  %v10841_v6 = vld [vmem:[%s13784_s1 + $0x11f0] sm:$0xff]  }
 0x215   :  { %9922 = vmatpush3.bf16.msra.mxu1 %v10803_v9  ;;  %9901 = vmatprep.subr.bf16.mxu0 %v10804_v12  ;;  %v10844_v9 = vld [vmem:[%s13784_s1 + $0x1178] sm:$0xff]  }
 0x216   :  { %v9599_v59 = vpop.f32.mrb[36].mxu0  ;;  %9923 = vmatprep.subr.bf16.mxu1 %v10805_v14  ;;  %v10847_v12 = vld [vmem:[%s13784_s1 + $0x11b8] sm:$0xff]  }
 0x217   :  { %v9621_v61 = vpop.f32.mrb[36].mxu1  ;;  %v9600_v63 = vpop.f32.mrb[37].mxu0  ;;  %v93_v14 = vld [vmem:[%s13783_s0 + $0x238] sm:$0xff] }
 0x218   :  { %v9601_v1 = vadd.f32 %v9600_v63, %v9599_v59  ;;  %v9622_v2 = vpop.f32.mrb[37].mxu1  ;;  %v9602_v5 = vpop.f32.mrb[38].mxu0  ;;  %9902 = vmatpush3.bf16.msra.mxu0 %v10806_v15  ;;  %v90_v15 = vld [vmem:[%s13783_s0 + $0x220] sm:$0xff] }
 0x219   :  { %v9623_v4 = vadd.f32 %v9622_v2, %v9621_v61  ;;  %v9624_v8 = vpop.f32.mrb[38].mxu1  ;;  %v9603_v10 = vpop.f32.mrb[39].mxu0  ;;  %9924 = vmatpush3.bf16.msra.mxu1 %v10807_v16  ;;  %9903 = vmatprep.subr.bf16.mxu0 %v10808_v17  ;;  %v10835_v61 = vld [vmem:[%s13784_s1 + $0x11a0] sm:$0xff]   ;;  %v10837_v2 = vld [vmem:[%s13784_s1 + $0x11e8] sm:$0xff]   ;;  %v10840_v5 = vld [vmem:[%s13784_s1 + $0x1170] sm:$0xff]   ;;  %v189_v17 = vpack.c.bf16 %v93_v14, %v93_v14 }
 0x21a   :  { %v7120_v7 = vadd.f32 %v9601_v1, %v12811_v23  ;;  %v9625_v13 = vpop.f32.mrb[39].mxu1  ;;  %9925 = vmatprep.subr.bf16.mxu1 %v10809_v18  ;;  %v10814_v23 = vld [vmem:[%s13784_s1 + $0x1038] sm:$0xff]   ;;  %v10843_v8 = vld [vmem:[%s13784_s1 + $0x11b0] sm:$0xff]   ;;  %v186_v18 = vpack.c.bf16 %v90_v15, %v90_v15  ;;  %v10885_v14 = vld [vmem:[%s13784_s1 + $0x13c8] sm:$0xff]  }
 0x21b   :  { %v10845_v10 = vld [vmem:[%s13784_s1 + $0x11f8] sm:$0xff]   ;;  %v91_v13 = vld [vmem:[%s13783_s0 + $0x228] sm:$0xff] }
 0x21c   :  { %v12922_v11 = vadd.f32 %v9623_v4, %v7120_v7  ;;  %9904 = vmatpush3.bf16.msra.mxu0 %v10810_v19  ;;  %v10839_v4 = vld [vmem:[%s13784_s1 + $0x11a8] sm:$0xff]   ;;  %v10842_v7 = vld [vmem:[%s13784_s1 + $0x1130] sm:$0xff]   ;;  %v187_v16 = vpack.c.bf16 %v91_v13, %v91_v13 }
 0x21d   :  { %9926 = vmatpush3.bf16.msra.mxu1 %v10811_v20  ;;  %9905 = vmatprep.subr.bf16.mxu0 %v10812_v21  ;;  %v92_v19 = vld [vmem:[%s13783_s0 + $0x230] sm:$0xff]  ;;  %v10848_v21 = vld [vmem:[%s13784_s1 + $0x1240] sm:$0xff]   ;;  %v10884_v13 = vld [vmem:[%s13784_s1 + $0x1348] sm:$0xff]  }
 0x21e   :  { %9927 = vmatprep.subr.bf16.mxu1 %v10813_v22  ;;  %v188_v20 = vpack.c.bf16 %v92_v19, %v92_v19  ;;  %v10849_v22 = vld [vmem:[%s13784_s1 + $0x12c0] sm:$0xff]   ;;  %v10886_v15 = vld [vmem:[%s13784_s1 + $0x1308] sm:$0xff]   ;;  %v10890_v19 = vld [vmem:[%s13784_s1 + $0x1310] sm:$0xff]  }
 0x220   :  { %9906 = vmatpush3.bf16.msra.mxu0 %v10814_v23  ;;  %v10850_v23 = vld [vmem:[%s13784_s1 + $0x1200] sm:$0xff]  }
 0x221   :  { %9928 = vmatpush3.bf16.msra.mxu1 %v10815_v24  ;;  %9935 = vmatprep.subr.bf16.mxu0 %v10816_v33  ;;  %v10851_v24 = vld [vmem:[%s13784_s1 + $0x1280] sm:$0xff]   ;;  %v10860_v33 = vld [vmem:[%s13784_s1 + $0x1258] sm:$0xff]  }
 0x222   :  { %9957 = vmatprep.subr.bf16.mxu1 %v10817_v34  ;;  %v10861_v34 = vld [vmem:[%s13784_s1 + $0x12d8] sm:$0xff]  }
 0x223   :  { %7678 = vmatmul.mubr.bf16.vlgmr.msra.gmra.mrb[64].mxu0 %v182_v31  ;;  %v10858_v31 = vld [vmem:[%s13784_s1 + $0x1210] sm:$0xff]  }
 0x224   :  { %7718 = vmatmul.mubr.bf16.vlgmr.msra.gmra.mrb[64].mxu1 %v184_v32  ;;  %9936 = vmatpush3.bf16.msra.mxu0 %v10818_v35  ;;  %v10859_v32 = vld [vmem:[%s13784_s1 + $0x1290] sm:$0xff]  }
 0x225   :  { %9958 = vmatpush3.bf16.msra.mxu1 %v10819_v36  ;;  %9937 = vmatprep.subr.bf16.mxu0 %v10820_v37  ;;  %v10862_v36 = vld [vmem:[%s13784_s1 + $0x1218] sm:$0xff]  }
 0x226   :  { %9959 = vmatprep.subr.bf16.mxu1 %v10821_v38  ;;  %7757 = vmatprep.mubr.bf16.mxu0 %v187_v16  ;;  %v10863_v38 = vld [vmem:[%s13784_s1 + $0x1298] sm:$0xff]   ;;  %v10887_v16 = vld [vmem:[%s13784_s1 + $0x1388] sm:$0xff]  }
 0x227   :  { %7797 = vmatprep.mubr.bf16.mxu1 %v189_v17  ;;  %v10888_v17 = vld [vmem:[%s13784_s1 + $0x1350] sm:$0xff]  }
 0x228   :  { %9938 = vmatpush3.bf16.msra.mxu0 %v10822_v39 }
 0x229   :  { %9960 = vmatpush3.bf16.msra.mxu1 %v10823_v40  ;;  %9939 = vmatprep.subr.bf16.mxu0 %v10824_v41  ;;  %v10864_v40 = vld [vmem:[%s13784_s1 + $0x1260] sm:$0xff]  }
 0x22a   :  { %9961 = vmatprep.subr.bf16.mxu1 %v10825_v42 }
 0x22c   :  { %9940 = vmatpush3.bf16.msra.mxu0 %v10826_v43  ;;  %v10865_v43 = vld [vmem:[%s13784_s1 + $0x12e0] sm:$0xff]  }
 0x22d   :  { %9962 = vmatpush3.bf16.msra.mxu1 %v10827_v44  ;;  %9941 = vmatprep.subr.bf16.mxu0 %v10828_v45 }
 0x22e   :  { %9963 = vmatprep.subr.bf16.mxu1 %v10829_v46  ;;  %v10866_v46 = vld [vmem:[%s13784_s1 + $0x1220] sm:$0xff]  }
 0x230   :  { %9942 = vmatpush3.bf16.msra.mxu0 %v10830_v48 }
 0x231   :  { %9964 = vmatpush3.bf16.msra.mxu1 %v10831_v50  ;;  %9943 = vmatprep.subr.bf16.mxu0 %v10832_v52  ;;  %v10868_v52 = vld [vmem:[%s13784_s1 + $0x1268] sm:$0xff]  }
 0x232   :  { %9965 = vmatprep.subr.bf16.mxu1 %v10833_v55  ;;  %v10870_v55 = vld [vmem:[%s13784_s1 + $0x1228] sm:$0xff]  }
 0x234   :  { %9944 = vmatpush3.bf16.msra.mxu0 %v10834_v58  ;;  %v10873_v58 = vld [vmem:[%s13784_s1 + $0x12f0] sm:$0xff]  }
 0x235   :  { %9966 = vmatpush3.bf16.msra.mxu1 %v10835_v61  ;;  %9945 = vmatprep.subr.bf16.mxu0 %v10836_v0  ;;  %v10876_v61 = vld [vmem:[%s13784_s1 + $0x1278] sm:$0xff]  }
 0x236   :  { %v9643_v47 = vpop.f32.mrb[40].mxu0  ;;  %9967 = vmatprep.subr.bf16.mxu1 %v10837_v2  ;;  %v10879_v0 = vld [vmem:[%s13784_s1 + $0x12b8] sm:$0xff]  }
 0x237   :  { %v9665_v49 = vpop.f32.mrb[40].mxu1  ;;  %v9644_v51 = vpop.f32.mrb[41].mxu0  ;;  %v97_v2 = vld [vmem:[%s13783_s0 + $0x258] sm:$0xff] }
 0x238   :  { %v9645_v53 = vadd.f32 %v9644_v51, %v9643_v47  ;;  %v9666_v54 = vpop.f32.mrb[41].mxu1  ;;  %v9646_v57 = vpop.f32.mrb[42].mxu0  ;;  %9946 = vmatpush3.bf16.msra.mxu0 %v10838_v3 }
 0x239   :  { %v9667_v56 = vadd.f32 %v9666_v54, %v9665_v49  ;;  %v9668_v60 = vpop.f32.mrb[42].mxu1  ;;  %v9647_v62 = vpop.f32.mrb[43].mxu0  ;;  %9968 = vmatpush3.bf16.msra.mxu1 %v10839_v4  ;;  %9947 = vmatprep.subr.bf16.mxu0 %v10840_v5  ;;  %v10867_v49 = vld [vmem:[%s13784_s1 + $0x12a0] sm:$0xff]   ;;  %v10869_v54 = vld [vmem:[%s13784_s1 + $0x12e8] sm:$0xff]   ;;  %v10872_v57 = vld [vmem:[%s13784_s1 + $0x1270] sm:$0xff]   ;;  %v193_v4 = vpack.c.bf16 %v97_v2, %v97_v2 }
 0x23a   :  { %v7200_v59 = vadd.f32 %v9645_v53, %v12922_v11  ;;  %v9669_v1 = vpop.f32.mrb[43].mxu1  ;;  %9969 = vmatprep.subr.bf16.mxu1 %v10841_v6  ;;  %v10846_v11 = vld [vmem:[%s13784_s1 + $0x1138] sm:$0xff]   ;;  %v10875_v60 = vld [vmem:[%s13784_s1 + $0x12b0] sm:$0xff]   ;;  %v94_v5 = vld [vmem:[%s13783_s0 + $0x240] sm:$0xff] }
 0x23b   :  { %v10877_v62 = vld [vmem:[%s13784_s1 + $0x12f8] sm:$0xff]   ;;  %v95_v1 = vld [vmem:[%s13783_s0 + $0x248] sm:$0xff]  ;;  %v96_v6 = vld [vmem:[%s13783_s0 + $0x250] sm:$0xff] }
 0x23c   :  { %v13033_v63 = vadd.f32 %v9667_v56, %v7200_v59  ;;  %9948 = vmatpush3.bf16.msra.mxu0 %v10842_v7  ;;  %v10871_v56 = vld [vmem:[%s13784_s1 + $0x12a8] sm:$0xff]   ;;  %v10874_v59 = vld [vmem:[%s13784_s1 + $0x1230] sm:$0xff]   ;;  %v191_v3 = vpack.c.bf16 %v95_v1, %v95_v1  ;;  %v190_v7 = vpack.c.bf16 %v94_v5, %v94_v5 }
 0x23d   :  { %9970 = vmatpush3.bf16.msra.mxu1 %v10843_v8  ;;  %9949 = vmatprep.subr.bf16.mxu0 %v10844_v9  ;;  %v192_v8 = vpack.c.bf16 %v96_v6, %v96_v6  ;;  %v10880_v9 = vld [vmem:[%s13784_s1 + $0x1340] sm:$0xff]   ;;  %v10916_v1 = vld [vmem:[%s13784_s1 + $0x1448] sm:$0xff]   ;;  %v10920_v5 = vld [vmem:[%s13784_s1 + $0x1450] sm:$0xff]  }
 0x23e   :  { %9971 = vmatprep.subr.bf16.mxu1 %v10845_v10  ;;  %v10881_v10 = vld [vmem:[%s13784_s1 + $0x13c0] sm:$0xff]   ;;  %v10917_v2 = vld [vmem:[%s13784_s1 + $0x14c8] sm:$0xff]   ;;  %v10921_v6 = vld [vmem:[%s13784_s1 + $0x14d0] sm:$0xff]  }
 0x240   :  { %9950 = vmatpush3.bf16.msra.mxu0 %v10846_v11  ;;  %v10882_v11 = vld [vmem:[%s13784_s1 + $0x1300] sm:$0xff]  }
 0x241   :  { %9972 = vmatpush3.bf16.msra.mxu1 %v10847_v12  ;;  %9979 = vmatprep.subr.bf16.mxu0 %v10848_v21  ;;  %v10883_v12 = vld [vmem:[%s13784_s1 + $0x1380] sm:$0xff]   ;;  %v10892_v21 = vld [vmem:[%s13784_s1 + $0x1358] sm:$0xff]  }
 0x242   :  { %10001 = vmatprep.subr.bf16.mxu1 %v10849_v22  ;;  %v10893_v22 = vld [vmem:[%s13784_s1 + $0x13d8] sm:$0xff]  }
 0x243   :  { %7758 = vmatmul.mubr.bf16.vlgmr.msra.gmra.mrb[68].mxu0 %v186_v18  ;;  %v10889_v18 = vld [vmem:[%s13784_s1 + $0x13d0] sm:$0xff]  }
 0x244   :  { %7798 = vmatmul.mubr.bf16.vlgmr.msra.gmra.mrb[68].mxu1 %v188_v20  ;;  %9980 = vmatpush3.bf16.msra.mxu0 %v10850_v23  ;;  %v10891_v20 = vld [vmem:[%s13784_s1 + $0x1390] sm:$0xff]  }
 0x245   :  { %10002 = vmatpush3.bf16.msra.mxu1 %v10851_v24  ;;  %9981 = vmatprep.subr.bf16.mxu0 %v10852_v25  ;;  %v10894_v24 = vld [vmem:[%s13784_s1 + $0x1318] sm:$0xff]  }
 0x246   :  { %10003 = vmatprep.subr.bf16.mxu1 %v10853_v26  ;;  %7837 = vmatprep.mubr.bf16.mxu0 %v191_v3  ;;  %v10895_v26 = vld [vmem:[%s13784_s1 + $0x1398] sm:$0xff]   ;;  %v10918_v3 = vld [vmem:[%s13784_s1 + $0x1408] sm:$0xff]  }
 0x247   :  { %7877 = vmatprep.mubr.bf16.mxu1 %v193_v4  ;;  %v10919_v4 = vld [vmem:[%s13784_s1 + $0x1488] sm:$0xff]  }
 0x248   :  { %9982 = vmatpush3.bf16.msra.mxu0 %v10854_v27 }
 0x249   :  { %10004 = vmatpush3.bf16.msra.mxu1 %v10855_v28  ;;  %9983 = vmatprep.subr.bf16.mxu0 %v10856_v29  ;;  %v10896_v28 = vld [vmem:[%s13784_s1 + $0x1360] sm:$0xff]  }
 0x24a   :  { %10005 = vmatprep.subr.bf16.mxu1 %v10857_v30 }
 0x24c   :  { %9984 = vmatpush3.bf16.msra.mxu0 %v10858_v31  ;;  %v10897_v31 = vld [vmem:[%s13784_s1 + $0x13e0] sm:$0xff]  }
 0x24d   :  { %10006 = vmatpush3.bf16.msra.mxu1 %v10859_v32  ;;  %9985 = vmatprep.subr.bf16.mxu0 %v10860_v33 }
 0x24e   :  { %10007 = vmatprep.subr.bf16.mxu1 %v10861_v34  ;;  %v10898_v34 = vld [vmem:[%s13784_s1 + $0x1320] sm:$0xff]  }
 0x250   :  { %9986 = vmatpush3.bf16.msra.mxu0 %v10862_v36 }
 0x251   :  { %10008 = vmatpush3.bf16.msra.mxu1 %v10863_v38  ;;  %9987 = vmatprep.subr.bf16.mxu0 %v10864_v40  ;;  %v10900_v40 = vld [vmem:[%s13784_s1 + $0x1368] sm:$0xff]  }
 0x252   :  { %10009 = vmatprep.subr.bf16.mxu1 %v10865_v43  ;;  %v10902_v43 = vld [vmem:[%s13784_s1 + $0x1328] sm:$0xff]  }
 0x254   :  { %9988 = vmatpush3.bf16.msra.mxu0 %v10866_v46  ;;  %v10905_v46 = vld [vmem:[%s13784_s1 + $0x13f0] sm:$0xff]  }
 0x255   :  { %10010 = vmatpush3.bf16.msra.mxu1 %v10867_v49  ;;  %9989 = vmatprep.subr.bf16.mxu0 %v10868_v52  ;;  %v10908_v49 = vld [vmem:[%s13784_s1 + $0x1378] sm:$0xff]  }
 0x256   :  { %v9687_v35 = vpop.f32.mrb[44].mxu0  ;;  %10011 = vmatprep.subr.bf16.mxu1 %v10869_v54  ;;  %v10911_v52 = vld [vmem:[%s13784_s1 + $0x13b8] sm:$0xff]  }
 0x257   :  { %v9709_v37 = vpop.f32.mrb[44].mxu1  ;;  %v9688_v39 = vpop.f32.mrb[45].mxu0 }
 0x258   :  { %v9689_v41 = vadd.f32 %v9688_v39, %v9687_v35  ;;  %v9710_v42 = vpop.f32.mrb[45].mxu1  ;;  %v9690_v45 = vpop.f32.mrb[46].mxu0  ;;  %9990 = vmatpush3.bf16.msra.mxu0 %v10870_v55  ;;  %v101_v55 = vld [vmem:[%s13783_s0 + $0x278] sm:$0xff] }
 0x259   :  { %v9711_v44 = vadd.f32 %v9710_v42, %v9709_v37  ;;  %v9712_v48 = vpop.f32.mrb[46].mxu1  ;;  %v9691_v50 = vpop.f32.mrb[47].mxu0  ;;  %10012 = vmatpush3.bf16.msra.mxu1 %v10871_v56  ;;  %9991 = vmatprep.subr.bf16.mxu0 %v10872_v57  ;;  %v10899_v37 = vld [vmem:[%s13784_s1 + $0x13a0] sm:$0xff]   ;;  %v10901_v42 = vld [vmem:[%s13784_s1 + $0x13e8] sm:$0xff]   ;;  %v10904_v45 = vld [vmem:[%s13784_s1 + $0x1370] sm:$0xff]  }
 0x25a   :  { %v7280_v47 = vadd.f32 %v9689_v41, %v13033_v63  ;;  %v9713_v53 = vpop.f32.mrb[47].mxu1  ;;  %10013 = vmatprep.subr.bf16.mxu1 %v10873_v58  ;;  %v10878_v63 = vld [vmem:[%s13784_s1 + $0x1238] sm:$0xff]   ;;  %v10907_v48 = vld [vmem:[%s13784_s1 + $0x13b0] sm:$0xff]   ;;  %v98_v56 = vld [vmem:[%s13783_s0 + $0x260] sm:$0xff]  ;;  %v197_v58 = vpack.c.bf16 %v101_v55, %v101_v55 }
 0x25b   :  { %v10909_v50 = vld [vmem:[%s13784_s1 + $0x13f8] sm:$0xff]   ;;  %v99_v53 = vld [vmem:[%s13783_s0 + $0x268] sm:$0xff]  ;;  %v100_v57 = vld [vmem:[%s13783_s0 + $0x270] sm:$0xff] }
 0x25c   :  { %v13144_v51 = vadd.f32 %v9711_v44, %v7280_v47  ;;  %9992 = vmatpush3.bf16.msra.mxu0 %v10874_v59  ;;  %v10903_v44 = vld [vmem:[%s13784_s1 + $0x13a8] sm:$0xff]   ;;  %v10906_v47 = vld [vmem:[%s13784_s1 + $0x1330] sm:$0xff]   ;;  %v195_v54 = vpack.c.bf16 %v99_v53, %v99_v53  ;;  %v194_v59 = vpack.c.bf16 %v98_v56, %v98_v56 }
 0x25d   :  { %10014 = vmatpush3.bf16.msra.mxu1 %v10875_v60  ;;  %9993 = vmatprep.subr.bf16.mxu0 %v10876_v61  ;;  %v196_v60 = vpack.c.bf16 %v100_v57, %v100_v57  ;;  %v10912_v61 = vld [vmem:[%s13784_s1 + $0x1440] sm:$0xff]   ;;  %v10948_v53 = vld [vmem:[%s13784_s1 + $0x1548] sm:$0xff]   ;;  %v10952_v57 = vld [vmem:[%s13784_s1 + $0x1550] sm:$0xff]  }
 0x25e   :  { %10015 = vmatprep.subr.bf16.mxu1 %v10877_v62  ;;  %v10913_v62 = vld [vmem:[%s13784_s1 + $0x14c0] sm:$0xff]   ;;  %v10950_v55 = vld [vmem:[%s13784_s1 + $0x1508] sm:$0xff]  }
 0x25f   :  { %v10951_v56 = vld [vmem:[%s13784_s1 + $0x1588] sm:$0xff]  }
 0x260   :  { %9994 = vmatpush3.bf16.msra.mxu0 %v10878_v63  ;;  %v10914_v63 = vld [vmem:[%s13784_s1 + $0x1400] sm:$0xff]  }
 0x261   :  { %10016 = vmatpush3.bf16.msra.mxu1 %v10879_v0  ;;  %10023 = vmatprep.subr.bf16.mxu0 %v10880_v9  ;;  %v10915_v0 = vld [vmem:[%s13784_s1 + $0x1480] sm:$0xff]   ;;  %v10924_v9 = vld [vmem:[%s13784_s1 + $0x1458] sm:$0xff]  }
 0x262   :  { %10045 = vmatprep.subr.bf16.mxu1 %v10881_v10  ;;  %v10925_v10 = vld [vmem:[%s13784_s1 + $0x14d8] sm:$0xff]  }
 0x263   :  { %7838 = vmatmul.mubr.bf16.vlgmr.msra.gmra.mrb[72].mxu0 %v190_v7  ;;  %v10922_v7 = vld [vmem:[%s13784_s1 + $0x1410] sm:$0xff]  }
 0x264   :  { %7878 = vmatmul.mubr.bf16.vlgmr.msra.gmra.mrb[72].mxu1 %v192_v8  ;;  %10024 = vmatpush3.bf16.msra.mxu0 %v10882_v11  ;;  %v10923_v8 = vld [vmem:[%s13784_s1 + $0x1490] sm:$0xff]  }
 0x265   :  { %10046 = vmatpush3.bf16.msra.mxu1 %v10883_v12  ;;  %10025 = vmatprep.subr.bf16.mxu0 %v10884_v13  ;;  %v10926_v12 = vld [vmem:[%s13784_s1 + $0x1418] sm:$0xff]  }
 0x266   :  { %10047 = vmatprep.subr.bf16.mxu1 %v10885_v14  ;;  %7917 = vmatprep.mubr.bf16.mxu0 %v195_v54  ;;  %v10927_v14 = vld [vmem:[%s13784_s1 + $0x1498] sm:$0xff]   ;;  %v10949_v54 = vld [vmem:[%s13784_s1 + $0x15c8] sm:$0xff]  }
 0x267   :  { %7957 = vmatprep.mubr.bf16.mxu1 %v197_v58  ;;  %v10953_v58 = vld [vmem:[%s13784_s1 + $0x15d0] sm:$0xff]  }
 0x268   :  { %10026 = vmatpush3.bf16.msra.mxu0 %v10886_v15 }
 0x269   :  { %10048 = vmatpush3.bf16.msra.mxu1 %v10887_v16  ;;  %10027 = vmatprep.subr.bf16.mxu0 %v10888_v17  ;;  %v10928_v16 = vld [vmem:[%s13784_s1 + $0x1460] sm:$0xff]  }
 0x26a   :  { %10049 = vmatprep.subr.bf16.mxu1 %v10889_v18 }
 0x26c   :  { %10028 = vmatpush3.bf16.msra.mxu0 %v10890_v19  ;;  %v10929_v19 = vld [vmem:[%s13784_s1 + $0x14e0] sm:$0xff]  }
 0x26d   :  { %10050 = vmatpush3.bf16.msra.mxu1 %v10891_v20  ;;  %10029 = vmatprep.subr.bf16.mxu0 %v10892_v21 }
 0x26e   :  { %10051 = vmatprep.subr.bf16.mxu1 %v10893_v22  ;;  %v10930_v22 = vld [vmem:[%s13784_s1 + $0x1420] sm:$0xff]  }
 0x270   :  { %10030 = vmatpush3.bf16.msra.mxu0 %v10894_v24 }
 0x271   :  { %10052 = vmatpush3.bf16.msra.mxu1 %v10895_v26  ;;  %10031 = vmatprep.subr.bf16.mxu0 %v10896_v28  ;;  %v10932_v28 = vld [vmem:[%s13784_s1 + $0x1468] sm:$0xff]  }
 0x272   :  { %10053 = vmatprep.subr.bf16.mxu1 %v10897_v31  ;;  %v10934_v31 = vld [vmem:[%s13784_s1 + $0x1428] sm:$0xff]  }
 0x274   :  { %10032 = vmatpush3.bf16.msra.mxu0 %v10898_v34  ;;  %v10937_v34 = vld [vmem:[%s13784_s1 + $0x14f0] sm:$0xff]  }
 0x275   :  { %10054 = vmatpush3.bf16.msra.mxu1 %v10899_v37  ;;  %10033 = vmatprep.subr.bf16.mxu0 %v10900_v40  ;;  %v10940_v37 = vld [vmem:[%s13784_s1 + $0x1478] sm:$0xff]  }
 0x276   :  { %v9731_v23 = vpop.f32.mrb[48].mxu0  ;;  %10055 = vmatprep.subr.bf16.mxu1 %v10901_v42  ;;  %v10943_v40 = vld [vmem:[%s13784_s1 + $0x14b8] sm:$0xff]  }
 0x277   :  { %v9753_v25 = vpop.f32.mrb[48].mxu1  ;;  %v9732_v27 = vpop.f32.mrb[49].mxu0  ;;  %v105_v42 = vld [vmem:[%s13783_s0 + $0x298] sm:$0xff] }
 0x278   :  { %v9733_v29 = vadd.f32 %v9732_v27, %v9731_v23  ;;  %v9754_v30 = vpop.f32.mrb[49].mxu1  ;;  %v9734_v33 = vpop.f32.mrb[50].mxu0  ;;  %10034 = vmatpush3.bf16.msra.mxu0 %v10902_v43  ;;  %v102_v43 = vld [vmem:[%s13783_s0 + $0x280] sm:$0xff] }
 0x279   :  { %v9755_v32 = vadd.f32 %v9754_v30, %v9753_v25  ;;  %v9756_v36 = vpop.f32.mrb[50].mxu1  ;;  %v9735_v38 = vpop.f32.mrb[51].mxu0  ;;  %10056 = vmatpush3.bf16.msra.mxu1 %v10903_v44  ;;  %10035 = vmatprep.subr.bf16.mxu0 %v10904_v45  ;;  %v10931_v25 = vld [vmem:[%s13784_s1 + $0x14a0] sm:$0xff]   ;;  %v10933_v30 = vld [vmem:[%s13784_s1 + $0x14e8] sm:$0xff]   ;;  %v10936_v33 = vld [vmem:[%s13784_s1 + $0x1470] sm:$0xff]   ;;  %v201_v45 = vpack.c.bf16 %v105_v42, %v105_v42 }
 0x27a   :  { %v7360_v35 = vadd.f32 %v9733_v29, %v13144_v51  ;;  %v9757_v41 = vpop.f32.mrb[51].mxu1  ;;  %10057 = vmatprep.subr.bf16.mxu1 %v10905_v46  ;;  %v10910_v51 = vld [vmem:[%s13784_s1 + $0x1338] sm:$0xff]   ;;  %v10939_v36 = vld [vmem:[%s13784_s1 + $0x14b0] sm:$0xff]   ;;  %v198_v46 = vpack.c.bf16 %v102_v43, %v102_v43  ;;  %v10981_v42 = vld [vmem:[%s13784_s1 + $0x16c8] sm:$0xff]  }
 0x27b   :  { %v10941_v38 = vld [vmem:[%s13784_s1 + $0x14f8] sm:$0xff]   ;;  %v103_v41 = vld [vmem:[%s13783_s0 + $0x288] sm:$0xff] }
 0x27c   :  { %v13255_v39 = vadd.f32 %v9755_v32, %v7360_v35  ;;  %10036 = vmatpush3.bf16.msra.mxu0 %v10906_v47  ;;  %v10935_v32 = vld [vmem:[%s13784_s1 + $0x14a8] sm:$0xff]   ;;  %v10938_v35 = vld [vmem:[%s13784_s1 + $0x1430] sm:$0xff]   ;;  %v199_v44 = vpack.c.bf16 %v103_v41, %v103_v41 }
 0x27d   :  { %10058 = vmatpush3.bf16.msra.mxu1 %v10907_v48  ;;  %10037 = vmatprep.subr.bf16.mxu0 %v10908_v49  ;;  %v104_v47 = vld [vmem:[%s13783_s0 + $0x290] sm:$0xff]  ;;  %v10944_v49 = vld [vmem:[%s13784_s1 + $0x1540] sm:$0xff]   ;;  %v10980_v41 = vld [vmem:[%s13784_s1 + $0x1648] sm:$0xff]  }
 0x27e   :  { %10059 = vmatprep.subr.bf16.mxu1 %v10909_v50  ;;  %v200_v48 = vpack.c.bf16 %v104_v47, %v104_v47  ;;  %v10945_v50 = vld [vmem:[%s13784_s1 + $0x15c0] sm:$0xff]   ;;  %v10982_v43 = vld [vmem:[%s13784_s1 + $0x1608] sm:$0xff]   ;;  %v10986_v47 = vld [vmem:[%s13784_s1 + $0x1610] sm:$0xff]  }
 0x280   :  { %10038 = vmatpush3.bf16.msra.mxu0 %v10910_v51  ;;  %v10946_v51 = vld [vmem:[%s13784_s1 + $0x1500] sm:$0xff]  }
 0x281   :  { %10060 = vmatpush3.bf16.msra.mxu1 %v10911_v52  ;;  %10067 = vmatprep.subr.bf16.mxu0 %v10912_v61  ;;  %v10947_v52 = vld [vmem:[%s13784_s1 + $0x1580] sm:$0xff]   ;;  %v10956_v61 = vld [vmem:[%s13784_s1 + $0x1558] sm:$0xff]  }
 0x282   :  { %10089 = vmatprep.subr.bf16.mxu1 %v10913_v62  ;;  %v10957_v62 = vld [vmem:[%s13784_s1 + $0x15d8] sm:$0xff]  }
 0x283   :  { %7918 = vmatmul.mubr.bf16.vlgmr.msra.gmra.mrb[76].mxu0 %v194_v59  ;;  %v10954_v59 = vld [vmem:[%s13784_s1 + $0x1510] sm:$0xff]  }
 0x284   :  { %7958 = vmatmul.mubr.bf16.vlgmr.msra.gmra.mrb[76].mxu1 %v196_v60  ;;  %10068 = vmatpush3.bf16.msra.mxu0 %v10914_v63  ;;  %v10955_v60 = vld [vmem:[%s13784_s1 + $0x1590] sm:$0xff]  }
 0x285   :  { %10090 = vmatpush3.bf16.msra.mxu1 %v10915_v0  ;;  %10069 = vmatprep.subr.bf16.mxu0 %v10916_v1  ;;  %v10958_v0 = vld [vmem:[%s13784_s1 + $0x1518] sm:$0xff]  }
 0x286   :  { %10091 = vmatprep.subr.bf16.mxu1 %v10917_v2  ;;  %7997 = vmatprep.mubr.bf16.mxu0 %v199_v44  ;;  %v10959_v2 = vld [vmem:[%s13784_s1 + $0x1598] sm:$0xff]   ;;  %v10983_v44 = vld [vmem:[%s13784_s1 + $0x1688] sm:$0xff]  }
 0x287   :  { %8037 = vmatprep.mubr.bf16.mxu1 %v201_v45  ;;  %v10984_v45 = vld [vmem:[%s13784_s1 + $0x1650] sm:$0xff]  }
 0x288   :  { %10070 = vmatpush3.bf16.msra.mxu0 %v10918_v3 }
 0x289   :  { %10092 = vmatpush3.bf16.msra.mxu1 %v10919_v4  ;;  %10071 = vmatprep.subr.bf16.mxu0 %v10920_v5  ;;  %v10960_v4 = vld [vmem:[%s13784_s1 + $0x1560] sm:$0xff]  }
 0x28a   :  { %10093 = vmatprep.subr.bf16.mxu1 %v10921_v6 }
 0x28c   :  { %10072 = vmatpush3.bf16.msra.mxu0 %v10922_v7  ;;  %v10961_v7 = vld [vmem:[%s13784_s1 + $0x15e0] sm:$0xff]  }
 0x28d   :  { %10094 = vmatpush3.bf16.msra.mxu1 %v10923_v8  ;;  %10073 = vmatprep.subr.bf16.mxu0 %v10924_v9 }
 0x28e   :  { %10095 = vmatprep.subr.bf16.mxu1 %v10925_v10  ;;  %v10962_v10 = vld [vmem:[%s13784_s1 + $0x1520] sm:$0xff]  }
 0x290   :  { %10074 = vmatpush3.bf16.msra.mxu0 %v10926_v12 }
 0x291   :  { %10096 = vmatpush3.bf16.msra.mxu1 %v10927_v14  ;;  %10075 = vmatprep.subr.bf16.mxu0 %v10928_v16  ;;  %v10964_v16 = vld [vmem:[%s13784_s1 + $0x1568] sm:$0xff]  }
 0x292   :  { %10097 = vmatprep.subr.bf16.mxu1 %v10929_v19  ;;  %v10966_v19 = vld [vmem:[%s13784_s1 + $0x1528] sm:$0xff]  }
 0x294   :  { %10076 = vmatpush3.bf16.msra.mxu0 %v10930_v22  ;;  %v10969_v22 = vld [vmem:[%s13784_s1 + $0x15f0] sm:$0xff]  }
 0x295   :  { %10098 = vmatpush3.bf16.msra.mxu1 %v10931_v25  ;;  %10077 = vmatprep.subr.bf16.mxu0 %v10932_v28  ;;  %v10972_v25 = vld [vmem:[%s13784_s1 + $0x1578] sm:$0xff]  }
 0x296   :  { %v9775_v11 = vpop.f32.mrb[52].mxu0  ;;  %10099 = vmatprep.subr.bf16.mxu1 %v10933_v30  ;;  %v10975_v28 = vld [vmem:[%s13784_s1 + $0x15b8] sm:$0xff]  }
 0x297   :  { %v9797_v13 = vpop.f32.mrb[52].mxu1  ;;  %v9776_v15 = vpop.f32.mrb[53].mxu0  ;;  %v109_v30 = vld [vmem:[%s13783_s0 + $0x2b8] sm:$0xff] }
 0x298   :  { %v9777_v17 = vadd.f32 %v9776_v15, %v9775_v11  ;;  %v9798_v18 = vpop.f32.mrb[53].mxu1  ;;  %v9778_v21 = vpop.f32.mrb[54].mxu0  ;;  %10078 = vmatpush3.bf16.msra.mxu0 %v10934_v31 }
 0x299   :  { %v9799_v20 = vadd.f32 %v9798_v18, %v9797_v13  ;;  %v9800_v24 = vpop.f32.mrb[54].mxu1  ;;  %v9779_v26 = vpop.f32.mrb[55].mxu0  ;;  %10100 = vmatpush3.bf16.msra.mxu1 %v10935_v32  ;;  %10079 = vmatprep.subr.bf16.mxu0 %v10936_v33  ;;  %v10963_v13 = vld [vmem:[%s13784_s1 + $0x15a0] sm:$0xff]   ;;  %v10965_v18 = vld [vmem:[%s13784_s1 + $0x15e8] sm:$0xff]   ;;  %v10968_v21 = vld [vmem:[%s13784_s1 + $0x1570] sm:$0xff]   ;;  %v205_v32 = vpack.c.bf16 %v109_v30, %v109_v30 }
 0x29a   :  { %v7440_v23 = vadd.f32 %v9777_v17, %v13255_v39  ;;  %v9801_v29 = vpop.f32.mrb[55].mxu1  ;;  %10101 = vmatprep.subr.bf16.mxu1 %v10937_v34  ;;  %v10942_v39 = vld [vmem:[%s13784_s1 + $0x1438] sm:$0xff]   ;;  %v10971_v24 = vld [vmem:[%s13784_s1 + $0x15b0] sm:$0xff]   ;;  %v106_v33 = vld [vmem:[%s13783_s0 + $0x2a0] sm:$0xff] }
 0x29b   :  { %v10973_v26 = vld [vmem:[%s13784_s1 + $0x15f8] sm:$0xff]   ;;  %v107_v29 = vld [vmem:[%s13783_s0 + $0x2a8] sm:$0xff]  ;;  %v108_v34 = vld [vmem:[%s13783_s0 + $0x2b0] sm:$0xff] }
 0x29c   :  { %v13366_v27 = vadd.f32 %v9799_v20, %v7440_v23  ;;  %10080 = vmatpush3.bf16.msra.mxu0 %v10938_v35  ;;  %v10967_v20 = vld [vmem:[%s13784_s1 + $0x15a8] sm:$0xff]   ;;  %v10970_v23 = vld [vmem:[%s13784_s1 + $0x1530] sm:$0xff]   ;;  %v203_v31 = vpack.c.bf16 %v107_v29, %v107_v29  ;;  %v202_v35 = vpack.c.bf16 %v106_v33, %v106_v33 }
 0x29d   :  { %10102 = vmatpush3.bf16.msra.mxu1 %v10939_v36  ;;  %10081 = vmatprep.subr.bf16.mxu0 %v10940_v37  ;;  %v204_v36 = vpack.c.bf16 %v108_v34, %v108_v34  ;;  %v10976_v37 = vld [vmem:[%s13784_s1 + $0x1640] sm:$0xff]   ;;  %v11012_v29 = vld [vmem:[%s13784_s1 + $0x1748] sm:$0xff]   ;;  %v11016_v33 = vld [vmem:[%s13784_s1 + $0x1750] sm:$0xff]  }
 0x29e   :  { %10103 = vmatprep.subr.bf16.mxu1 %v10941_v38  ;;  %v10977_v38 = vld [vmem:[%s13784_s1 + $0x16c0] sm:$0xff]   ;;  %v11013_v30 = vld [vmem:[%s13784_s1 + $0x17c8] sm:$0xff]   ;;  %v11017_v34 = vld [vmem:[%s13784_s1 + $0x17d0] sm:$0xff]  }
 0x2a0   :  { %10082 = vmatpush3.bf16.msra.mxu0 %v10942_v39  ;;  %v10978_v39 = vld [vmem:[%s13784_s1 + $0x1600] sm:$0xff]  }
 0x2a1   :  { %10104 = vmatpush3.bf16.msra.mxu1 %v10943_v40  ;;  %10111 = vmatprep.subr.bf16.mxu0 %v10944_v49  ;;  %v10979_v40 = vld [vmem:[%s13784_s1 + $0x1680] sm:$0xff]   ;;  %v10988_v49 = vld [vmem:[%s13784_s1 + $0x1658] sm:$0xff]  }
 0x2a2   :  { %10133 = vmatprep.subr.bf16.mxu1 %v10945_v50  ;;  %v10989_v50 = vld [vmem:[%s13784_s1 + $0x16d8] sm:$0xff]  }
 0x2a3   :  { %7998 = vmatmul.mubr.bf16.vlgmr.msra.gmra.mrb[80].mxu0 %v198_v46  ;;  %v10985_v46 = vld [vmem:[%s13784_s1 + $0x16d0] sm:$0xff]  }
 0x2a4   :  { %8038 = vmatmul.mubr.bf16.vlgmr.msra.gmra.mrb[80].mxu1 %v200_v48  ;;  %10112 = vmatpush3.bf16.msra.mxu0 %v10946_v51  ;;  %v10987_v48 = vld [vmem:[%s13784_s1 + $0x1690] sm:$0xff]  }
 0x2a5   :  { %10134 = vmatpush3.bf16.msra.mxu1 %v10947_v52  ;;  %10113 = vmatprep.subr.bf16.mxu0 %v10948_v53  ;;  %v10990_v52 = vld [vmem:[%s13784_s1 + $0x1618] sm:$0xff]  }
 0x2a6   :  { %10135 = vmatprep.subr.bf16.mxu1 %v10949_v54  ;;  %8077 = vmatprep.mubr.bf16.mxu0 %v203_v31  ;;  %v10991_v54 = vld [vmem:[%s13784_s1 + $0x1698] sm:$0xff]   ;;  %v11014_v31 = vld [vmem:[%s13784_s1 + $0x1708] sm:$0xff]  }
 0x2a7   :  { %8117 = vmatprep.mubr.bf16.mxu1 %v205_v32  ;;  %v11015_v32 = vld [vmem:[%s13784_s1 + $0x1788] sm:$0xff]  }
 0x2a8   :  { %10114 = vmatpush3.bf16.msra.mxu0 %v10950_v55 }
 0x2a9   :  { %10136 = vmatpush3.bf16.msra.mxu1 %v10951_v56  ;;  %10115 = vmatprep.subr.bf16.mxu0 %v10952_v57  ;;  %v10992_v56 = vld [vmem:[%s13784_s1 + $0x1660] sm:$0xff]  }
 0x2aa   :  { %10137 = vmatprep.subr.bf16.mxu1 %v10953_v58 }
 0x2ac   :  { %10116 = vmatpush3.bf16.msra.mxu0 %v10954_v59  ;;  %v10993_v59 = vld [vmem:[%s13784_s1 + $0x16e0] sm:$0xff]  }
 0x2ad   :  { %10138 = vmatpush3.bf16.msra.mxu1 %v10955_v60  ;;  %10117 = vmatprep.subr.bf16.mxu0 %v10956_v61 }
 0x2ae   :  { %10139 = vmatprep.subr.bf16.mxu1 %v10957_v62  ;;  %v10994_v62 = vld [vmem:[%s13784_s1 + $0x1620] sm:$0xff]  }
 0x2b0   :  { %10118 = vmatpush3.bf16.msra.mxu0 %v10958_v0 }
 0x2b1   :  { %10140 = vmatpush3.bf16.msra.mxu1 %v10959_v2  ;;  %10119 = vmatprep.subr.bf16.mxu0 %v10960_v4  ;;  %v10996_v4 = vld [vmem:[%s13784_s1 + $0x1668] sm:$0xff]  }
 0x2b2   :  { %10141 = vmatprep.subr.bf16.mxu1 %v10961_v7  ;;  %v10998_v7 = vld [vmem:[%s13784_s1 + $0x1628] sm:$0xff]  }
 0x2b4   :  { %10120 = vmatpush3.bf16.msra.mxu0 %v10962_v10  ;;  %v11001_v10 = vld [vmem:[%s13784_s1 + $0x16f0] sm:$0xff]  }
 0x2b5   :  { %10142 = vmatpush3.bf16.msra.mxu1 %v10963_v13  ;;  %10121 = vmatprep.subr.bf16.mxu0 %v10964_v16  ;;  %v11004_v13 = vld [vmem:[%s13784_s1 + $0x1678] sm:$0xff]  }
 0x2b6   :  { %v9819_v63 = vpop.f32.mrb[56].mxu0  ;;  %10143 = vmatprep.subr.bf16.mxu1 %v10965_v18  ;;  %v11007_v16 = vld [vmem:[%s13784_s1 + $0x16b8] sm:$0xff]  }
 0x2b7   :  { %v9841_v1 = vpop.f32.mrb[56].mxu1  ;;  %v9820_v3 = vpop.f32.mrb[57].mxu0 }
 0x2b8   :  { %v9821_v5 = vadd.f32 %v9820_v3, %v9819_v63  ;;  %v9842_v6 = vpop.f32.mrb[57].mxu1  ;;  %v9822_v9 = vpop.f32.mrb[58].mxu0  ;;  %10122 = vmatpush3.bf16.msra.mxu0 %v10966_v19  ;;  %v113_v19 = vld [vmem:[%s13783_s0 + $0x2d8] sm:$0xff] }
 0x2b9   :  { %v9843_v8 = vadd.f32 %v9842_v6, %v9841_v1  ;;  %v9844_v12 = vpop.f32.mrb[58].mxu1  ;;  %v9823_v14 = vpop.f32.mrb[59].mxu0  ;;  %10144 = vmatpush3.bf16.msra.mxu1 %v10967_v20  ;;  %10123 = vmatprep.subr.bf16.mxu0 %v10968_v21  ;;  %v10995_v1 = vld [vmem:[%s13784_s1 + $0x16a0] sm:$0xff]   ;;  %v10997_v6 = vld [vmem:[%s13784_s1 + $0x16e8] sm:$0xff]   ;;  %v11000_v9 = vld [vmem:[%s13784_s1 + $0x1670] sm:$0xff]  }
 0x2ba   :  { %v7520_v11 = vadd.f32 %v9821_v5, %v13366_v27  ;;  %v9845_v17 = vpop.f32.mrb[59].mxu1  ;;  %10145 = vmatprep.subr.bf16.mxu1 %v10969_v22  ;;  %v10974_v27 = vld [vmem:[%s13784_s1 + $0x1538] sm:$0xff]   ;;  %v11003_v12 = vld [vmem:[%s13784_s1 + $0x16b0] sm:$0xff]   ;;  %v110_v20 = vld [vmem:[%s13783_s0 + $0x2c0] sm:$0xff]  ;;  %v209_v22 = vpack.c.bf16 %v113_v19, %v113_v19 }
 0x2bb   :  { %v11005_v14 = vld [vmem:[%s13784_s1 + $0x16f8] sm:$0xff]   ;;  %v111_v17 = vld [vmem:[%s13783_s0 + $0x2c8] sm:$0xff]  ;;  %v112_v21 = vld [vmem:[%s13783_s0 + $0x2d0] sm:$0xff] }
 0x2bc   :  { %v13477_v15 = vadd.f32 %v9843_v8, %v7520_v11  ;;  %10124 = vmatpush3.bf16.msra.mxu0 %v10970_v23  ;;  %v10999_v8 = vld [vmem:[%s13784_s1 + $0x16a8] sm:$0xff]   ;;  %v11002_v11 = vld [vmem:[%s13784_s1 + $0x1630] sm:$0xff]   ;;  %v207_v18 = vpack.c.bf16 %v111_v17, %v111_v17  ;;  %v206_v23 = vpack.c.bf16 %v110_v20, %v110_v20 }
 0x2bd   :  { %10146 = vmatpush3.bf16.msra.mxu1 %v10971_v24  ;;  %10125 = vmatprep.subr.bf16.mxu0 %v10972_v25  ;;  %v208_v24 = vpack.c.bf16 %v112_v21, %v112_v21  ;;  %v11008_v25 = vld [vmem:[%s13784_s1 + $0x1740] sm:$0xff]  }
 0x2be   :  { %10147 = vmatprep.subr.bf16.mxu1 %v10973_v26  ;;  %v11009_v26 = vld [vmem:[%s13784_s1 + $0x17c0] sm:$0xff]  }
 0x2c0   :  { %10126 = vmatpush3.bf16.msra.mxu0 %v10974_v27  ;;  %v11010_v27 = vld [vmem:[%s13784_s1 + $0x1700] sm:$0xff]  }
 0x2c1   :  { %10148 = vmatpush3.bf16.msra.mxu1 %v10975_v28  ;;  %10155 = vmatprep.subr.bf16.mxu0 %v10976_v37  ;;  %v11011_v28 = vld [vmem:[%s13784_s1 + $0x1780] sm:$0xff]   ;;  %v11020_v37 = vld [vmem:[%s13784_s1 + $0x1758] sm:$0xff]  }
 0x2c2   :  { %10177 = vmatprep.subr.bf16.mxu1 %v10977_v38  ;;  %v11021_v38 = vld [vmem:[%s13784_s1 + $0x17d8] sm:$0xff]  }
 0x2c3   :  { %8078 = vmatmul.mubr.bf16.vlgmr.msra.gmra.mrb[84].mxu0 %v202_v35  ;;  %v11018_v35 = vld [vmem:[%s13784_s1 + $0x1710] sm:$0xff]  }
 0x2c4   :  { %8118 = vmatmul.mubr.bf16.vlgmr.msra.gmra.mrb[84].mxu1 %v204_v36  ;;  %10156 = vmatpush3.bf16.msra.mxu0 %v10978_v39  ;;  %v11019_v36 = vld [vmem:[%s13784_s1 + $0x1790] sm:$0xff]  }
 0x2c5   :  { %10178 = vmatpush3.bf16.msra.mxu1 %v10979_v40  ;;  %10157 = vmatprep.subr.bf16.mxu0 %v10980_v41  ;;  %v11022_v40 = vld [vmem:[%s13784_s1 + $0x1718] sm:$0xff]  }
 0x2c6   :  { %10179 = vmatprep.subr.bf16.mxu1 %v10981_v42  ;;  %8157 = vmatprep.mubr.bf16.mxu0 %v207_v18  ;;  %v11023_v42 = vld [vmem:[%s13784_s1 + $0x1798] sm:$0xff]  }
 0x2c7   :  { %8197 = vmatprep.mubr.bf16.mxu1 %v209_v22 }
 0x2c8   :  { %10158 = vmatpush3.bf16.msra.mxu0 %v10982_v43 }
 0x2c9   :  { %10180 = vmatpush3.bf16.msra.mxu1 %v10983_v44  ;;  %10159 = vmatprep.subr.bf16.mxu0 %v10984_v45  ;;  %v11024_v44 = vld [vmem:[%s13784_s1 + $0x1760] sm:$0xff]  }
 0x2ca   :  { %10181 = vmatprep.subr.bf16.mxu1 %v10985_v46 }
 0x2cc   :  { %10160 = vmatpush3.bf16.msra.mxu0 %v10986_v47  ;;  %v11025_v47 = vld [vmem:[%s13784_s1 + $0x17e0] sm:$0xff]  }
 0x2cd   :  { %10182 = vmatpush3.bf16.msra.mxu1 %v10987_v48  ;;  %10161 = vmatprep.subr.bf16.mxu0 %v10988_v49 }
 0x2ce   :  { %10183 = vmatprep.subr.bf16.mxu1 %v10989_v50  ;;  %v11026_v50 = vld [vmem:[%s13784_s1 + $0x1720] sm:$0xff]  }
 0x2d0   :  { %10162 = vmatpush3.bf16.msra.mxu0 %v10990_v52 }
 0x2d1   :  { %10184 = vmatpush3.bf16.msra.mxu1 %v10991_v54  ;;  %10163 = vmatprep.subr.bf16.mxu0 %v10992_v56  ;;  %v11028_v56 = vld [vmem:[%s13784_s1 + $0x1768] sm:$0xff]  }
 0x2d2   :  { %10185 = vmatprep.subr.bf16.mxu1 %v10993_v59  ;;  %v11030_v59 = vld [vmem:[%s13784_s1 + $0x1728] sm:$0xff]  }
 0x2d4   :  { %10164 = vmatpush3.bf16.msra.mxu0 %v10994_v62  ;;  %v11033_v62 = vld [vmem:[%s13784_s1 + $0x17f0] sm:$0xff]  }
 0x2d5   :  { %10186 = vmatpush3.bf16.msra.mxu1 %v10995_v1  ;;  %10165 = vmatprep.subr.bf16.mxu0 %v10996_v4  ;;  %v11036_v1 = vld [vmem:[%s13784_s1 + $0x1778] sm:$0xff]  }
 0x2d6   :  { %v9863_v51 = vpop.f32.mrb[60].mxu0  ;;  %10187 = vmatprep.subr.bf16.mxu1 %v10997_v6  ;;  %v11039_v4 = vld [vmem:[%s13784_s1 + $0x17b8] sm:$0xff]  }
 0x2d7   :  { %v9885_v53 = vpop.f32.mrb[60].mxu1  ;;  %v9864_v55 = vpop.f32.mrb[61].mxu0  ;;  %v117_v6 = vld [vmem:[%s13783_s0 + $0x2f8] sm:$0xff] }
 0x2d8   :  { %v9865_v57 = vadd.f32 %v9864_v55, %v9863_v51  ;;  %v9886_v58 = vpop.f32.mrb[61].mxu1  ;;  %v9866_v61 = vpop.f32.mrb[62].mxu0  ;;  %10166 = vmatpush3.bf16.msra.mxu0 %v10998_v7  ;;  %v114_v7 = vld [vmem:[%s13783_s0 + $0x2e0] sm:$0xff] }
 0x2d9   :  { %v9887_v60 = vadd.f32 %v9886_v58, %v9885_v53  ;;  %v9888_v0 = vpop.f32.mrb[62].mxu1  ;;  %v9867_v2 = vpop.f32.mrb[63].mxu0  ;;  %10188 = vmatpush3.bf16.msra.mxu1 %v10999_v8  ;;  %10167 = vmatprep.subr.bf16.mxu0 %v11000_v9  ;;  %v11027_v53 = vld [vmem:[%s13784_s1 + $0x17a0] sm:$0xff]   ;;  %v11029_v58 = vld [vmem:[%s13784_s1 + $0x17e8] sm:$0xff]   ;;  %v11032_v61 = vld [vmem:[%s13784_s1 + $0x1770] sm:$0xff]   ;;  %v213_v9 = vpack.c.bf16 %v117_v6, %v117_v6 }
 0x2da   :  { %v7600_v63 = vadd.f32 %v9865_v57, %v13477_v15  ;;  %v9889_v5 = vpop.f32.mrb[63].mxu1  ;;  %10189 = vmatprep.subr.bf16.mxu1 %v11001_v10  ;;  %v11006_v15 = vld [vmem:[%s13784_s1 + $0x1638] sm:$0xff]   ;;  %v11035_v0 = vld [vmem:[%s13784_s1 + $0x17b0] sm:$0xff]   ;;  %v210_v10 = vpack.c.bf16 %v114_v7, %v114_v7 }
 0x2db   :  { %v11037_v2 = vld [vmem:[%s13784_s1 + $0x17f8] sm:$0xff]   ;;  %v115_v5 = vld [vmem:[%s13783_s0 + $0x2e8] sm:$0xff] }
 0x2dc   :  { %v13588_v3 = vadd.f32 %v9887_v60, %v7600_v63  ;;  %10168 = vmatpush3.bf16.msra.mxu0 %v11002_v11  ;;  %v11031_v60 = vld [vmem:[%s13784_s1 + $0x17a8] sm:$0xff]   ;;  %v11034_v63 = vld [vmem:[%s13784_s1 + $0x1730] sm:$0xff]   ;;  %v211_v8 = vpack.c.bf16 %v115_v5, %v115_v5 }
 0x2dd   :  { %10190 = vmatpush3.bf16.msra.mxu1 %v11003_v12  ;;  %10169 = vmatprep.subr.bf16.mxu0 %v11004_v13  ;;  %v116_v11 = vld [vmem:[%s13783_s0 + $0x2f0] sm:$0xff] }
 0x2de   :  { %10191 = vmatprep.subr.bf16.mxu1 %v11005_v14  ;;  %v212_v12 = vpack.c.bf16 %v116_v11, %v116_v11 }
 0x2e0   :  { %10170 = vmatpush3.bf16.msra.mxu0 %v11006_v15 }
 0x2e1   :  { %10192 = vmatpush3.bf16.msra.mxu1 %v11007_v16  ;;  %10199 = vmatprep.subr.bf16.mxu0 %v11008_v25 }
 0x2e2   :  { %10221 = vmatprep.subr.bf16.mxu1 %v11009_v26 }
 0x2e3   :  { %8158 = vmatmul.mubr.bf16.vlgmr.msra.gmra.mrb[88].mxu0 %v206_v23 }
 0x2e4   :  { %8198 = vmatmul.mubr.bf16.vlgmr.msra.gmra.mrb[88].mxu1 %v208_v24  ;;  %10200 = vmatpush3.bf16.msra.mxu0 %v11010_v27 }
 0x2e5   :  { %10222 = vmatpush3.bf16.msra.mxu1 %v11011_v28  ;;  %10201 = vmatprep.subr.bf16.mxu0 %v11012_v29 }
 0x2e6   :  { %10223 = vmatprep.subr.bf16.mxu1 %v11013_v30  ;;  %8237 = vmatprep.mubr.bf16.mxu0 %v211_v8 }
 0x2e7   :  { %8277 = vmatprep.mubr.bf16.mxu1 %v213_v9 }
 0x2e8   :  { %10202 = vmatpush3.bf16.msra.mxu0 %v11014_v31 }
 0x2e9   :  { %10224 = vmatpush3.bf16.msra.mxu1 %v11015_v32  ;;  %10203 = vmatprep.subr.bf16.mxu0 %v11016_v33 }
 0x2ea   :  { %10225 = vmatprep.subr.bf16.mxu1 %v11017_v34 }
 0x2ec   :  { %10204 = vmatpush3.bf16.msra.mxu0 %v11018_v35 }
 0x2ed   :  { %10226 = vmatpush3.bf16.msra.mxu1 %v11019_v36  ;;  %10205 = vmatprep.subr.bf16.mxu0 %v11020_v37 }
 0x2ee   :  { %10227 = vmatprep.subr.bf16.mxu1 %v11021_v38 }
 0x2f0   :  { %10206 = vmatpush3.bf16.msra.mxu0 %v11022_v40 }
 0x2f1   :  { %10228 = vmatpush3.bf16.msra.mxu1 %v11023_v42  ;;  %10207 = vmatprep.subr.bf16.mxu0 %v11024_v44 }
 0x2f2   :  { %10229 = vmatprep.subr.bf16.mxu1 %v11025_v47 }
 0x2f4   :  { %10208 = vmatpush3.bf16.msra.mxu0 %v11026_v50 }
 0x2f5   :  { %10230 = vmatpush3.bf16.msra.mxu1 %v11027_v53  ;;  %10209 = vmatprep.subr.bf16.mxu0 %v11028_v56 }
 0x2f6   :  { %v9907_v39 = vpop.f32.mrb[64].mxu0  ;;  %10231 = vmatprep.subr.bf16.mxu1 %v11029_v58 }
 0x2f7   :  { %v9929_v41 = vpop.f32.mrb[64].mxu1  ;;  %v9908_v43 = vpop.f32.mrb[65].mxu0 }
 0x2f8   :  { %v9909_v45 = vadd.f32 %v9908_v43, %v9907_v39  ;;  %v9930_v46 = vpop.f32.mrb[65].mxu1  ;;  %v9910_v49 = vpop.f32.mrb[66].mxu0  ;;  %10210 = vmatpush3.bf16.msra.mxu0 %v11030_v59 }
 0x2f9   :  { %v9931_v48 = vadd.f32 %v9930_v46, %v9929_v41  ;;  %v9932_v52 = vpop.f32.mrb[66].mxu1  ;;  %v9911_v54 = vpop.f32.mrb[67].mxu0  ;;  %10232 = vmatpush3.bf16.msra.mxu1 %v11031_v60  ;;  %10211 = vmatprep.subr.bf16.mxu0 %v11032_v61 }
 0x2fa   :  { %v7680_v51 = vadd.f32 %v9909_v45, %v13588_v3  ;;  %v9933_v57 = vpop.f32.mrb[67].mxu1  ;;  %10233 = vmatprep.subr.bf16.mxu1 %v11033_v62  ;;  %v11038_v3 = vld [vmem:[%s13784_s1 + $0x1738] sm:$0xff]  }
 0x2fc   :  { %v7720_v55 = vadd.f32 %v9931_v48, %v7680_v51  ;;  %10212 = vmatpush3.bf16.msra.mxu0 %v11034_v63 }
 0x2fd   :  { %10234 = vmatpush3.bf16.msra.mxu1 %v11035_v0  ;;  %10213 = vmatprep.subr.bf16.mxu0 %v11036_v1 }
 0x2fe   :  { %10235 = vmatprep.subr.bf16.mxu1 %v11037_v2 }
 0x300   :  { %10214 = vmatpush3.bf16.msra.mxu0 %v11038_v3 }
 0x301   :  { %10236 = vmatpush3.bf16.msra.mxu1 %v11039_v4 }
 0x303   :  { %8238 = vmatmul.mubr.bf16.vlgmr.msra.gmra.mrb[92].mxu0 %v210_v10 }
 0x304   :  { %8278 = vmatmul.mubr.bf16.vlgmr.msra.gmra.mrb[92].mxu1 %v212_v12 }
 0x305   :  { %10 = vsyncpa [#allocation3], 0  ;;  %v11040_v37 = vld [vmem:[%s13786_s3] sm:$0xff]   ;;  %v11071_v38 = vmov 0.0   ;;  %v11041_v39 = vld [vmem:[%s13786_s3 + $0x8] sm:$0xff]   ;;  %vm8350_vm0 = vcmask 1041408  }
 0x306   :  { %10251 = vmatprep.subr.bf16.mxu0 %v11071_v38  ;;  %v11042_v40 = vld [vmem:[%s13786_s3 + $0x10] sm:$0xff]   ;;  %v11043_v41 = vld [vmem:[%s13786_s3 + $0x18] sm:$0xff]   ;;  %v11044_v53 = vld [vmem:[%s13786_s3 + $0x20] sm:$0xff]   ;;  %vm11072_vm1 = vmmov 0   ;;  %vm8346_vm2 = vcmask 818176   ;;  %s11073_s15 = smov [#allocation2]  }
 0x307   :  { %10252 = vmatpush3.bf16.msra.mxu0 %v11040_v37  ;;  %v11046_v56 = vld [vmem:[%s13786_s3 + $0x30] ss:$0 sps:$4 sm:$0x33]   ;;  %10265 = vmatprep.mubr.msk.bf16.mxu0 %vm11072_vm1, %v11071_v38  ;;  %s8401_s16 = sshll.u32 %s11073_s15, 4  ;;  %s8402_s16 = int_to_ptr.vmem [resolvable:$true] %s8401_s16 }
 0x308   :  { %10253 = vmatprep.subr.bf16.mxu0 %v11071_v38  ;;  %v8352_v57 = vsel %vm8350_vm0, %v11046_v56, 0  ;;  %s11047_s17 = scalar_lea.vmem %s8402_s16, 128  ;;  %p11052_p1 = scmp.lt.s32.totalorder %s8402_s16, %s8402_s16 }
 0x309   :  { %p11048_p0 = scmp.ne.s32.totalorder %s8402_s16, %s11047_s17  ;;  %p11053_p2 = scmp.lt.s32.totalorder %s11047_s17, %s11047_s17 }
 0x30b   :  { %10254 = vmatpush3.bf16.msra.mxu0 %v11041_v39  ;;  %p11054_p3 = por %p11053_p2, %p11052_p1 }
 0x30c   :  { %10255 = vmatprep.subr.bf16.mxu0 %v11071_v38 }
 0x30d   :  { %p11055_p4 = pnand %p11054_p3, %p11048_p0 }
 0x30f   :  { %10256 = vmatpush3.bf16.msra.mxu0 %v11042_v40 }
 0x310   :  { %10257 = vmatprep.subr.bf16.mxu0 %v11071_v38 }
 0x313   :  { %10258 = vmatpush3.bf16.msra.mxu0 %v11043_v41 }
 0x314   :  { %10259 = vmatprep.subr.bf16.mxu0 %v11071_v38 }
 0x316   :  { %v9951_v13 = vpop.f32.mrb[68].mxu0 }
 0x317   :  { %v9973_v14 = vpop.f32.mrb[68].mxu1  ;;  %v9952_v15 = vpop.f32.mrb[69].mxu0  ;;  %10260 = vmatpush3.bf16.msra.mxu0 %v11044_v53 }
 0x318   :  { %v9974_v16 = vpop.f32.mrb[69].mxu1  ;;  %v9953_v17 = vadd.f32 %v9952_v15, %v9951_v13  ;;  %v9954_v19 = vpop.f32.mrb[70].mxu0  ;;  %10261 = vmatprep.subr.bf16.mxu0 %v11071_v38 }
 0x319   :  { %v9975_v18 = vadd.f32 %v9974_v16, %v9973_v14  ;;  %v9976_v20 = vpop.f32.mrb[70].mxu1  ;;  %v9955_v21 = vpop.f32.mrb[71].mxu0 }
 0x31a   :  { %v9977_v22 = vpop.f32.mrb[71].mxu1  ;;  %v7760_v23 = vadd.f32 %v9953_v17, %v7720_v55  ;;  %v11045_v55 = vld [vmem:[%s13786_s3 + $0x28] sm:$0xff]  }
 0x31b   :  { %10262 = vmatpush3.bf16.msra.mxu0 %v11045_v55 }
 0x31c   :  { %v7800_v24 = vadd.f32 %v9975_v18, %v7760_v23  ;;  %10263 = vmatprep.subr.bf16.mxu0 %v11071_v38 }
 0x31f   :  { %10264 = vmatpush3.bf16.msra.mxu0 %v8352_v57 }
 0x336   :  { %v9995_v25 = vpop.f32.mrb[72].mxu0 }
 0x337   :  { %v10017_v26 = vpop.f32.mrb[72].mxu1  ;;  %v9996_v27 = vpop.f32.mrb[73].mxu0 }
 0x338   :  { %v9997_v28 = vadd.f32 %v9996_v27, %v9995_v25  ;;  %v10018_v29 = vpop.f32.mrb[73].mxu1  ;;  %v9998_v30 = vpop.f32.mrb[74].mxu0 }
 0x339   :  { %v10019_v31 = vadd.f32 %v10018_v29, %v10017_v26  ;;  %v10020_v32 = vpop.f32.mrb[74].mxu1  ;;  %v9999_v33 = vpop.f32.mrb[75].mxu0 }
 0x33a   :  { %v7840_v34 = vadd.f32 %v9997_v28, %v7800_v24  ;;  %v10021_v35 = vpop.f32.mrb[75].mxu1 }
 0x33c   :  { %v7880_v36 = vadd.f32 %v10019_v31, %v7840_v34 }
 0x356   :  { %v10039_v42 = vpop.f32.mrb[76].mxu0 }
 0x357   :  { %v10061_v43 = vpop.f32.mrb[76].mxu1  ;;  %v10040_v44 = vpop.f32.mrb[77].mxu0 }
 0x358   :  { %v10041_v45 = vadd.f32 %v10040_v44, %v10039_v42  ;;  %v10062_v46 = vpop.f32.mrb[77].mxu1  ;;  %v10042_v47 = vpop.f32.mrb[78].mxu0  ;;  %v9178_v44 = vld [vmem:[%s13787_s4] ss:$0 sm:$0xff] }
 0x359   :  { %v10063_v48 = vadd.f32 %v10062_v46, %v10061_v43  ;;  %v10064_v49 = vpop.f32.mrb[78].mxu1  ;;  %v10043_v50 = vpop.f32.mrb[79].mxu0 }
 0x35a   :  { %v7920_v51 = vadd.f32 %v10041_v45, %v7880_v36  ;;  %v10065_v52 = vpop.f32.mrb[79].mxu1 }
 0x35c   :  { %v7960_v54 = vadd.f32 %v10063_v48, %v7920_v51 }
 0x376   :  { %v10083_v58 = vpop.f32.mrb[80].mxu0 }
 0x377   :  { %v10105_v59 = vpop.f32.mrb[80].mxu1  ;;  %v10084_v60 = vpop.f32.mrb[81].mxu0 }
 0x378   :  { %v10106_v61 = vpop.f32.mrb[81].mxu1  ;;  %v10085_v62 = vadd.f32 %v10084_v60, %v10083_v58  ;;  %v10086_v0 = vpop.f32.mrb[82].mxu0 }
 0x379   :  { %v10107_v63 = vadd.f32 %v10106_v61, %v10105_v59  ;;  %v10108_v1 = vpop.f32.mrb[82].mxu1  ;;  %v10087_v2 = vpop.f32.mrb[83].mxu0 }
 0x37a   :  { %v10109_v3 = vpop.f32.mrb[83].mxu1  ;;  %v8000_v4 = vadd.f32 %v10085_v62, %v7960_v54 }
 0x37c   :  { %v8040_v5 = vadd.f32 %v10107_v63, %v8000_v4 }
 0x396   :  { %v10127_v6 = vpop.f32.mrb[84].mxu0 }
 0x397   :  { %v10149_v7 = vpop.f32.mrb[84].mxu1  ;;  %v10128_v8 = vpop.f32.mrb[85].mxu0 }
 0x398   :  { %v10129_v9 = vadd.f32 %v10128_v8, %v10127_v6  ;;  %v10150_v10 = vpop.f32.mrb[85].mxu1  ;;  %v10130_v11 = vpop.f32.mrb[86].mxu0 }
 0x399   :  { %v10151_v12 = vadd.f32 %v10150_v10, %v10149_v7  ;;  %v10152_v13 = vpop.f32.mrb[86].mxu1  ;;  %v10131_v14 = vpop.f32.mrb[87].mxu0 }
 0x39a   :  { %v8080_v15 = vadd.f32 %v10129_v9, %v8040_v5  ;;  %v10153_v16 = vpop.f32.mrb[87].mxu1 }
 0x39c   :  { %v8120_v17 = vadd.f32 %v10151_v12, %v8080_v15 }
 0x3b6   :  { %v10171_v18 = vpop.f32.mrb[88].mxu0 }
 0x3b7   :  { %v10193_v19 = vpop.f32.mrb[88].mxu1  ;;  %v10172_v20 = vpop.f32.mrb[89].mxu0 }
 0x3b8   :  { %v10173_v21 = vadd.f32 %v10172_v20, %v10171_v18  ;;  %v10194_v22 = vpop.f32.mrb[89].mxu1  ;;  %v10174_v23 = vpop.f32.mrb[90].mxu0 }
 0x3b9   :  { %v10195_v24 = vadd.f32 %v10194_v22, %v10193_v19  ;;  %v10196_v25 = vpop.f32.mrb[90].mxu1  ;;  %v10175_v26 = vpop.f32.mrb[91].mxu0 }
 0x3ba   :  { %v8160_v27 = vadd.f32 %v10173_v21, %v8120_v17  ;;  %v10197_v28 = vpop.f32.mrb[91].mxu1 }
 0x3bc   :  { %v8200_v29 = vadd.f32 %v10195_v24, %v8160_v27 }
 0x3d6   :  { %v10215_v30 = vpop.f32.mrb[92].mxu0 }
 0x3d7   :  { %v10237_v31 = vpop.f32.mrb[92].mxu1  ;;  %v10216_v32 = vpop.f32.mrb[93].mxu0 }
 0x3d8   :  { %v10238_v33 = vpop.f32.mrb[93].mxu1  ;;  %v10217_v34 = vadd.f32 %v10216_v32, %v10215_v30  ;;  %v10218_v36 = vpop.f32.mrb[94].mxu0 }
 0x3d9   :  { %v10239_v35 = vadd.f32 %v10238_v33, %v10237_v31  ;;  %v10240_v37 = vpop.f32.mrb[94].mxu1  ;;  %v10219_v38 = vpop.f32.mrb[95].mxu0 }
 0x3da   :  { %v10241_v39 = vpop.f32.mrb[95].mxu1  ;;  %v8240_v40 = vadd.f32 %v10217_v34, %v8200_v29 }
 0x3dc   :  { %v8280_v41 = vadd.f32 %v10239_v35, %v8240_v40 }
 0x3de   :  { %v8285_v42 = vmax.f32 %v8280_v41, 0.0 }
 0x3e0   :  { %v8286_v43 = vpack.c.bf16 %v8285_v42, %v8285_v42 }
 0x3e2   :  { %10266 = vmatmul.mubr.msk.bf16.vlgmr.msra.gmra.mrb[96].mxu0 %vm8346_vm2, %v8286_v43 }
 0x4b5   :  { %v8388_v45 = vpop.f32.mrb[96].mxu0 }
 0x4b6   :  { %v8389_v46 = vadd.f32 %v9178_v44, %v8388_v45  ;;  %v10267_v47 = vpop.f32.mrb[97].mxu0 }
 0x4b7   :  { %v8391_v48 = vpop.f32.mrb[98].mxu0 }
 0x4b8   :  { %8394 = vst [vmem:[#allocation2] sm:$0xff] %v8389_v46  ;;  %v10268_v49 = vpop.f32.mrb[99].mxu0 }
 0x4b9   :  { %11058 = shalt.err (!%p11055_p4)
}
 0x4ba   :  { %s11059_s4 = scalar_lea.hbm %s13788_s5, 128 }
 0x4bb   :  { %p11060_p5 = scmp.ne.s32.totalorder %s13788_s5, %s11059_s4  ;;  %p11063_p6 = scmp.lt.u32.totalorder %s11059_s4, %s13788_s5 }
 0x4bd   :  { %p11065_p7 = pnand %p11063_p6, %p11060_p5 }
 0x4bf   :  { %11068 = shalt.err (!%p11065_p7)
}
 0x4c0   :  { %8404 = dma.vmem_to_hbm [thread:$0]  %s8402_s16, 128, %s13788_s5, [#allocation3]  }
 0x4c1   :  { %11069 = dma.done.wait [#allocation3], 128  }
 0x4c2   :  { %11070 = vsyncadd [#allocation3], 4294967168 }
 0x4c3   :  { %8408 = vsyncpa [#allocation3], 1 }

</bundles_post_ra>
